<compile_context>
chip_gen: v7x
topology: tpu7x:2x2x1
jax: 0.10.0
libtpu: 0.0.40
codegen_flags: <defaults>
</compile_context>

<pallas_src>
import functools
import math

import jax
import jax.numpy as jnp
from jax.experimental import pallas as pl
from jax.experimental.pallas import tpu as pltpu


VMEM_LIMIT = 32 * 1024 * 1024   # explicit scoped-VMEM cap; valid on v5e/v6e/v7x


def _stage_geom(h, w):
    """Geometry for one conv(3x3,pad=1) + maxpool(2x2) stage (quad-split form)."""
    hp = h + 3
    hp += hp % 2
    wp = w + 2
    wp += wp % 2
    return hp, wp, hp // 2, wp // 2, h // 2, w // 2


def _choose_btile(n):
    """Images per grid step: amortize step overhead, but keep >=2 grid steps
    when possible so both v7x TensorCores get work."""
    bt = 8
    while bt > 1 and -(-n // bt) < 2:
        bt //= 2
    return bt


# ---------------------------------------------------------------------------
# Pallas kernels
# ---------------------------------------------------------------------------

def _conv1_pool_kernel(x_ref, w_ref, ss_ref, o_ref):
    """Stage 1: conv1(1->32,3x3,pad1)+BN+ReLU+maxpool2, im2col form.

    x_ref : (4, M, 9)  per pool-window-parity im2col patches, batch folded in M
    w_ref : (9, 32)    conv taps (ky*3+kx)
    ss_ref: (2, 32)    row 0 = BN scale, row 1 = BN shift (conv bias folded)
    o_ref : (M, 32)    pooled output, row = b*196 + oy*14 + ox
    """
    scale = ss_ref[0:1, :]
    shift = ss_ref[1:2, :]
    pooled = None
    for p in range(4):                       # pool-window parity (py, px)
        acc = jnp.dot(x_ref[p], w_ref[...], preferred_element_type=jnp.float32)
        a = jnp.maximum(acc * scale + shift, 0.0)      # f32 epilogue (v5e-safe)
        pooled = a if pooled is None else jnp.maximum(pooled, a)
    o_ref[...] = pooled.astype(o_ref.dtype)


def _conv_pool_kernel(x_ref, w_ref, ss_ref, o_ref, *, wh, rows):
    """Stages 2/3: fused 3x3 conv (pad1)+BN+ReLU+maxpool2 for a batch tile.

    x_ref : (BT, 4, Hh*Wh, Cin)  parity(quadrant)-split, zero-padded inputs
    w_ref : (9, Cin, Cout)       conv taps, REAL channel counts (no K zero-pad)
    ss_ref: (2, Cout)            BN scale / shift
    o_ref : (BT, rows, Cout)     pooled output; cols u >= Wo (and rounded-up
                                 rows) are junk, masked downstream

    Each tap of each pool-parity accumulator is a contiguous slice of one
    quadrant slab, so the conv is 36 dense (rows x Cin x Cout) matmuls per
    image and the pool is an elementwise max of 4 accumulators.
    """
    bt = o_ref.shape[0]
    scale = ss_ref[0:1, :]
    shift = ss_ref[1:2, :]
    for b in range(bt):                      # static unroll over the batch tile
        pooled = None
        for py in range(2):                  # conv-row parity in the pool window
            for px in range(2):              # conv-col parity in the pool window
                acc = None
                for ky in range(3):
                    for kx in range(3):
                        qy, dy = (py + ky) % 2, (py + ky) // 2
                        qx, dx = (px + kx) % 2, (px + kx) // 2
                        xs = x_ref[b, 2 * qy + qx, pl.ds(dy * wh + dx, rows), :]
                        t = jnp.dot(xs, w_ref[3 * ky + kx],
                                    preferred_element_type=jnp.float32)
                        acc = t if acc is None else acc + t
                a = jnp.maximum(acc * scale + shift, 0.0)
                pooled = a if pooled is None else jnp.maximum(pooled, a)
        o_ref[b] = pooled.astype(o_ref.dtype)


def _fc_kernel(x_ref, w1_ref, b1_ref, w2_ref, b2_ref, o_ref):
    """Fused fc1 (+bias+ReLU) -> fc2 (+bias) for one batch tile."""
    h = jnp.dot(x_ref[...], w1_ref[...], preferred_element_type=jnp.float32)
    h = jnp.maximum(h + b1_ref[...], 0.0)
    # TODO(synk): nn.Dropout(0.5) is identity in eval mode; no kernel op emitted.
    y = jnp.dot(h.astype(w2_ref.dtype), w2_ref[...],
                preferred_element_type=jnp.float32)
    o_ref[...] = y + b2_ref[...]


# ---------------------------------------------------------------------------
# pallas_call wrappers
# ---------------------------------------------------------------------------

def _conv1_pool_stage(patches, w9, ss, out_dtype=jnp.bfloat16):
    nb, _, m1, k = patches.shape
    cout = w9.shape[-1]
    flops = 2 * 4 * m1 * k * cout * nb
    bytes_accessed = (patches.size * patches.dtype.itemsize
                      + w9.size * w9.dtype.itemsize + ss.size * 4
                      + nb * m1 * cout * jnp.dtype(out_dtype).itemsize)
    return pl.pallas_call(
        _conv1_pool_kernel,
        out_shape=jax.ShapeDtypeStruct((nb, m1, cout), out_dtype),
        grid=(nb,),
        in_specs=[
            pl.BlockSpec((None, 4, m1, k), lambda i: (i, 0, 0, 0)),
            pl.BlockSpec((9, cout), lambda i: (0, 0)),
            pl.BlockSpec((2, cout), lambda i: (0, 0)),
        ],
        out_specs=pl.BlockSpec((None, m1, cout), lambda i: (i, 0, 0)),
        compiler_params=pltpu.CompilerParams(
            dimension_semantics=("parallel",), vmem_limit_bytes=VMEM_LIMIT),
        cost_estimate=pl.CostEstimate(flops=flops, transcendentals=0,
                                      bytes_accessed=bytes_accessed),
    )(patches, w9, ss)


def _conv_pool_stage(x_quad, w9, ss, *, wh, rows, out_dtype=jnp.bfloat16):
    nb, bt, _, slab, cin = x_quad.shape
    cout = w9.shape[-1]
    assert wh + 1 + rows <= slab, "shifted slab slice would leave the quadrant"
    flops = 2 * 36 * rows * cin * cout * bt * nb
    bytes_accessed = (x_quad.size * x_quad.dtype.itemsize
                      + w9.size * w9.dtype.itemsize + ss.size * 4
                      + nb * bt * rows * cout * jnp.dtype(out_dtype).itemsize)
    kern = functools.partial(_conv_pool_kernel, wh=wh, rows=rows)
    return pl.pallas_call(
        kern,
        out_shape=jax.ShapeDtypeStruct((nb, bt, rows, cout), out_dtype),
        grid=(nb,),
        in_specs=[
            pl.BlockSpec((None, bt, 4, slab, cin), lambda i: (i, 0, 0, 0, 0)),
            pl.BlockSpec((9, cin, cout), lambda i: (0, 0, 0)),
            pl.BlockSpec((2, cout), lambda i: (0, 0)),
        ],
        out_specs=pl.BlockSpec((None, bt, rows, cout), lambda i: (i, 0, 0, 0)),
        compiler_params=pltpu.CompilerParams(
            dimension_semantics=("parallel",), vmem_limit_bytes=VMEM_LIMIT),
        cost_estimate=pl.CostEstimate(flops=flops, transcendentals=0,
                                      bytes_accessed=bytes_accessed),
    )(x_quad, w9, ss)


def _fc_fused(x, w1, b1, w2, b2, *, tm):
    n, k1 = x.shape
    flops = 2 * n * (k1 * 128 + 128 * 128)
    bytes_accessed = (x.size * x.dtype.itemsize + w1.size * w1.dtype.itemsize
                      + w2.size * w2.dtype.itemsize + (b1.size + b2.size) * 4
                      + n * 128 * 4)
    return pl.pallas_call(
        _fc_kernel,
        out_shape=jax.ShapeDtypeStruct((n, 128), jnp.float32),
        grid=(n // tm,),
        in_specs=[
            pl.BlockSpec((tm, k1), lambda i: (i, 0)),
            pl.BlockSpec((k1, 128), lambda i: (0, 0)),
            pl.BlockSpec((1, 128), lambda i: (0, 0)),
            pl.BlockSpec((128, 128), lambda i: (0, 0)),
            pl.BlockSpec((1, 128), lambda i: (0, 0)),
        ],
        out_specs=pl.BlockSpec((tm, 128), lambda i: (i, 0)),
        compiler_params=pltpu.CompilerParams(
            dimension_semantics=("parallel",), vmem_limit_bytes=VMEM_LIMIT),
        cost_estimate=pl.CostEstimate(flops=flops, transcendentals=0,
                                      bytes_accessed=bytes_accessed),
    )(x, w1, b1, w2, b2)


# ---------------------------------------------------------------------------
# Wrapper glue (layout prep; touches only tiny activations once per stage)
# ---------------------------------------------------------------------------

def _im2col_pool_parity(x_hw):
    """(N,H,W) -> (N, 4, (H/2)*(W/2), 9): 3x3 taps for each pool-window parity."""
    n, h, w = x_hw.shape
    ho, wo = h // 2, w // 2
    xp = jnp.pad(x_hw, ((0, 0), (1, 1), (1, 1)))
    quads = []
    for py in range(2):
        for px in range(2):
            taps = []
            for ky in range(3):
                for kx in range(3):
                    r0, c0 = py + ky, px + kx
                    taps.append(xp[:, r0:r0 + 2 * ho - 1:2, c0:c0 + 2 * wo - 1:2])
            quads.append(jnp.stack(taps, axis=-1).reshape(n, ho * wo, 9))
    return jnp.stack(quads, axis=1)


def _quad_split(a, b_tile):
    """(N,H,W,C) -> (N/BT, BT, 4, Hh*Wh, C), real channel count (no lane pad).

    [nb, b, 2*qy+qx, y2*Wh+u, c] = xpad[n, 2*y2+qy, 2*u+qx, c]
    """
    n, h, w, c = a.shape
    hp, wp, hh, wh, _, _ = _stage_geom(h, w)
    x = jnp.pad(a, ((0, 0), (1, hp - h - 1), (1, wp - w - 1), (0, 0)))
    x = x.reshape(n, hh, 2, wh, 2, c)
    x = jnp.transpose(x, (0, 2, 4, 1, 3, 5))          # (N, 2, 2, Hh, Wh, C)
    return x.reshape(n // b_tile, b_tile, 4, hh * wh, c)


# ---------------------------------------------------------------------------
# Parameter construction (deterministic, synthetic) + packing for the kernels
# ---------------------------------------------------------------------------

def init_params(key):
    ks = jax.random.split(key, 16)
    p = {}
    # conv weights: (Cout, Cin, 3, 3), PyTorch layout
    p["w1"] = 0.1 * jax.random.normal(ks[0], (32, 1, 3, 3), jnp.float32)
    p["b1"] = 0.01 * jax.random.normal(ks[1], (32,), jnp.float32)
    p["w2"] = 0.05 * jax.random.normal(ks[2], (64, 32, 3, 3), jnp.float32)
    p["b2"] = 0.01 * jax.random.normal(ks[3], (64,), jnp.float32)
    p["w3"] = 0.05 * jax.random.normal(ks[4], (64, 64, 3, 3), jnp.float32)
    p["b3"] = 0.01 * jax.random.normal(ks[5], (64,), jnp.float32)
    # BatchNorm params (gamma, beta, running_mean, running_var)
    for i, c, k0 in (("1", 32, 6), ("2", 64, 8), ("3", 64, 10)):
        p["g" + i] = 1.0 + 0.1 * jax.random.normal(ks[k0], (c,), jnp.float32)
        p["be" + i] = 0.1 * jax.random.normal(ks[k0 + 1], (c,), jnp.float32)
        p["m" + i] = 0.05 * jax.random.normal(jax.random.fold_in(ks[k0], 1), (c,), jnp.float32)
        p["v" + i] = 1.0 + 0.2 * jax.random.uniform(jax.random.fold_in(ks[k0], 2), (c,), jnp.float32)
    # fc layers as (in, out) matmul matrices; fc1 input index order is the
    # PyTorch NCHW flatten order c*9 + h*3 + w.
    p["fc1_w"] = 0.05 * jax.random.normal(ks[12], (64 * 3 * 3, 128), jnp.float32)
    p["fc1_b"] = 0.01 * jax.random.normal(ks[13], (128,), jnp.float32)
    p["fc2_w"] = 0.05 * jax.random.normal(ks[14], (128, 10), jnp.float32)
    p["fc2_b"] = 0.01 * jax.random.normal(ks[15], (10,), jnp.float32)
    return p


def prepare_params(p):
    """One-time packing: fold BN, repack conv/fc weights, cast MXU paths to bf16."""
    eps = 1e-5

    def fold_bn(b, g, beta, mean, var):
        scale = g / jnp.sqrt(var + eps)
        shift = (b - mean) * scale + beta
        return jnp.stack([scale, shift]).astype(jnp.float32)     # (2, C)

    pp = {}
    # conv1: (32,1,3,3) -> (9, 32), tap index ky*3+kx
    pp["w1"] = jnp.transpose(p["w1"][:, 0], (1, 2, 0)).reshape(9, 32).astype(jnp.bfloat16)
    pp["ss1"] = fold_bn(p["b1"], p["g1"], p["be1"], p["m1"], p["v1"])
    # conv2/3: (Cout,Cin,3,3) -> (9, Cin, Cout), real channel counts
    pp["w2"] = jnp.transpose(p["w2"], (2, 3, 1, 0)).reshape(9, 32, 64).astype(jnp.bfloat16)
    pp["ss2"] = fold_bn(p["b2"], p["g2"], p["be2"], p["m2"], p["v2"])
    pp["w3"] = jnp.transpose(p["w3"], (2, 3, 1, 0)).reshape(9, 64, 64).astype(jnp.bfloat16)
    pp["ss3"] = fold_bn(p["b3"], p["g3"], p["be3"], p["m3"], p["v3"])

    # fc1: re-pack PyTorch NCHW-flatten rows (c*9 + h*3 + w) into the stage-3
    # kernel-output layout (row = h*Wh3 + u, channel c); Wh3=5 incl. junk cols,
    # rows padded to 16; junk/pad positions get zero weight rows.
    _, _, _, wh3, ho3, wo3 = _stage_geom(7, 7)                   # wh3=5, ho3=wo3=3
    rows3 = ho3 * wh3
    rows3 += (-rows3) % 8                                        # 16
    w = p["fc1_w"].reshape(64, ho3, wo3, 128)                    # (c, h, w, out)
    w = jnp.transpose(w, (1, 2, 0, 3))                           # (h, w, c, out)
    w = jnp.pad(w, ((0, 0), (0, wh3 - wo3), (0, 0), (0, 0)))     # (3, 5, 64, 128)
    w = w.reshape(ho3 * wh3, 64, 128)
    w = jnp.pad(w, ((0, rows3 - ho3 * wh3), (0, 0), (0, 0)))     # (16, 64, 128)
    pp["fc1_w"] = w.reshape(rows3 * 64, 128).astype(jnp.bfloat16)
    pp["fc1_b"] = p["fc1_b"].reshape(1, 128).astype(jnp.float32)
    pp["fc2_w"] = jnp.pad(p["fc2_w"], ((0, 0), (0, 118))).astype(jnp.bfloat16)
    pp["fc2_b"] = jnp.pad(p["fc2_b"], (0, 118)).reshape(1, 128).astype(jnp.float32)
    return pp


# ---------------------------------------------------------------------------
# Forward pass
# ---------------------------------------------------------------------------

@jax.jit
def net_forward(x_nchw, pp):
    n = x_nchw.shape[0]                                          # (N, 1, 28, 28)
    bt = _choose_btile(n)
    nb = -(-n // bt)
    n_pad = nb * bt

    x = x_nchw[:, 0, :, :].astype(jnp.float32)                   # (N, 28, 28)
    if n_pad != n:
        x = jnp.pad(x, ((0, n_pad - n), (0, 0), (0, 0)))
    h, w = x.shape[1], x.shape[2]
    ho, wo = h // 2, w // 2

    # ---- stage 1: conv1+bn1+relu+pool (im2col, batch folded into M, K=9 MXU) ----
    patches = _im2col_pool_parity(x)                             # (Np, 4, 196, 9)
    patches = (patches.reshape(nb, bt, 4, ho * wo, 9)
               .transpose(0, 2, 1, 3, 4)
               .reshape(nb, 4, bt * ho * wo, 9)
               .astype(jnp.bfloat16))
    y = _conv1_pool_stage(patches, pp["w1"], pp["ss1"])          # (nb, bt*196, 32)
    x = y.reshape(n_pad, ho, wo, 32)                             # (Np, 14, 14, 32)

    # ---- stage 2: conv2+bn2+relu+pool (quad-split slabs, real K=32) ----
    _, _, hh, wh, ho, wo = _stage_geom(x.shape[1], x.shape[2])
    rows = ho * wh                                               # 56
    xq = _quad_split(x, bt)                                      # (nb, bt, 4, 72, 32)
    y = _conv_pool_stage(xq, pp["w2"], pp["ss2"], wh=wh, rows=rows)
    x = y.reshape(n_pad, ho, wh, 64)[:, :, :wo, :]               # (Np, 7, 7, 64)

    # ---- stage 3: conv3+bn3+relu+pool (real K=64, rows rounded to 16) ----
    _, _, hh, wh, ho, wo = _stage_geom(x.shape[1], x.shape[2])
    rows = ho * wh
    rows += (-rows) % 8                                          # 15 -> 16
    xq = _quad_split(x, bt)                                      # (nb, bt, 4, 25, 64)
    y = _conv_pool_stage(xq, pp["w3"], pp["ss3"], wh=wh, rows=rows)
    # flatten as-is; junk columns / pad row are zero-masked by the packed fc1 weight
    xf = y.reshape(n_pad, rows * 64)                             # (Np, 1024) bf16

    # ---- fc1(+ReLU) + dropout(identity) + fc2, one fused kernel tiled over batch ----
    tm = math.gcd(n_pad, 512)
    out = _fc_fused(xf, pp["fc1_w"], pp["fc1_b"], pp["fc2_w"], pp["fc2_b"], tm=tm)
    return out[:n, :10]


if __name__ == "__main__":
    key = jax.random.PRNGKey(0)
    pkey, xkey = jax.random.split(key)
    params = init_params(pkey)
    prepped = prepare_params(params)

    # MNIST-style input: batch=2, 1 channel, 28x28 (-> 3x3 after three 2x2 pools)
    x = jax.random.normal(xkey, (2, 1, 28, 28), jnp.float32)

    out = net_forward(x, prepped)
    out = jax.block_until_ready(out)
    assert out.shape == (2, 10), out.shape
    assert bool(jnp.all(jnp.isfinite(out)))
    print("KERNEL_OK")
</pallas_src>

<mosaic_0001>
module attributes {stable_mosaic.version = 11 : i64} {
  func.func @_conv1_pool_kernel(%arg0: i32, %arg1: memref<1x4x196x9xbf16, #tpu.memory_space<vmem>>, %arg2: memref<9x32xbf16, #tpu.memory_space<vmem>>, %arg3: memref<2x32xf32, #tpu.memory_space<vmem>>, %arg4: memref<1x196x32xbf16, #tpu.memory_space<vmem>>) attributes {dimension_semantics = [#tpu.dimension_semantics<parallel>], iteration_bounds = array<i64: 2>, scalar_prefetch = 0 : i64, scratch_operands = 0 : i64, tpu.core_type = #tpu.core_type<tc>, window_params = [{transform_indices = @transform_0, window_bounds = array<i64: 1, 4, 196, 9>}, {pipeline_mode = #tpu.pipeline_mode<synchronous>, transform_indices = @transform_1, window_bounds = array<i64: 9, 32>}, {pipeline_mode = #tpu.pipeline_mode<synchronous>, transform_indices = @transform_2, window_bounds = array<i64: 2, 32>}, {transform_indices = @transform_3, window_bounds = array<i64: 1, 196, 32>}]} {
    %c0 = arith.constant 0 : index
    %c0_0 = arith.constant 0 : index
    %0 = vector.load %arg3[%c0, %c0_0] : memref<2x32xf32, #tpu.memory_space<vmem>>, vector<1x32xf32>
    %c1 = arith.constant 1 : index
    %c0_1 = arith.constant 0 : index
    %1 = vector.load %arg3[%c1, %c0_1] : memref<2x32xf32, #tpu.memory_space<vmem>>, vector<1x32xf32>
    %c0_2 = arith.constant 0 : index
    %c0_3 = arith.constant 0 : index
    %c0_4 = arith.constant 0 : index
    %c0_5 = arith.constant 0 : index
    %2 = vector.load %arg1[%c0_2, %c0_3, %c0_4, %c0_5] : memref<1x4x196x9xbf16, #tpu.memory_space<vmem>>, vector<1x1x196x9xbf16>
    %3 = vector.shape_cast %2 : vector<1x1x196x9xbf16> to vector<196x9xbf16>
    %c0_6 = arith.constant 0 : index
    %c0_7 = arith.constant 0 : index
    %4 = vector.load %arg2[%c0_6, %c0_7] : memref<9x32xbf16, #tpu.memory_space<vmem>>, vector<9x32xbf16>
    %cst = arith.constant dense<0.000000e+00> : vector<196x32xf32>
    %5 = tpu.matmul %3, %4, %cst {dimension_numbers = #tpu.dot_dimension_numbers<[1], [0], [0], [1], [0, 0, 1, 1], [], []>} : vector<196x9xbf16>, vector<9x32xbf16>, vector<196x32xf32> -> vector<196x32xf32>
    %6 = vector.broadcast %0 : vector<1x32xf32> to vector<196x32xf32>
    %7 = arith.mulf %5, %6 : vector<196x32xf32>
    %8 = vector.broadcast %1 : vector<1x32xf32> to vector<196x32xf32>
    %9 = arith.addf %7, %8 : vector<196x32xf32>
    %cst_8 = arith.constant 0.000000e+00 : f32
    %10 = vector.broadcast %cst_8 : f32 to vector<196x32xf32>
    %11 = arith.maximumf %9, %10 : vector<196x32xf32>
    %c0_9 = arith.constant 0 : index
    %c1_10 = arith.constant 1 : index
    %c0_11 = arith.constant 0 : index
    %c0_12 = arith.constant 0 : index
    %12 = vector.load %arg1[%c0_9, %c1_10, %c0_11, %c0_12] : memref<1x4x196x9xbf16, #tpu.memory_space<vmem>>, vector<1x1x196x9xbf16>
    %13 = vector.shape_cast %12 : vector<1x1x196x9xbf16> to vector<196x9xbf16>
    %c0_13 = arith.constant 0 : index
    %c0_14 = arith.constant 0 : index
    %14 = vector.load %arg2[%c0_13, %c0_14] : memref<9x32xbf16, #tpu.memory_space<vmem>>, vector<9x32xbf16>
    %cst_15 = arith.constant dense<0.000000e+00> : vector<196x32xf32>
    %15 = tpu.matmul %13, %14, %cst_15 {dimension_numbers = #tpu.dot_dimension_numbers<[1], [0], [0], [1], [0, 0, 1, 1], [], []>} : vector<196x9xbf16>, vector<9x32xbf16>, vector<196x32xf32> -> vector<196x32xf32>
    %16 = vector.broadcast %0 : vector<1x32xf32> to vector<196x32xf32>
    %17 = arith.mulf %15, %16 : vector<196x32xf32>
    %18 = vector.broadcast %1 : vector<1x32xf32> to vector<196x32xf32>
    %19 = arith.addf %17, %18 : vector<196x32xf32>
    %cst_16 = arith.constant 0.000000e+00 : f32
    %20 = vector.broadcast %cst_16 : f32 to vector<196x32xf32>
    %21 = arith.maximumf %19, %20 : vector<196x32xf32>
    %22 = arith.maximumf %11, %21 : vector<196x32xf32>
    %c0_17 = arith.constant 0 : index
    %c2 = arith.constant 2 : index
    %c0_18 = arith.constant 0 : index
    %c0_19 = arith.constant 0 : index
    %23 = vector.load %arg1[%c0_17, %c2, %c0_18, %c0_19] : memref<1x4x196x9xbf16, #tpu.memory_space<vmem>>, vector<1x1x196x9xbf16>
    %24 = vector.shape_cast %23 : vector<1x1x196x9xbf16> to vector<196x9xbf16>
    %c0_20 = arith.constant 0 : index
    %c0_21 = arith.constant 0 : index
    %25 = vector.load %arg2[%c0_20, %c0_21] : memref<9x32xbf16, #tpu.memory_space<vmem>>, vector<9x32xbf16>
    %cst_22 = arith.constant dense<0.000000e+00> : vector<196x32xf32>
    %26 = tpu.matmul %24, %25, %cst_22 {dimension_numbers = #tpu.dot_dimension_numbers<[1], [0], [0], [1], [0, 0, 1, 1], [], []>} : vector<196x9xbf16>, vector<9x32xbf16>, vector<196x32xf32> -> vector<196x32xf32>
    %27 = vector.broadcast %0 : vector<1x32xf32> to vector<196x32xf32>
    %28 = arith.mulf %26, %27 : vector<196x32xf32>
    %29 = vector.broadcast %1 : vector<1x32xf32> to vector<196x32xf32>
    %30 = arith.addf %28, %29 : vector<196x32xf32>
    %cst_23 = arith.constant 0.000000e+00 : f32
    %31 = vector.broadcast %cst_23 : f32 to vector<196x32xf32>
    %32 = arith.maximumf %30, %31 : vector<196x32xf32>
    %33 = arith.maximumf %22, %32 : vector<196x32xf32>
    %c0_24 = arith.constant 0 : index
    %c3 = arith.constant 3 : index
    %c0_25 = arith.constant 0 : index
    %c0_26 = arith.constant 0 : index
    %34 = vector.load %arg1[%c0_24, %c3, %c0_25, %c0_26] : memref<1x4x196x9xbf16, #tpu.memory_space<vmem>>, vector<1x1x196x9xbf16>
    %35 = vector.shape_cast %34 : vector<1x1x196x9xbf16> to vector<196x9xbf16>
    %c0_27 = arith.constant 0 : index
    %c0_28 = arith.constant 0 : index
    %36 = vector.load %arg2[%c0_27, %c0_28] : memref<9x32xbf16, #tpu.memory_space<vmem>>, vector<9x32xbf16>
    %cst_29 = arith.constant dense<0.000000e+00> : vector<196x32xf32>
    %37 = tpu.matmul %35, %36, %cst_29 {dimension_numbers = #tpu.dot_dimension_numbers<[1], [0], [0], [1], [0, 0, 1, 1], [], []>} : vector<196x9xbf16>, vector<9x32xbf16>, vector<196x32xf32> -> vector<196x32xf32>
    %38 = vector.broadcast %0 : vector<1x32xf32> to vector<196x32xf32>
    %39 = arith.mulf %37, %38 : vector<196x32xf32>
    %40 = vector.broadcast %1 : vector<1x32xf32> to vector<196x32xf32>
    %41 = arith.addf %39, %40 : vector<196x32xf32>
    %cst_30 = arith.constant 0.000000e+00 : f32
    %42 = vector.broadcast %cst_30 : f32 to vector<196x32xf32>
    %43 = arith.maximumf %41, %42 : vector<196x32xf32>
    %44 = arith.maximumf %33, %43 : vector<196x32xf32>
    %45 = arith.truncf %44 : vector<196x32xf32> to vector<196x32xbf16>
    %c0_31 = arith.constant 0 : index
    %c0_32 = arith.constant 0 : index
    %c0_33 = arith.constant 0 : index
    %46 = vector.load %arg4[%c0_31, %c0_32, %c0_33] : memref<1x196x32xbf16, #tpu.memory_space<vmem>>, vector<1x196x32xbf16>
    %47 = vector.shape_cast %46 : vector<1x196x32xbf16> to vector<196x32xbf16>
    %48 = vector.shape_cast %45 : vector<196x32xbf16> to vector<1x196x32xbf16>
    tpu.vector_store %arg4[%c0_31, %c0_32, %c0_33], %48 {strides = array<i32>} : memref<1x196x32xbf16, #tpu.memory_space<vmem>>, vector<1x196x32xbf16>,
    return
  }
  func.func @transform_0(%arg0: i32) -> (i32, i32, i32, i32) {
    %c0_i32 = arith.constant 0 : i32
    %c0_i32_0 = arith.constant 0 : i32
    %c0_i32_1 = arith.constant 0 : i32
    %c0_i32_2 = arith.constant 0 : i32
    return %arg0, %c0_i32, %c0_i32_0, %c0_i32_1 : i32, i32, i32, i32
  }
  func.func @transform_1(%arg0: i32) -> (i32, i32) {
    %c0_i32 = arith.constant 0 : i32
    %c0_i32_0 = arith.constant 0 : i32
    %c0_i32_1 = arith.constant 0 : i32
    return %c0_i32, %c0_i32_0 : i32, i32
  }
  func.func @transform_2(%arg0: i32) -> (i32, i32) {
    %c0_i32 = arith.constant 0 : i32
    %c0_i32_0 = arith.constant 0 : i32
    %c0_i32_1 = arith.constant 0 : i32
    return %c0_i32, %c0_i32_0 : i32, i32
  }
  func.func @transform_3(%arg0: i32) -> (i32, i32, i32) {
    %c0_i32 = arith.constant 0 : i32
    %c0_i32_0 = arith.constant 0 : i32
    %c0_i32_1 = arith.constant 0 : i32
    return %arg0, %c0_i32, %c0_i32_0 : i32, i32, i32
  }
}

module attributes {stable_mosaic.version = 11 : i64} {
  func.func @_conv_pool_kernel(%arg0: i32, %arg1: memref<1x1x4x72x32xbf16, #tpu.memory_space<vmem>>, %arg2: memref<9x32x64xbf16, #tpu.memory_space<vmem>>, %arg3: memref<2x64xf32, #tpu.memory_space<vmem>>, %arg4: memref<1x1x56x64xbf16, #tpu.memory_space<vmem>>) attributes {dimension_semantics = [#tpu.dimension_semantics<parallel>], iteration_bounds = array<i64: 2>, scalar_prefetch = 0 : i64, scratch_operands = 0 : i64, tpu.core_type = #tpu.core_type<tc>, window_params = [{transform_indices = @transform_0, window_bounds = array<i64: 1, 1, 4, 72, 32>}, {pipeline_mode = #tpu.pipeline_mode<synchronous>, transform_indices = @transform_1, window_bounds = array<i64: 9, 32, 64>}, {pipeline_mode = #tpu.pipeline_mode<synchronous>, transform_indices = @transform_2, window_bounds = array<i64: 2, 64>}, {transform_indices = @transform_3, window_bounds = array<i64: 1, 1, 56, 64>}]} {
    %c0 = arith.constant 0 : index
    %c0_0 = arith.constant 0 : index
    %0 = vector.load %arg3[%c0, %c0_0] : memref<2x64xf32, #tpu.memory_space<vmem>>, vector<1x64xf32>
    %c1 = arith.constant 1 : index
    %c0_1 = arith.constant 0 : index
    %1 = vector.load %arg3[%c1, %c0_1] : memref<2x64xf32, #tpu.memory_space<vmem>>, vector<1x64xf32>
    %c0_2 = arith.constant 0 : index
    %c0_3 = arith.constant 0 : index
    %c0_4 = arith.constant 0 : index
    %c0_5 = arith.constant 0 : index
    %c0_6 = arith.constant 0 : index
    %2 = vector.load %arg1[%c0_2, %c0_3, %c0_4, %c0_5, %c0_6] : memref<1x1x4x72x32xbf16, #tpu.memory_space<vmem>>, vector<1x1x1x56x32xbf16>
    %3 = vector.shape_cast %2 : vector<1x1x1x56x32xbf16> to vector<56x32xbf16>
    %c0_7 = arith.constant 0 : index
    %c0_8 = arith.constant 0 : index
    %c0_9 = arith.constant 0 : index
    %4 = vector.load %arg2[%c0_7, %c0_8, %c0_9] : memref<9x32x64xbf16, #tpu.memory_space<vmem>>, vector<1x32x64xbf16>
    %5 = vector.shape_cast %4 : vector<1x32x64xbf16> to vector<32x64xbf16>
    %cst = arith.constant dense<0.000000e+00> : vector<56x64xf32>
    %6 = tpu.matmul %3, %5, %cst {dimension_numbers = #tpu.dot_dimension_numbers<[1], [0], [0], [1], [0, 0, 1, 1], [], []>} : vector<56x32xbf16>, vector<32x64xbf16>, vector<56x64xf32> -> vector<56x64xf32>
    %c0_10 = arith.constant 0 : index
    %c0_11 = arith.constant 0 : index
    %c1_12 = arith.constant 1 : index
    %c0_13 = arith.constant 0 : index
    %c0_14 = arith.constant 0 : index
    %7 = vector.load %arg1[%c0_10, %c0_11, %c1_12, %c0_13, %c0_14] : memref<1x1x4x72x32xbf16, #tpu.memory_space<vmem>>, vector<1x1x1x56x32xbf16>
    %8 = vector.shape_cast %7 : vector<1x1x1x56x32xbf16> to vector<56x32xbf16>
    %c1_15 = arith.constant 1 : index
    %c0_16 = arith.constant 0 : index
    %c0_17 = arith.constant 0 : index
    %9 = vector.load %arg2[%c1_15, %c0_16, %c0_17] : memref<9x32x64xbf16, #tpu.memory_space<vmem>>, vector<1x32x64xbf16>
    %10 = vector.shape_cast %9 : vector<1x32x64xbf16> to vector<32x64xbf16>
    %cst_18 = arith.constant dense<0.000000e+00> : vector<56x64xf32>
    %11 = tpu.matmul %8, %10, %cst_18 {dimension_numbers = #tpu.dot_dimension_numbers<[1], [0], [0], [1], [0, 0, 1, 1], [], []>} : vector<56x32xbf16>, vector<32x64xbf16>, vector<56x64xf32> -> vector<56x64xf32>
    %12 = arith.addf %6, %11 : vector<56x64xf32>
    %c0_19 = arith.constant 0 : index
    %c0_20 = arith.constant 0 : index
    %c0_21 = arith.constant 0 : index
    %c1_22 = arith.constant 1 : index
    %c0_23 = arith.constant 0 : index
    %13 = vector.load %arg1[%c0_19, %c0_20, %c0_21, %c1_22, %c0_23] : memref<1x1x4x72x32xbf16, #tpu.memory_space<vmem>>, vector<1x1x1x56x32xbf16>
    %14 = vector.shape_cast %13 : vector<1x1x1x56x32xbf16> to vector<56x32xbf16>
    %c2 = arith.constant 2 : index
    %c0_24 = arith.constant 0 : index
    %c0_25 = arith.constant 0 : index
    %15 = vector.load %arg2[%c2, %c0_24, %c0_25] : memref<9x32x64xbf16, #tpu.memory_space<vmem>>, vector<1x32x64xbf16>
    %16 = vector.shape_cast %15 : vector<1x32x64xbf16> to vector<32x64xbf16>
    %cst_26 = arith.constant dense<0.000000e+00> : vector<56x64xf32>
    %17 = tpu.matmul %14, %16, %cst_26 {dimension_numbers = #tpu.dot_dimension_numbers<[1], [0], [0], [1], [0, 0, 1, 1], [], []>} : vector<56x32xbf16>, vector<32x64xbf16>, vector<56x64xf32> -> vector<56x64xf32>
    %18 = arith.addf %12, %17 : vector<56x64xf32>
    %c0_27 = arith.constant 0 : index
    %c0_28 = arith.constant 0 : index
    %c2_29 = arith.constant 2 : index
    %c0_30 = arith.constant 0 : index
    %c0_31 = arith.constant 0 : index
    %19 = vector.load %arg1[%c0_27, %c0_28, %c2_29, %c0_30, %c0_31] : memref<1x1x4x72x32xbf16, #tpu.memory_space<vmem>>, vector<1x1x1x56x32xbf16>
    %20 = vector.shape_cast %19 : vector<1x1x1x56x32xbf16> to vector<56x32xbf16>
    %c3 = arith.constant 3 : index
    %c0_32 = arith.constant 0 : index
    %c0_33 = arith.constant 0 : index
    %21 = vector.load %arg2[%c3, %c0_32, %c0_33] : memref<9x32x64xbf16, #tpu.memory_space<vmem>>, vector<1x32x64xbf16>
    %22 = vector.shape_cast %21 : vector<1x32x64xbf16> to vector<32x64xbf16>
    %cst_34 = arith.constant dense<0.000000e+00> : vector<56x64xf32>
    %23 = tpu.matmul %20, %22, %cst_34 {dimension_numbers = #tpu.dot_dimension_numbers<[1], [0], [0], [1], [0, 0, 1, 1], [], []>} : vector<56x32xbf16>, vector<32x64xbf16>, vector<56x64xf32> -> vector<56x64xf32>
    %24 = arith.addf %18, %23 : vector<56x64xf32>
    %c0_35 = arith.constant 0 : index
    %c0_36 = arith.constant 0 : index
    %c3_37 = arith.constant 3 : index
    %c0_38 = arith.constant 0 : index
    %c0_39 = arith.constant 0 : index
    %25 = vector.load %arg1[%c0_35, %c0_36, %c3_37, %c0_38, %c0_39] : memref<1x1x4x72x32xbf16, #tpu.memory_space<vmem>>, vector<1x1x1x56x32xbf16>
    %26 = vector.shape_cast %25 : vector<1x1x1x56x32xbf16> to vector<56x32xbf16>
    %c4 = arith.constant 4 : index
    %c0_40 = arith.constant 0 : index
    %c0_41 = arith.constant 0 : index
    %27 = vector.load %arg2[%c4, %c0_40, %c0_41] : memref<9x32x64xbf16, #tpu.memory_space<vmem>>, vector<1x32x64xbf16>
    %28 = vector.shape_cast %27 : vector<1x32x64xbf16> to vector<32x64xbf16>
    %cst_42 = arith.constant dense<0.000000e+00> : vector<56x64xf32>
    %29 = tpu.matmul %26, %28, %cst_42 {dimension_numbers = #tpu.dot_dimension_numbers<[1], [0], [0], [1], [0, 0, 1, 1], [], []>} : vector<56x32xbf16>, vector<32x64xbf16>, vector<56x64xf32> -> vector<56x64xf32>
    %30 = arith.addf %24, %29 : vector<56x64xf32>
    %c0_43 = arith.constant 0 : index
    %c0_44 = arith.constant 0 : index
    %c2_45 = arith.constant 2 : index
    %c1_46 = arith.constant 1 : index
    %c0_47 = arith.constant 0 : index
    %31 = vector.load %arg1[%c0_43, %c0_44, %c2_45, %c1_46, %c0_47] : memref<1x1x4x72x32xbf16, #tpu.memory_space<vmem>>, vector<1x1x1x56x32xbf16>
    %32 = vector.shape_cast %31 : vector<1x1x1x56x32xbf16> to vector<56x32xbf16>
    %c5 = arith.constant 5 : index
    %c0_48 = arith.constant 0 : index
    %c0_49 = arith.constant 0 : index
    %33 = vector.load %arg2[%c5, %c0_48, %c0_49] : memref<9x32x64xbf16, #tpu.memory_space<vmem>>, vector<1x32x64xbf16>
    %34 = vector.shape_cast %33 : vector<1x32x64xbf16> to vector<32x64xbf16>
    %cst_50 = arith.constant dense<0.000000e+00> : vector<56x64xf32>
    %35 = tpu.matmul %32, %34, %cst_50 {dimension_numbers = #tpu.dot_dimension_numbers<[1], [0], [0], [1], [0, 0, 1, 1], [], []>} : vector<56x32xbf16>, vector<32x64xbf16>, vector<56x64xf32> -> vector<56x64xf32>
    %36 = arith.addf %30, %35 : vector<56x64xf32>
    %c0_51 = arith.constant 0 : index
    %c0_52 = arith.constant 0 : index
    %c0_53 = arith.constant 0 : index
    %c8 = arith.constant 8 : index
    %c0_54 = arith.constant 0 : index
    %37 = vector.load %arg1[%c0_51, %c0_52, %c0_53, %c8, %c0_54] : memref<1x1x4x72x32xbf16, #tpu.memory_space<vmem>>, vector<1x1x1x56x32xbf16>
    %38 = vector.shape_cast %37 : vector<1x1x1x56x32xbf16> to vector<56x32xbf16>
    %c6 = arith.constant 6 : index
    %c0_55 = arith.constant 0 : index
    %c0_56 = arith.constant 0 : index
    %39 = vector.load %arg2[%c6, %c0_55, %c0_56] : memref<9x32x64xbf16, #tpu.memory_space<vmem>>, vector<1x32x64xbf16>
    %40 = vector.shape_cast %39 : vector<1x32x64xbf16> to vector<32x64xbf16>
    %cst_57 = arith.constant dense<0.000000e+00> : vector<56x64xf32>
    %41 = tpu.matmul %38, %40, %cst_57 {dimension_numbers = #tpu.dot_dimension_numbers<[1], [0], [0], [1], [0, 0, 1, 1], [], []>} : vector<56x32xbf16>, vector<32x64xbf16>, vector<56x64xf32> -> vector<56x64xf32>
    %42 = arith.addf %36, %41 : vector<56x64xf32>
    %c0_58 = arith.constant 0 : index
    %c0_59 = arith.constant 0 : index
    %c1_60 = arith.constant 1 : index
    %c8_61 = arith.constant 8 : index
    %c0_62 = arith.constant 0 : index
    %43 = vector.load %arg1[%c0_58, %c0_59, %c1_60, %c8_61, %c0_62] : memref<1x1x4x72x32xbf16, #tpu.memory_space<vmem>>, vector<1x1x1x56x32xbf16>
    %44 = vector.shape_cast %43 : vector<1x1x1x56x32xbf16> to vector<56x32xbf16>
    %c7 = arith.constant 7 : index
    %c0_63 = arith.constant 0 : index
    %c0_64 = arith.constant 0 : index
    %45 = vector.load %arg2[%c7, %c0_63, %c0_64] : memref<9x32x64xbf16, #tpu.memory_space<vmem>>, vector<1x32x64xbf16>
    %46 = vector.shape_cast %45 : vector<1x32x64xbf16> to vector<32x64xbf16>
    %cst_65 = arith.constant dense<0.000000e+00> : vector<56x64xf32>
    %47 = tpu.matmul %44, %46, %cst_65 {dimension_numbers = #tpu.dot_dimension_numbers<[1], [0], [0], [1], [0, 0, 1, 1], [], []>} : vector<56x32xbf16>, vector<32x64xbf16>, vector<56x64xf32> -> vector<56x64xf32>
    %48 = arith.addf %42, %47 : vector<56x64xf32>
    %c0_66 = arith.constant 0 : index
    %c0_67 = arith.constant 0 : index
    %c0_68 = arith.constant 0 : index
    %c9 = arith.constant 9 : index
    %c0_69 = arith.constant 0 : index
    %49 = vector.load %arg1[%c0_66, %c0_67, %c0_68, %c9, %c0_69] : memref<1x1x4x72x32xbf16, #tpu.memory_space<vmem>>, vector<1x1x1x56x32xbf16>
    %50 = vector.shape_cast %49 : vector<1x1x1x56x32xbf16> to vector<56x32xbf16>
    %c8_70 = arith.constant 8 : index
    %c0_71 = arith.constant 0 : index
    %c0_72 = arith.constant 0 : index
    %51 = vector.load %arg2[%c8_70, %c0_71, %c0_72] : memref<9x32x64xbf16, #tpu.memory_space<vmem>>, vector<1x32x64xbf16>
    %52 = vector.shape_cast %51 : vector<1x32x64xbf16> to vector<32x64xbf16>
    %cst_73 = arith.constant dense<0.000000e+00> : vector<56x64xf32>
    %53 = tpu.matmul %50, %52, %cst_73 {dimension_numbers = #tpu.dot_dimension_numbers<[1], [0], [0], [1], [0, 0, 1, 1], [], []>} : vector<56x32xbf16>, vector<32x64xbf16>, vector<56x64xf32> -> vector<56x64xf32>
    %54 = arith.addf %48, %53 : vector<56x64xf32>
    %55 = vector.broadcast %0 : vector<1x64xf32> to vector<56x64xf32>
    %56 = arith.mulf %54, %55 : vector<56x64xf32>
    %57 = vector.broadcast %1 : vector<1x64xf32> to vector<56x64xf32>
    %58 = arith.addf %56, %57 : vector<56x64xf32>
    %cst_74 = arith.constant 0.000000e+00 : f32
    %59 = vector.broadcast %cst_74 : f32 to vector<56x64xf32>
    %60 = arith.maximumf %58, %59 : vector<56x64xf32>
    %c0_75 = arith.constant 0 : index
    %c0_76 = arith.constant 0 : index
    %c1_77 = arith.constant 1 : index
    %c0_78 = arith.constant 0 : index
    %c0_79 = arith.constant 0 : index
    %61 = vector.load %arg1[%c0_75, %c0_76, %c1_77, %c0_78, %c0_79] : memref<1x1x4x72x32xbf16, #tpu.memory_space<vmem>>, vector<1x1x1x56x32xbf16>
    %62 = vector.shape_cast %61 : vector<1x1x1x56x32xbf16> to vector<56x32xbf16>
    %c0_80 = arith.constant 0 : index
    %c0_81 = arith.constant 0 : index
    %c0_82 = arith.constant 0 : index
    %63 = vector.load %arg2[%c0_80, %c0_81, %c0_82] : memref<9x32x64xbf16, #tpu.memory_space<vmem>>, vector<1x32x64xbf16>
    %64 = vector.shape_cast %63 : vector<1x32x64xbf16> to vector<32x64xbf16>
    %cst_83 = arith.constant dense<0.000000e+00> : vector<56x64xf32>
    %65 = tpu.matmul %62, %64, %cst_83 {dimension_numbers = #tpu.dot_dimension_numbers<[1], [0], [0], [1], [0, 0, 1, 1], [], []>} : vector<56x32xbf16>, vector<32x64xbf16>, vector<56x64xf32> -> vector<56x64xf32>
    %c0_84 = arith.constant 0 : index
    %c0_85 = arith.constant 0 : index
    %c0_86 = arith.constant 0 : index
    %c1_87 = arith.constant 1 : index
    %c0_88 = arith.constant 0 : index
    %66 = vector.load %arg1[%c0_84, %c0_85, %c0_86, %c1_87, %c0_88] : memref<1x1x4x72x32xbf16, #tpu.memory_space<vmem>>, vector<1x1x1x56x32xbf16>
    %67 = vector.shape_cast %66 : vector<1x1x1x56x32xbf16> to vector<56x32xbf16>
    %c1_89 = arith.constant 1 : index
    %c0_90 = arith.constant 0 : index
    %c0_91 = arith.constant 0 : index
    %68 = vector.load %arg2[%c1_89, %c0_90, %c0_91] : memref<9x32x64xbf16, #tpu.memory_space<vmem>>, vector<1x32x64xbf16>
    %69 = vector.shape_cast %68 : vector<1x32x64xbf16> to vector<32x64xbf16>
    %cst_92 = arith.constant dense<0.000000e+00> : vector<56x64xf32>
    %70 = tpu.matmul %67, %69, %cst_92 {dimension_numbers = #tpu.dot_dimension_numbers<[1], [0], [0], [1], [0, 0, 1, 1], [], []>} : vector<56x32xbf16>, vector<32x64xbf16>, vector<56x64xf32> -> vector<56x64xf32>
    %71 = arith.addf %65, %70 : vector<56x64xf32>
    %c0_93 = arith.constant 0 : index
    %c0_94 = arith.constant 0 : index
    %c1_95 = arith.constant 1 : index
    %c1_96 = arith.constant 1 : index
    %c0_97 = arith.constant 0 : index
    %72 = vector.load %arg1[%c0_93, %c0_94, %c1_95, %c1_96, %c0_97] : memref<1x1x4x72x32xbf16, #tpu.memory_space<vmem>>, vector<1x1x1x56x32xbf16>
    %73 = vector.shape_cast %72 : vector<1x1x1x56x32xbf16> to vector<56x32xbf16>
    %c2_98 = arith.constant 2 : index
    %c0_99 = arith.constant 0 : index
    %c0_100 = arith.constant 0 : index
    %74 = vector.load %arg2[%c2_98, %c0_99, %c0_100] : memref<9x32x64xbf16, #tpu.memory_space<vmem>>, vector<1x32x64xbf16>
    %75 = vector.shape_cast %74 : vector<1x32x64xbf16> to vector<32x64xbf16>
    %cst_101 = arith.constant dense<0.000000e+00> : vector<56x64xf32>
    %76 = tpu.matmul %73, %75, %cst_101 {dimension_numbers = #tpu.dot_dimension_numbers<[1], [0], [0], [1], [0, 0, 1, 1], [], []>} : vector<56x32xbf16>, vector<32x64xbf16>, vector<56x64xf32> -> vector<56x64xf32>
    %77 = arith.addf %71, %76 : vector<56x64xf32>
    %c0_102 = arith.constant 0 : index
    %c0_103 = arith.constant 0 : index
    %c3_104 = arith.constant 3 : index
    %c0_105 = arith.constant 0 : index
    %c0_106 = arith.constant 0 : index
    %78 = vector.load %arg1[%c0_102, %c0_103, %c3_104, %c0_105, %c0_106] : memref<1x1x4x72x32xbf16, #tpu.memory_space<vmem>>, vector<1x1x1x56x32xbf16>
    %79 = vector.shape_cast %78 : vector<1x1x1x56x32xbf16> to vector<56x32xbf16>
    %c3_107 = arith.constant 3 : index
    %c0_108 = arith.constant 0 : index
    %c0_109 = arith.constant 0 : index
    %80 = vector.load %arg2[%c3_107, %c0_108, %c0_109] : memref<9x32x64xbf16, #tpu.memory_space<vmem>>, vector<1x32x64xbf16>
    %81 = vector.shape_cast %80 : vector<1x32x64xbf16> to vector<32x64xbf16>
    %cst_110 = arith.constant dense<0.000000e+00> : vector<56x64xf32>
    %82 = tpu.matmul %79, %81, %cst_110 {dimension_numbers = #tpu.dot_dimension_numbers<[1], [0], [0], [1], [0, 0, 1, 1], [], []>} : vector<56x32xbf16>, vector<32x64xbf16>, vector<56x64xf32> -> vector<56x64xf32>
    %83 = arith.addf %77, %82 : vector<56x64xf32>
    %c0_111 = arith.constant 0 : index
    %c0_112 = arith.constant 0 : index
    %c2_113 = arith.constant 2 : index
    %c1_114 = arith.constant 1 : index
    %c0_115 = arith.constant 0 : index
    %84 = vector.load %arg1[%c0_111, %c0_112, %c2_113, %c1_114, %c0_115] : memref<1x1x4x72x32xbf16, #tpu.memory_space<vmem>>, vector<1x1x1x56x32xbf16>
    %85 = vector.shape_cast %84 : vector<1x1x1x56x32xbf16> to vector<56x32xbf16>
    %c4_116 = arith.constant 4 : index
    %c0_117 = arith.constant 0 : index
    %c0_118 = arith.constant 0 : index
    %86 = vector.load %arg2[%c4_116, %c0_117, %c0_118] : memref<9x32x64xbf16, #tpu.memory_space<vmem>>, vector<1x32x64xbf16>
    %87 = vector.shape_cast %86 : vector<1x32x64xbf16> to vector<32x64xbf16>
    %cst_119 = arith.constant dense<0.000000e+00> : vector<56x64xf32>
    %88 = tpu.matmul %85, %87, %cst_119 {dimension_numbers = #tpu.dot_dimension_numbers<[1], [0], [0], [1], [0, 0, 1, 1], [], []>} : vector<56x32xbf16>, vector<32x64xbf16>, vector<56x64xf32> -> vector<56x64xf32>
    %89 = arith.addf %83, %88 : vector<56x64xf32>
    %c0_120 = arith.constant 0 : index
    %c0_121 = arith.constant 0 : index
    %c3_122 = arith.constant 3 : index
    %c1_123 = arith.constant 1 : index
    %c0_124 = arith.constant 0 : index
    %90 = vector.load %arg1[%c0_120, %c0_121, %c3_122, %c1_123, %c0_124] : memref<1x1x4x72x32xbf16, #tpu.memory_space<vmem>>, vector<1x1x1x56x32xbf16>
    %91 = vector.shape_cast %90 : vector<1x1x1x56x32xbf16> to vector<56x32xbf16>
    %c5_125 = arith.constant 5 : index
    %c0_126 = arith.constant 0 : index
    %c0_127 = arith.constant 0 : index
    %92 = vector.load %arg2[%c5_125, %c0_126, %c0_127] : memref<9x32x64xbf16, #tpu.memory_space<vmem>>, vector<1x32x64xbf16>
    %93 = vector.shape_cast %92 : vector<1x32x64xbf16> to vector<32x64xbf16>
    %cst_128 = arith.constant dense<0.000000e+00> : vector<56x64xf32>
    %94 = tpu.matmul %91, %93, %cst_128 {dimension_numbers = #tpu.dot_dimension_numbers<[1], [0], [0], [1], [0, 0, 1, 1], [], []>} : vector<56x32xbf16>, vector<32x64xbf16>, vector<56x64xf32> -> vector<56x64xf32>
    %95 = arith.addf %89, %94 : vector<56x64xf32>
    %c0_129 = arith.constant 0 : index
    %c0_130 = arith.constant 0 : index
    %c1_131 = arith.constant 1 : index
    %c8_132 = arith.constant 8 : index
    %c0_133 = arith.constant 0 : index
    %96 = vector.load %arg1[%c0_129, %c0_130, %c1_131, %c8_132, %c0_133] : memref<1x1x4x72x32xbf16, #tpu.memory_space<vmem>>, vector<1x1x1x56x32xbf16>
    %97 = vector.shape_cast %96 : vector<1x1x1x56x32xbf16> to vector<56x32xbf16>
    %c6_134 = arith.constant 6 : index
    %c0_135 = arith.constant 0 : index
    %c0_136 = arith.constant 0 : index
    %98 = vector.load %arg2[%c6_134, %c0_135, %c0_136] : memref<9x32x64xbf16, #tpu.memory_space<vmem>>, vector<1x32x64xbf16>
    %99 = vector.shape_cast %98 : vector<1x32x64xbf16> to vector<32x64xbf16>
    %cst_137 = arith.constant dense<0.000000e+00> : vector<56x64xf32>
    %100 = tpu.matmul %97, %99, %cst_137 {dimension_numbers = #tpu.dot_dimension_numbers<[1], [0], [0], [1], [0, 0, 1, 1], [], []>} : vector<56x32xbf16>, vector<32x64xbf16>, vector<56x64xf32> -> vector<56x64xf32>
    %101 = arith.addf %95, %100 : vector<56x64xf32>
    %c0_138 = arith.constant 0 : index
    %c0_139 = arith.constant 0 : index
    %c0_140 = arith.constant 0 : index
    %c9_141 = arith.constant 9 : index
    %c0_142 = arith.constant 0 : index
    %102 = vector.load %arg1[%c0_138, %c0_139, %c0_140, %c9_141, %c0_142] : memref<1x1x4x72x32xbf16, #tpu.memory_space<vmem>>, vector<1x1x1x56x32xbf16>
    %103 = vector.shape_cast %102 : vector<1x1x1x56x32xbf16> to vector<56x32xbf16>
    %c7_143 = arith.constant 7 : index
    %c0_144 = arith.constant 0 : index
    %c0_145 = arith.constant 0 : index
    %104 = vector.load %arg2[%c7_143, %c0_144, %c0_145] : memref<9x32x64xbf16, #tpu.memory_space<vmem>>, vector<1x32x64xbf16>
    %105 = vector.shape_cast %104 : vector<1x32x64xbf16> to vector<32x64xbf16>
    %cst_146 = arith.constant dense<0.000000e+00> : vector<56x64xf32>
    %106 = tpu.matmul %103, %105, %cst_146 {dimension_numbers = #tpu.dot_dimension_numbers<[1], [0], [0], [1], [0, 0, 1, 1], [], []>} : vector<56x32xbf16>, vector<32x64xbf16>, vector<56x64xf32> -> vector<56x64xf32>
    %107 = arith.addf %101, %106 : vector<56x64xf32>
    %c0_147 = arith.constant 0 : index
    %c0_148 = arith.constant 0 : index
    %c1_149 = arith.constant 1 : index
    %c9_150 = arith.constant 9 : index
    %c0_151 = arith.constant 0 : index
    %108 = vector.load %arg1[%c0_147, %c0_148, %c1_149, %c9_150, %c0_151] : memref<1x1x4x72x32xbf16, #tpu.memory_space<vmem>>, vector<1x1x1x56x32xbf16>
    %109 = vector.shape_cast %108 : vector<1x1x1x56x32xbf16> to vector<56x32xbf16>
    %c8_152 = arith.constant 8 : index
    %c0_153 = arith.constant 0 : index
    %c0_154 = arith.constant 0 : index
    %110 = vector.load %arg2[%c8_152, %c0_153, %c0_154] : memref<9x32x64xbf16, #tpu.memory_space<vmem>>, vector<1x32x64xbf16>
    %111 = vector.shape_cast %110 : vector<1x32x64xbf16> to vector<32x64xbf16>
    %cst_155 = arith.constant dense<0.000000e+00> : vector<56x64xf32>
    %112 = tpu.matmul %109, %111, %cst_155 {dimension_numbers = #tpu.dot_dimension_numbers<[1], [0], [0], [1], [0, 0, 1, 1], [], []>} : vector<56x32xbf16>, vector<32x64xbf16>, vector<56x64xf32> -> vector<56x64xf32>
    %113 = arith.addf %107, %112 : vector<56x64xf32>
    %114 = vector.broadcast %0 : vector<1x64xf32> to vector<56x64xf32>
    %115 = arith.mulf %113, %114 : vector<56x64xf32>
    %116 = vector.broadcast %1 : vector<1x64xf32> to vector<56x64xf32>
    %117 = arith.addf %115, %116 : vector<56x64xf32>
    %cst_156 = arith.constant 0.000000e+00 : f32
    %118 = vector.broadcast %cst_156 : f32 to vector<56x64xf32>
    %119 = arith.maximumf %117, %118 : vector<56x64xf32>
    %120 = arith.maximumf %60, %119 : vector<56x64xf32>
    %c0_157 = arith.constant 0 : index
    %c0_158 = arith.constant 0 : index
    %c2_159 = arith.constant 2 : index
    %c0_160 = arith.constant 0 : index
    %c0_161 = arith.constant 0 : index
    %121 = vector.load %arg1[%c0_157, %c0_158, %c2_159, %c0_160, %c0_161] : memref<1x1x4x72x32xbf16, #tpu.memory_space<vmem>>, vector<1x1x1x56x32xbf16>
    %122 = vector.shape_cast %121 : vector<1x1x1x56x32xbf16> to vector<56x32xbf16>
    %c0_162 = arith.constant 0 : index
    %c0_163 = arith.constant 0 : index
    %c0_164 = arith.constant 0 : index
    %123 = vector.load %arg2[%c0_162, %c0_163, %c0_164] : memref<9x32x64xbf16, #tpu.memory_space<vmem>>, vector<1x32x64xbf16>
    %124 = vector.shape_cast %123 : vector<1x32x64xbf16> to vector<32x64xbf16>
    %cst_165 = arith.constant dense<0.000000e+00> : vector<56x64xf32>
    %125 = tpu.matmul %122, %124, %cst_165 {dimension_numbers = #tpu.dot_dimension_numbers<[1], [0], [0], [1], [0, 0, 1, 1], [], []>} : vector<56x32xbf16>, vector<32x64xbf16>, vector<56x64xf32> -> vector<56x64xf32>
    %c0_166 = arith.constant 0 : index
    %c0_167 = arith.constant 0 : index
    %c3_168 = arith.constant 3 : index
    %c0_169 = arith.constant 0 : index
    %c0_170 = arith.constant 0 : index
    %126 = vector.load %arg1[%c0_166, %c0_167, %c3_168, %c0_169, %c0_170] : memref<1x1x4x72x32xbf16, #tpu.memory_space<vmem>>, vector<1x1x1x56x32xbf16>
    %127 = vector.shape_cast %126 : vector<1x1x1x56x32xbf16> to vector<56x32xbf16>
    %c1_171 = arith.constant 1 : index
    %c0_172 = arith.constant 0 : index
    %c0_173 = arith.constant 0 : index
    %128 = vector.load %arg2[%c1_171, %c0_172, %c0_173] : memref<9x32x64xbf16, #tpu.memory_space<vmem>>, vector<1x32x64xbf16>
    %129 = vector.shape_cast %128 : vector<1x32x64xbf16> to vector<32x64xbf16>
    %cst_174 = arith.constant dense<0.000000e+00> : vector<56x64xf32>
    %130 = tpu.matmul %127, %129, %cst_174 {dimension_numbers = #tpu.dot_dimension_numbers<[1], [0], [0], [1], [0, 0, 1, 1], [], []>} : vector<56x32xbf16>, vector<32x64xbf16>, vector<56x64xf32> -> vector<56x64xf32>
    %131 = arith.addf %125, %130 : vector<56x64xf32>
    %c0_175 = arith.constant 0 : index
    %c0_176 = arith.constant 0 : index
    %c2_177 = arith.constant 2 : index
    %c1_178 = arith.constant 1 : index
    %c0_179 = arith.constant 0 : index
    %132 = vector.load %arg1[%c0_175, %c0_176, %c2_177, %c1_178, %c0_179] : memref<1x1x4x72x32xbf16, #tpu.memory_space<vmem>>, vector<1x1x1x56x32xbf16>
    %133 = vector.shape_cast %132 : vector<1x1x1x56x32xbf16> to vector<56x32xbf16>
    %c2_180 = arith.constant 2 : index
    %c0_181 = arith.constant 0 : index
    %c0_182 = arith.constant 0 : index
    %134 = vector.load %arg2[%c2_180, %c0_181, %c0_182] : memref<9x32x64xbf16, #tpu.memory_space<vmem>>, vector<1x32x64xbf16>
    %135 = vector.shape_cast %134 : vector<1x32x64xbf16> to vector<32x64xbf16>
    %cst_183 = arith.constant dense<0.000000e+00> : vector<56x64xf32>
    %136 = tpu.matmul %133, %135, %cst_183 {dimension_numbers = #tpu.dot_dimension_numbers<[1], [0], [0], [1], [0, 0, 1, 1], [], []>} : vector<56x32xbf16>, vector<32x64xbf16>, vector<56x64xf32> -> vector<56x64xf32>
    %137 = arith.addf %131, %136 : vector<56x64xf32>
    %c0_184 = arith.constant 0 : index
    %c0_185 = arith.constant 0 : index
    %c0_186 = arith.constant 0 : index
    %c8_187 = arith.constant 8 : index
    %c0_188 = arith.constant 0 : index
    %138 = vector.load %arg1[%c0_184, %c0_185, %c0_186, %c8_187, %c0_188] : memref<1x1x4x72x32xbf16, #tpu.memory_space<vmem>>, vector<1x1x1x56x32xbf16>
    %139 = vector.shape_cast %138 : vector<1x1x1x56x32xbf16> to vector<56x32xbf16>
    %c3_189 = arith.constant 3 : index
    %c0_190 = arith.constant 0 : index
    %c0_191 = arith.constant 0 : index
    %140 = vector.load %arg2[%c3_189, %c0_190, %c0_191] : memref<9x32x64xbf16, #tpu.memory_space<vmem>>, vector<1x32x64xbf16>
    %141 = vector.shape_cast %140 : vector<1x32x64xbf16> to vector<32x64xbf16>
    %cst_192 = arith.constant dense<0.000000e+00> : vector<56x64xf32>
    %142 = tpu.matmul %139, %141, %cst_192 {dimension_numbers = #tpu.dot_dimension_numbers<[1], [0], [0], [1], [0, 0, 1, 1], [], []>} : vector<56x32xbf16>, vector<32x64xbf16>, vector<56x64xf32> -> vector<56x64xf32>
    %143 = arith.addf %137, %142 : vector<56x64xf32>
    %c0_193 = arith.constant 0 : index
    %c0_194 = arith.constant 0 : index
    %c1_195 = arith.constant 1 : index
    %c8_196 = arith.constant 8 : index
    %c0_197 = arith.constant 0 : index
    %144 = vector.load %arg1[%c0_193, %c0_194, %c1_195, %c8_196, %c0_197] : memref<1x1x4x72x32xbf16, #tpu.memory_space<vmem>>, vector<1x1x1x56x32xbf16>
    %145 = vector.shape_cast %144 : vector<1x1x1x56x32xbf16> to vector<56x32xbf16>
    %c4_198 = arith.constant 4 : index
    %c0_199 = arith.constant 0 : index
    %c0_200 = arith.constant 0 : index
    %146 = vector.load %arg2[%c4_198, %c0_199, %c0_200] : memref<9x32x64xbf16, #tpu.memory_space<vmem>>, vector<1x32x64xbf16>
    %147 = vector.shape_cast %146 : vector<1x32x64xbf16> to vector<32x64xbf16>
    %cst_201 = arith.constant dense<0.000000e+00> : vector<56x64xf32>
    %148 = tpu.matmul %145, %147, %cst_201 {dimension_numbers = #tpu.dot_dimension_numbers<[1], [0], [0], [1], [0, 0, 1, 1], [], []>} : vector<56x32xbf16>, vector<32x64xbf16>, vector<56x64xf32> -> vector<56x64xf32>
    %149 = arith.addf %143, %148 : vector<56x64xf32>
    %c0_202 = arith.constant 0 : index
    %c0_203 = arith.constant 0 : index
    %c0_204 = arith.constant 0 : index
    %c9_205 = arith.constant 9 : index
    %c0_206 = arith.constant 0 : index
    %150 = vector.load %arg1[%c0_202, %c0_203, %c0_204, %c9_205, %c0_206] : memref<1x1x4x72x32xbf16, #tpu.memory_space<vmem>>, vector<1x1x1x56x32xbf16>
    %151 = vector.shape_cast %150 : vector<1x1x1x56x32xbf16> to vector<56x32xbf16>
    %c5_207 = arith.constant 5 : index
    %c0_208 = arith.constant 0 : index
    %c0_209 = arith.constant 0 : index
    %152 = vector.load %arg2[%c5_207, %c0_208, %c0_209] : memref<9x32x64xbf16, #tpu.memory_space<vmem>>, vector<1x32x64xbf16>
    %153 = vector.shape_cast %152 : vector<1x32x64xbf16> to vector<32x64xbf16>
    %cst_210 = arith.constant dense<0.000000e+00> : vector<56x64xf32>
    %154 = tpu.matmul %151, %153, %cst_210 {dimension_numbers = #tpu.dot_dimension_numbers<[1], [0], [0], [1], [0, 0, 1, 1], [], []>} : vector<56x32xbf16>, vector<32x64xbf16>, vector<56x64xf32> -> vector<56x64xf32>
    %155 = arith.addf %149, %154 : vector<56x64xf32>
    %c0_211 = arith.constant 0 : index
    %c0_212 = arith.constant 0 : index
    %c2_213 = arith.constant 2 : index
    %c8_214 = arith.constant 8 : index
    %c0_215 = arith.constant 0 : index
    %156 = vector.load %arg1[%c0_211, %c0_212, %c2_213, %c8_214, %c0_215] : memref<1x1x4x72x32xbf16, #tpu.memory_space<vmem>>, vector<1x1x1x56x32xbf16>
    %157 = vector.shape_cast %156 : vector<1x1x1x56x32xbf16> to vector<56x32xbf16>
    %c6_216 = arith.constant 6 : index
    %c0_217 = arith.constant 0 : index
    %c0_218 = arith.constant 0 : index
    %158 = vector.load %arg2[%c6_216, %c0_217, %c0_218] : memref<9x32x64xbf16, #tpu.memory_space<vmem>>, vector<1x32x64xbf16>
    %159 = vector.shape_cast %158 : vector<1x32x64xbf16> to vector<32x64xbf16>
    %cst_219 = arith.constant dense<0.000000e+00> : vector<56x64xf32>
    %160 = tpu.matmul %157, %159, %cst_219 {dimension_numbers = #tpu.dot_dimension_numbers<[1], [0], [0], [1], [0, 0, 1, 1], [], []>} : vector<56x32xbf16>, vector<32x64xbf16>, vector<56x64xf32> -> vector<56x64xf32>
    %161 = arith.addf %155, %160 : vector<56x64xf32>
    %c0_220 = arith.constant 0 : index
    %c0_221 = arith.constant 0 : index
    %c3_222 = arith.constant 3 : index
    %c8_223 = arith.constant 8 : index
    %c0_224 = arith.constant 0 : index
    %162 = vector.load %arg1[%c0_220, %c0_221, %c3_222, %c8_223, %c0_224] : memref<1x1x4x72x32xbf16, #tpu.memory_space<vmem>>, vector<1x1x1x56x32xbf16>
    %163 = vector.shape_cast %162 : vector<1x1x1x56x32xbf16> to vector<56x32xbf16>
    %c7_225 = arith.constant 7 : index
    %c0_226 = arith.constant 0 : index
    %c0_227 = arith.constant 0 : index
    %164 = vector.load %arg2[%c7_225, %c0_226, %c0_227] : memref<9x32x64xbf16, #tpu.memory_space<vmem>>, vector<1x32x64xbf16>
    %165 = vector.shape_cast %164 : vector<1x32x64xbf16> to vector<32x64xbf16>
    %cst_228 = arith.constant dense<0.000000e+00> : vector<56x64xf32>
    %166 = tpu.matmul %163, %165, %cst_228 {dimension_numbers = #tpu.dot_dimension_numbers<[1], [0], [0], [1], [0, 0, 1, 1], [], []>} : vector<56x32xbf16>, vector<32x64xbf16>, vector<56x64xf32> -> vector<56x64xf32>
    %167 = arith.addf %161, %166 : vector<56x64xf32>
    %c0_229 = arith.constant 0 : index
    %c0_230 = arith.constant 0 : index
    %c2_231 = arith.constant 2 : index
    %c9_232 = arith.constant 9 : index
    %c0_233 = arith.constant 0 : index
    %168 = vector.load %arg1[%c0_229, %c0_230, %c2_231, %c9_232, %c0_233] : memref<1x1x4x72x32xbf16, #tpu.memory_space<vmem>>, vector<1x1x1x56x32xbf16>
    %169 = vector.shape_cast %168 : vector<1x1x1x56x32xbf16> to vector<56x32xbf16>
    %c8_234 = arith.constant 8 : index
    %c0_235 = arith.constant 0 : index
    %c0_236 = arith.constant 0 : index
    %170 = vector.load %arg2[%c8_234, %c0_235, %c0_236] : memref<9x32x64xbf16, #tpu.memory_space<vmem>>, vector<1x32x64xbf16>
    %171 = vector.shape_cast %170 : vector<1x32x64xbf16> to vector<32x64xbf16>
    %cst_237 = arith.constant dense<0.000000e+00> : vector<56x64xf32>
    %172 = tpu.matmul %169, %171, %cst_237 {dimension_numbers = #tpu.dot_dimension_numbers<[1], [0], [0], [1], [0, 0, 1, 1], [], []>} : vector<56x32xbf16>, vector<32x64xbf16>, vector<56x64xf32> -> vector<56x64xf32>
    %173 = arith.addf %167, %172 : vector<56x64xf32>
    %174 = vector.broadcast %0 : vector<1x64xf32> to vector<56x64xf32>
    %175 = arith.mulf %173, %174 : vector<56x64xf32>
    %176 = vector.broadcast %1 : vector<1x64xf32> to vector<56x64xf32>
    %177 = arith.addf %175, %176 : vector<56x64xf32>
    %cst_238 = arith.constant 0.000000e+00 : f32
    %178 = vector.broadcast %cst_238 : f32 to vector<56x64xf32>
    %179 = arith.maximumf %177, %178 : vector<56x64xf32>
    %180 = arith.maximumf %120, %179 : vector<56x64xf32>
    %c0_239 = arith.constant 0 : index
    %c0_240 = arith.constant 0 : index
    %c3_241 = arith.constant 3 : index
    %c0_242 = arith.constant 0 : index
    %c0_243 = arith.constant 0 : index
    %181 = vector.load %arg1[%c0_239, %c0_240, %c3_241, %c0_242, %c0_243] : memref<1x1x4x72x32xbf16, #tpu.memory_space<vmem>>, vector<1x1x1x56x32xbf16>
    %182 = vector.shape_cast %181 : vector<1x1x1x56x32xbf16> to vector<56x32xbf16>
    %c0_244 = arith.constant 0 : index
    %c0_245 = arith.constant 0 : index
    %c0_246 = arith.constant 0 : index
    %183 = vector.load %arg2[%c0_244, %c0_245, %c0_246] : memref<9x32x64xbf16, #tpu.memory_space<vmem>>, vector<1x32x64xbf16>
    %184 = vector.shape_cast %183 : vector<1x32x64xbf16> to vector<32x64xbf16>
    %cst_247 = arith.constant dense<0.000000e+00> : vector<56x64xf32>
    %185 = tpu.matmul %182, %184, %cst_247 {dimension_numbers = #tpu.dot_dimension_numbers<[1], [0], [0], [1], [0, 0, 1, 1], [], []>} : vector<56x32xbf16>, vector<32x64xbf16>, vector<56x64xf32> -> vector<56x64xf32>
    %c0_248 = arith.constant 0 : index
    %c0_249 = arith.constant 0 : index
    %c2_250 = arith.constant 2 : index
    %c1_251 = arith.constant 1 : index
    %c0_252 = arith.constant 0 : index
    %186 = vector.load %arg1[%c0_248, %c0_249, %c2_250, %c1_251, %c0_252] : memref<1x1x4x72x32xbf16, #tpu.memory_space<vmem>>, vector<1x1x1x56x32xbf16>
    %187 = vector.shape_cast %186 : vector<1x1x1x56x32xbf16> to vector<56x32xbf16>
    %c1_253 = arith.constant 1 : index
    %c0_254 = arith.constant 0 : index
    %c0_255 = arith.constant 0 : index
    %188 = vector.load %arg2[%c1_253, %c0_254, %c0_255] : memref<9x32x64xbf16, #tpu.memory_space<vmem>>, vector<1x32x64xbf16>
    %189 = vector.shape_cast %188 : vector<1x32x64xbf16> to vector<32x64xbf16>
    %cst_256 = arith.constant dense<0.000000e+00> : vector<56x64xf32>
    %190 = tpu.matmul %187, %189, %cst_256 {dimension_numbers = #tpu.dot_dimension_numbers<[1], [0], [0], [1], [0, 0, 1, 1], [], []>} : vector<56x32xbf16>, vector<32x64xbf16>, vector<56x64xf32> -> vector<56x64xf32>
    %191 = arith.addf %185, %190 : vector<56x64xf32>
    %c0_257 = arith.constant 0 : index
    %c0_258 = arith.constant 0 : index
    %c3_259 = arith.constant 3 : index
    %c1_260 = arith.constant 1 : index
    %c0_261 = arith.constant 0 : index
    %192 = vector.load %arg1[%c0_257, %c0_258, %c3_259, %c1_260, %c0_261] : memref<1x1x4x72x32xbf16, #tpu.memory_space<vmem>>, vector<1x1x1x56x32xbf16>
    %193 = vector.shape_cast %192 : vector<1x1x1x56x32xbf16> to vector<56x32xbf16>
    %c2_262 = arith.constant 2 : index
    %c0_263 = arith.constant 0 : index
    %c0_264 = arith.constant 0 : index
    %194 = vector.load %arg2[%c2_262, %c0_263, %c0_264] : memref<9x32x64xbf16, #tpu.memory_space<vmem>>, vector<1x32x64xbf16>
    %195 = vector.shape_cast %194 : vector<1x32x64xbf16> to vector<32x64xbf16>
    %cst_265 = arith.constant dense<0.000000e+00> : vector<56x64xf32>
    %196 = tpu.matmul %193, %195, %cst_265 {dimension_numbers = #tpu.dot_dimension_numbers<[1], [0], [0], [1], [0, 0, 1, 1], [], []>} : vector<56x32xbf16>, vector<32x64xbf16>, vector<56x64xf32> -> vector<56x64xf32>
    %197 = arith.addf %191, %196 : vector<56x64xf32>
    %c0_266 = arith.constant 0 : index
    %c0_267 = arith.constant 0 : index
    %c1_268 = arith.constant 1 : index
    %c8_269 = arith.constant 8 : index
    %c0_270 = arith.constant 0 : index
    %198 = vector.load %arg1[%c0_266, %c0_267, %c1_268, %c8_269, %c0_270] : memref<1x1x4x72x32xbf16, #tpu.memory_space<vmem>>, vector<1x1x1x56x32xbf16>
    %199 = vector.shape_cast %198 : vector<1x1x1x56x32xbf16> to vector<56x32xbf16>
    %c3_271 = arith.constant 3 : index
    %c0_272 = arith.constant 0 : index
    %c0_273 = arith.constant 0 : index
    %200 = vector.load %arg2[%c3_271, %c0_272, %c0_273] : memref<9x32x64xbf16, #tpu.memory_space<vmem>>, vector<1x32x64xbf16>
    %201 = vector.shape_cast %200 : vector<1x32x64xbf16> to vector<32x64xbf16>
    %cst_274 = arith.constant dense<0.000000e+00> : vector<56x64xf32>
    %202 = tpu.matmul %199, %201, %cst_274 {dimension_numbers = #tpu.dot_dimension_numbers<[1], [0], [0], [1], [0, 0, 1, 1], [], []>} : vector<56x32xbf16>, vector<32x64xbf16>, vector<56x64xf32> -> vector<56x64xf32>
    %203 = arith.addf %197, %202 : vector<56x64xf32>
    %c0_275 = arith.constant 0 : index
    %c0_276 = arith.constant 0 : index
    %c0_277 = arith.constant 0 : index
    %c9_278 = arith.constant 9 : index
    %c0_279 = arith.constant 0 : index
    %204 = vector.load %arg1[%c0_275, %c0_276, %c0_277, %c9_278, %c0_279] : memref<1x1x4x72x32xbf16, #tpu.memory_space<vmem>>, vector<1x1x1x56x32xbf16>
    %205 = vector.shape_cast %204 : vector<1x1x1x56x32xbf16> to vector<56x32xbf16>
    %c4_280 = arith.constant 4 : index
    %c0_281 = arith.constant 0 : index
    %c0_282 = arith.constant 0 : index
    %206 = vector.load %arg2[%c4_280, %c0_281, %c0_282] : memref<9x32x64xbf16, #tpu.memory_space<vmem>>, vector<1x32x64xbf16>
    %207 = vector.shape_cast %206 : vector<1x32x64xbf16> to vector<32x64xbf16>
    %cst_283 = arith.constant dense<0.000000e+00> : vector<56x64xf32>
    %208 = tpu.matmul %205, %207, %cst_283 {dimension_numbers = #tpu.dot_dimension_numbers<[1], [0], [0], [1], [0, 0, 1, 1], [], []>} : vector<56x32xbf16>, vector<32x64xbf16>, vector<56x64xf32> -> vector<56x64xf32>
    %209 = arith.addf %203, %208 : vector<56x64xf32>
    %c0_284 = arith.constant 0 : index
    %c0_285 = arith.constant 0 : index
    %c1_286 = arith.constant 1 : index
    %c9_287 = arith.constant 9 : index
    %c0_288 = arith.constant 0 : index
    %210 = vector.load %arg1[%c0_284, %c0_285, %c1_286, %c9_287, %c0_288] : memref<1x1x4x72x32xbf16, #tpu.memory_space<vmem>>, vector<1x1x1x56x32xbf16>
    %211 = vector.shape_cast %210 : vector<1x1x1x56x32xbf16> to vector<56x32xbf16>
    %c5_289 = arith.constant 5 : index
    %c0_290 = arith.constant 0 : index
    %c0_291 = arith.constant 0 : index
    %212 = vector.load %arg2[%c5_289, %c0_290, %c0_291] : memref<9x32x64xbf16, #tpu.memory_space<vmem>>, vector<1x32x64xbf16>
    %213 = vector.shape_cast %212 : vector<1x32x64xbf16> to vector<32x64xbf16>
    %cst_292 = arith.constant dense<0.000000e+00> : vector<56x64xf32>
    %214 = tpu.matmul %211, %213, %cst_292 {dimension_numbers = #tpu.dot_dimension_numbers<[1], [0], [0], [1], [0, 0, 1, 1], [], []>} : vector<56x32xbf16>, vector<32x64xbf16>, vector<56x64xf32> -> vector<56x64xf32>
    %215 = arith.addf %209, %214 : vector<56x64xf32>
    %c0_293 = arith.constant 0 : index
    %c0_294 = arith.constant 0 : index
    %c3_295 = arith.constant 3 : index
    %c8_296 = arith.constant 8 : index
    %c0_297 = arith.constant 0 : index
    %216 = vector.load %arg1[%c0_293, %c0_294, %c3_295, %c8_296, %c0_297] : memref<1x1x4x72x32xbf16, #tpu.memory_space<vmem>>, vector<1x1x1x56x32xbf16>
    %217 = vector.shape_cast %216 : vector<1x1x1x56x32xbf16> to vector<56x32xbf16>
    %c6_298 = arith.constant 6 : index
    %c0_299 = arith.constant 0 : index
    %c0_300 = arith.constant 0 : index
    %218 = vector.load %arg2[%c6_298, %c0_299, %c0_300] : memref<9x32x64xbf16, #tpu.memory_space<vmem>>, vector<1x32x64xbf16>
    %219 = vector.shape_cast %218 : vector<1x32x64xbf16> to vector<32x64xbf16>
    %cst_301 = arith.constant dense<0.000000e+00> : vector<56x64xf32>
    %220 = tpu.matmul %217, %219, %cst_301 {dimension_numbers = #tpu.dot_dimension_numbers<[1], [0], [0], [1], [0, 0, 1, 1], [], []>} : vector<56x32xbf16>, vector<32x64xbf16>, vector<56x64xf32> -> vector<56x64xf32>
    %221 = arith.addf %215, %220 : vector<56x64xf32>
    %c0_302 = arith.constant 0 : index
    %c0_303 = arith.constant 0 : index
    %c2_304 = arith.constant 2 : index
    %c9_305 = arith.constant 9 : index
    %c0_306 = arith.constant 0 : index
    %222 = vector.load %arg1[%c0_302, %c0_303, %c2_304, %c9_305, %c0_306] : memref<1x1x4x72x32xbf16, #tpu.memory_space<vmem>>, vector<1x1x1x56x32xbf16>
    %223 = vector.shape_cast %222 : vector<1x1x1x56x32xbf16> to vector<56x32xbf16>
    %c7_307 = arith.constant 7 : index
    %c0_308 = arith.constant 0 : index
    %c0_309 = arith.constant 0 : index
    %224 = vector.load %arg2[%c7_307, %c0_308, %c0_309] : memref<9x32x64xbf16, #tpu.memory_space<vmem>>, vector<1x32x64xbf16>
    %225 = vector.shape_cast %224 : vector<1x32x64xbf16> to vector<32x64xbf16>
    %cst_310 = arith.constant dense<0.000000e+00> : vector<56x64xf32>
    %226 = tpu.matmul %223, %225, %cst_310 {dimension_numbers = #tpu.dot_dimension_numbers<[1], [0], [0], [1], [0, 0, 1, 1], [], []>} : vector<56x32xbf16>, vector<32x64xbf16>, vector<56x64xf32> -> vector<56x64xf32>
    %227 = arith.addf %221, %226 : vector<56x64xf32>
    %c0_311 = arith.constant 0 : index
    %c0_312 = arith.constant 0 : index
    %c3_313 = arith.constant 3 : index
    %c9_314 = arith.constant 9 : index
    %c0_315 = arith.constant 0 : index
    %228 = vector.load %arg1[%c0_311, %c0_312, %c3_313, %c9_314, %c0_315] : memref<1x1x4x72x32xbf16, #tpu.memory_space<vmem>>, vector<1x1x1x56x32xbf16>
    %229 = vector.shape_cast %228 : vector<1x1x1x56x32xbf16> to vector<56x32xbf16>
    %c8_316 = arith.constant 8 : index
    %c0_317 = arith.constant 0 : index
    %c0_318 = arith.constant 0 : index
    %230 = vector.load %arg2[%c8_316, %c0_317, %c0_318] : memref<9x32x64xbf16, #tpu.memory_space<vmem>>, vector<1x32x64xbf16>
    %231 = vector.shape_cast %230 : vector<1x32x64xbf16> to vector<32x64xbf16>
    %cst_319 = arith.constant dense<0.000000e+00> : vector<56x64xf32>
    %232 = tpu.matmul %229, %231, %cst_319 {dimension_numbers = #tpu.dot_dimension_numbers<[1], [0], [0], [1], [0, 0, 1, 1], [], []>} : vector<56x32xbf16>, vector<32x64xbf16>, vector<56x64xf32> -> vector<56x64xf32>
    %233 = arith.addf %227, %232 : vector<56x64xf32>
    %234 = vector.broadcast %0 : vector<1x64xf32> to vector<56x64xf32>
    %235 = arith.mulf %233, %234 : vector<56x64xf32>
    %236 = vector.broadcast %1 : vector<1x64xf32> to vector<56x64xf32>
    %237 = arith.addf %235, %236 : vector<56x64xf32>
    %cst_320 = arith.constant 0.000000e+00 : f32
    %238 = vector.broadcast %cst_320 : f32 to vector<56x64xf32>
    %239 = arith.maximumf %237, %238 : vector<56x64xf32>
    %240 = arith.maximumf %180, %239 : vector<56x64xf32>
    %241 = arith.truncf %240 : vector<56x64xf32> to vector<56x64xbf16>
    %c0_321 = arith.constant 0 : index
    %c0_322 = arith.constant 0 : index
    %c0_323 = arith.constant 0 : index
    %c0_324 = arith.constant 0 : index
    %242 = vector.load %arg4[%c0_321, %c0_322, %c0_323, %c0_324] : memref<1x1x56x64xbf16, #tpu.memory_space<vmem>>, vector<1x1x56x64xbf16>
    %243 = vector.shape_cast %242 : vector<1x1x56x64xbf16> to vector<56x64xbf16>
    %244 = vector.shape_cast %241 : vector<56x64xbf16> to vector<1x1x56x64xbf16>
    tpu.vector_store %arg4[%c0_321, %c0_322, %c0_323, %c0_324], %244 {strides = array<i32>} : memref<1x1x56x64xbf16, #tpu.memory_space<vmem>>, vector<1x1x56x64xbf16>,
    return
  }
  func.func @transform_0(%arg0: i32) -> (i32, i32, i32, i32, i32) {
    %c0_i32 = arith.constant 0 : i32
    %c0_i32_0 = arith.constant 0 : i32
    %c0_i32_1 = arith.constant 0 : i32
    %c0_i32_2 = arith.constant 0 : i32
    %c0_i32_3 = arith.constant 0 : i32
    return %arg0, %c0_i32, %c0_i32_0, %c0_i32_1, %c0_i32_2 : i32, i32, i32, i32, i32
  }
  func.func @transform_1(%arg0: i32) -> (i32, i32, i32) {
    %c0_i32 = arith.constant 0 : i32
    %c0_i32_0 = arith.constant 0 : i32
    %c0_i32_1 = arith.constant 0 : i32
    %c0_i32_2 = arith.constant 0 : i32
    return %c0_i32, %c0_i32_0, %c0_i32_1 : i32, i32, i32
  }
  func.func @transform_2(%arg0: i32) -> (i32, i32) {
    %c0_i32 = arith.constant 0 : i32
    %c0_i32_0 = arith.constant 0 : i32
    %c0_i32_1 = arith.constant 0 : i32
    return %c0_i32, %c0_i32_0 : i32, i32
  }
  func.func @transform_3(%arg0: i32) -> (i32, i32, i32, i32) {
    %c0_i32 = arith.constant 0 : i32
    %c0_i32_0 = arith.constant 0 : i32
    %c0_i32_1 = arith.constant 0 : i32
    %c0_i32_2 = arith.constant 0 : i32
    return %arg0, %c0_i32, %c0_i32_0, %c0_i32_1 : i32, i32, i32, i32
  }
}

module attributes {stable_mosaic.version = 11 : i64} {
  func.func @_conv_pool_kernel(%arg0: i32, %arg1: memref<1x1x4x25x64xbf16, #tpu.memory_space<vmem>>, %arg2: memref<9x64x64xbf16, #tpu.memory_space<vmem>>, %arg3: memref<2x64xf32, #tpu.memory_space<vmem>>, %arg4: memref<1x1x16x64xbf16, #tpu.memory_space<vmem>>) attributes {dimension_semantics = [#tpu.dimension_semantics<parallel>], iteration_bounds = array<i64: 2>, scalar_prefetch = 0 : i64, scratch_operands = 0 : i64, tpu.core_type = #tpu.core_type<tc>, window_params = [{transform_indices = @transform_0, window_bounds = array<i64: 1, 1, 4, 25, 64>}, {pipeline_mode = #tpu.pipeline_mode<synchronous>, transform_indices = @transform_1, window_bounds = array<i64: 9, 64, 64>}, {pipeline_mode = #tpu.pipeline_mode<synchronous>, transform_indices = @transform_2, window_bounds = array<i64: 2, 64>}, {transform_indices = @transform_3, window_bounds = array<i64: 1, 1, 16, 64>}]} {
    %c0 = arith.constant 0 : index
    %c0_0 = arith.constant 0 : index
    %0 = vector.load %arg3[%c0, %c0_0] : memref<2x64xf32, #tpu.memory_space<vmem>>, vector<1x64xf32>
    %c1 = arith.constant 1 : index
    %c0_1 = arith.constant 0 : index
    %1 = vector.load %arg3[%c1, %c0_1] : memref<2x64xf32, #tpu.memory_space<vmem>>, vector<1x64xf32>
    %c0_2 = arith.constant 0 : index
    %c0_3 = arith.constant 0 : index
    %c0_4 = arith.constant 0 : index
    %c0_5 = arith.constant 0 : index
    %c0_6 = arith.constant 0 : index
    %2 = vector.load %arg1[%c0_2, %c0_3, %c0_4, %c0_5, %c0_6] : memref<1x1x4x25x64xbf16, #tpu.memory_space<vmem>>, vector<1x1x1x16x64xbf16>
    %3 = vector.shape_cast %2 : vector<1x1x1x16x64xbf16> to vector<16x64xbf16>
    %c0_7 = arith.constant 0 : index
    %c0_8 = arith.constant 0 : index
    %c0_9 = arith.constant 0 : index
    %4 = vector.load %arg2[%c0_7, %c0_8, %c0_9] : memref<9x64x64xbf16, #tpu.memory_space<vmem>>, vector<1x64x64xbf16>
    %5 = vector.shape_cast %4 : vector<1x64x64xbf16> to vector<64x64xbf16>
    %cst = arith.constant dense<0.000000e+00> : vector<16x64xf32>
    %6 = tpu.matmul %3, %5, %cst {dimension_numbers = #tpu.dot_dimension_numbers<[1], [0], [0], [1], [0, 0, 1, 1], [], []>} : vector<16x64xbf16>, vector<64x64xbf16>, vector<16x64xf32> -> vector<16x64xf32>
    %c0_10 = arith.constant 0 : index
    %c0_11 = arith.constant 0 : index
    %c1_12 = arith.constant 1 : index
    %c0_13 = arith.constant 0 : index
    %c0_14 = arith.constant 0 : index
    %7 = vector.load %arg1[%c0_10, %c0_11, %c1_12, %c0_13, %c0_14] : memref<1x1x4x25x64xbf16, #tpu.memory_space<vmem>>, vector<1x1x1x16x64xbf16>
    %8 = vector.shape_cast %7 : vector<1x1x1x16x64xbf16> to vector<16x64xbf16>
    %c1_15 = arith.constant 1 : index
    %c0_16 = arith.constant 0 : index
    %c0_17 = arith.constant 0 : index
    %9 = vector.load %arg2[%c1_15, %c0_16, %c0_17] : memref<9x64x64xbf16, #tpu.memory_space<vmem>>, vector<1x64x64xbf16>
    %10 = vector.shape_cast %9 : vector<1x64x64xbf16> to vector<64x64xbf16>
    %cst_18 = arith.constant dense<0.000000e+00> : vector<16x64xf32>
    %11 = tpu.matmul %8, %10, %cst_18 {dimension_numbers = #tpu.dot_dimension_numbers<[1], [0], [0], [1], [0, 0, 1, 1], [], []>} : vector<16x64xbf16>, vector<64x64xbf16>, vector<16x64xf32> -> vector<16x64xf32>
    %12 = arith.addf %6, %11 : vector<16x64xf32>
    %c0_19 = arith.constant 0 : index
    %c0_20 = arith.constant 0 : index
    %c0_21 = arith.constant 0 : index
    %c1_22 = arith.constant 1 : index
    %c0_23 = arith.constant 0 : index
    %13 = vector.load %arg1[%c0_19, %c0_20, %c0_21, %c1_22, %c0_23] : memref<1x1x4x25x64xbf16, #tpu.memory_space<vmem>>, vector<1x1x1x16x64xbf16>
    %14 = vector.shape_cast %13 : vector<1x1x1x16x64xbf16> to vector<16x64xbf16>
    %c2 = arith.constant 2 : index
    %c0_24 = arith.constant 0 : index
    %c0_25 = arith.constant 0 : index
    %15 = vector.load %arg2[%c2, %c0_24, %c0_25] : memref<9x64x64xbf16, #tpu.memory_space<vmem>>, vector<1x64x64xbf16>
    %16 = vector.shape_cast %15 : vector<1x64x64xbf16> to vector<64x64xbf16>
    %cst_26 = arith.constant dense<0.000000e+00> : vector<16x64xf32>
    %17 = tpu.matmul %14, %16, %cst_26 {dimension_numbers = #tpu.dot_dimension_numbers<[1], [0], [0], [1], [0, 0, 1, 1], [], []>} : vector<16x64xbf16>, vector<64x64xbf16>, vector<16x64xf32> -> vector<16x64xf32>
    %18 = arith.addf %12, %17 : vector<16x64xf32>
    %c0_27 = arith.constant 0 : index
    %c0_28 = arith.constant 0 : index
    %c2_29 = arith.constant 2 : index
    %c0_30 = arith.constant 0 : index
    %c0_31 = arith.constant 0 : index
    %19 = vector.load %arg1[%c0_27, %c0_28, %c2_29, %c0_30, %c0_31] : memref<1x1x4x25x64xbf16, #tpu.memory_space<vmem>>, vector<1x1x1x16x64xbf16>
    %20 = vector.shape_cast %19 : vector<1x1x1x16x64xbf16> to vector<16x64xbf16>
    %c3 = arith.constant 3 : index
    %c0_32 = arith.constant 0 : index
    %c0_33 = arith.constant 0 : index
    %21 = vector.load %arg2[%c3, %c0_32, %c0_33] : memref<9x64x64xbf16, #tpu.memory_space<vmem>>, vector<1x64x64xbf16>
    %22 = vector.shape_cast %21 : vector<1x64x64xbf16> to vector<64x64xbf16>
    %cst_34 = arith.constant dense<0.000000e+00> : vector<16x64xf32>
    %23 = tpu.matmul %20, %22, %cst_34 {dimension_numbers = #tpu.dot_dimension_numbers<[1], [0], [0], [1], [0, 0, 1, 1], [], []>} : vector<16x64xbf16>, vector<64x64xbf16>, vector<16x64xf32> -> vector<16x64xf32>
    %24 = arith.addf %18, %23 : vector<16x64xf32>
    %c0_35 = arith.constant 0 : index
    %c0_36 = arith.constant 0 : index
    %c3_37 = arith.constant 3 : index
    %c0_38 = arith.constant 0 : index
    %c0_39 = arith.constant 0 : index
    %25 = vector.load %arg1[%c0_35, %c0_36, %c3_37, %c0_38, %c0_39] : memref<1x1x4x25x64xbf16, #tpu.memory_space<vmem>>, vector<1x1x1x16x64xbf16>
    %26 = vector.shape_cast %25 : vector<1x1x1x16x64xbf16> to vector<16x64xbf16>
    %c4 = arith.constant 4 : index
    %c0_40 = arith.constant 0 : index
    %c0_41 = arith.constant 0 : index
    %27 = vector.load %arg2[%c4, %c0_40, %c0_41] : memref<9x64x64xbf16, #tpu.memory_space<vmem>>, vector<1x64x64xbf16>
    %28 = vector.shape_cast %27 : vector<1x64x64xbf16> to vector<64x64xbf16>
    %cst_42 = arith.constant dense<0.000000e+00> : vector<16x64xf32>
    %29 = tpu.matmul %26, %28, %cst_42 {dimension_numbers = #tpu.dot_dimension_numbers<[1], [0], [0], [1], [0, 0, 1, 1], [], []>} : vector<16x64xbf16>, vector<64x64xbf16>, vector<16x64xf32> -> vector<16x64xf32>
    %30 = arith.addf %24, %29 : vector<16x64xf32>
    %c0_43 = arith.constant 0 : index
    %c0_44 = arith.constant 0 : index
    %c2_45 = arith.constant 2 : index
    %c1_46 = arith.constant 1 : index
    %c0_47 = arith.constant 0 : index
    %31 = vector.load %arg1[%c0_43, %c0_44, %c2_45, %c1_46, %c0_47] : memref<1x1x4x25x64xbf16, #tpu.memory_space<vmem>>, vector<1x1x1x16x64xbf16>
    %32 = vector.shape_cast %31 : vector<1x1x1x16x64xbf16> to vector<16x64xbf16>
    %c5 = arith.constant 5 : index
    %c0_48 = arith.constant 0 : index
    %c0_49 = arith.constant 0 : index
    %33 = vector.load %arg2[%c5, %c0_48, %c0_49] : memref<9x64x64xbf16, #tpu.memory_space<vmem>>, vector<1x64x64xbf16>
    %34 = vector.shape_cast %33 : vector<1x64x64xbf16> to vector<64x64xbf16>
    %cst_50 = arith.constant dense<0.000000e+00> : vector<16x64xf32>
    %35 = tpu.matmul %32, %34, %cst_50 {dimension_numbers = #tpu.dot_dimension_numbers<[1], [0], [0], [1], [0, 0, 1, 1], [], []>} : vector<16x64xbf16>, vector<64x64xbf16>, vector<16x64xf32> -> vector<16x64xf32>
    %36 = arith.addf %30, %35 : vector<16x64xf32>
    %c0_51 = arith.constant 0 : index
    %c0_52 = arith.constant 0 : index
    %c0_53 = arith.constant 0 : index
    %c5_54 = arith.constant 5 : index
    %c0_55 = arith.constant 0 : index
    %37 = vector.load %arg1[%c0_51, %c0_52, %c0_53, %c5_54, %c0_55] : memref<1x1x4x25x64xbf16, #tpu.memory_space<vmem>>, vector<1x1x1x16x64xbf16>
    %38 = vector.shape_cast %37 : vector<1x1x1x16x64xbf16> to vector<16x64xbf16>
    %c6 = arith.constant 6 : index
    %c0_56 = arith.constant 0 : index
    %c0_57 = arith.constant 0 : index
    %39 = vector.load %arg2[%c6, %c0_56, %c0_57] : memref<9x64x64xbf16, #tpu.memory_space<vmem>>, vector<1x64x64xbf16>
    %40 = vector.shape_cast %39 : vector<1x64x64xbf16> to vector<64x64xbf16>
    %cst_58 = arith.constant dense<0.000000e+00> : vector<16x64xf32>
    %41 = tpu.matmul %38, %40, %cst_58 {dimension_numbers = #tpu.dot_dimension_numbers<[1], [0], [0], [1], [0, 0, 1, 1], [], []>} : vector<16x64xbf16>, vector<64x64xbf16>, vector<16x64xf32> -> vector<16x64xf32>
    %42 = arith.addf %36, %41 : vector<16x64xf32>
    %c0_59 = arith.constant 0 : index
    %c0_60 = arith.constant 0 : index
    %c1_61 = arith.constant 1 : index
    %c5_62 = arith.constant 5 : index
    %c0_63 = arith.constant 0 : index
    %43 = vector.load %arg1[%c0_59, %c0_60, %c1_61, %c5_62, %c0_63] : memref<1x1x4x25x64xbf16, #tpu.memory_space<vmem>>, vector<1x1x1x16x64xbf16>
    %44 = vector.shape_cast %43 : vector<1x1x1x16x64xbf16> to vector<16x64xbf16>
    %c7 = arith.constant 7 : index
    %c0_64 = arith.constant 0 : index
    %c0_65 = arith.constant 0 : index
    %45 = vector.load %arg2[%c7, %c0_64, %c0_65] : memref<9x64x64xbf16, #tpu.memory_space<vmem>>, vector<1x64x64xbf16>
    %46 = vector.shape_cast %45 : vector<1x64x64xbf16> to vector<64x64xbf16>
    %cst_66 = arith.constant dense<0.000000e+00> : vector<16x64xf32>
    %47 = tpu.matmul %44, %46, %cst_66 {dimension_numbers = #tpu.dot_dimension_numbers<[1], [0], [0], [1], [0, 0, 1, 1], [], []>} : vector<16x64xbf16>, vector<64x64xbf16>, vector<16x64xf32> -> vector<16x64xf32>
    %48 = arith.addf %42, %47 : vector<16x64xf32>
    %c0_67 = arith.constant 0 : index
    %c0_68 = arith.constant 0 : index
    %c0_69 = arith.constant 0 : index
    %c6_70 = arith.constant 6 : index
    %c0_71 = arith.constant 0 : index
    %49 = vector.load %arg1[%c0_67, %c0_68, %c0_69, %c6_70, %c0_71] : memref<1x1x4x25x64xbf16, #tpu.memory_space<vmem>>, vector<1x1x1x16x64xbf16>
    %50 = vector.shape_cast %49 : vector<1x1x1x16x64xbf16> to vector<16x64xbf16>
    %c8 = arith.constant 8 : index
    %c0_72 = arith.constant 0 : index
    %c0_73 = arith.constant 0 : index
    %51 = vector.load %arg2[%c8, %c0_72, %c0_73] : memref<9x64x64xbf16, #tpu.memory_space<vmem>>, vector<1x64x64xbf16>
    %52 = vector.shape_cast %51 : vector<1x64x64xbf16> to vector<64x64xbf16>
    %cst_74 = arith.constant dense<0.000000e+00> : vector<16x64xf32>
    %53 = tpu.matmul %50, %52, %cst_74 {dimension_numbers = #tpu.dot_dimension_numbers<[1], [0], [0], [1], [0, 0, 1, 1], [], []>} : vector<16x64xbf16>, vector<64x64xbf16>, vector<16x64xf32> -> vector<16x64xf32>
    %54 = arith.addf %48, %53 : vector<16x64xf32>
    %55 = vector.broadcast %0 : vector<1x64xf32> to vector<16x64xf32>
    %56 = arith.mulf %54, %55 : vector<16x64xf32>
    %57 = vector.broadcast %1 : vector<1x64xf32> to vector<16x64xf32>
    %58 = arith.addf %56, %57 : vector<16x64xf32>
    %cst_75 = arith.constant 0.000000e+00 : f32
    %59 = vector.broadcast %cst_75 : f32 to vector<16x64xf32>
    %60 = arith.maximumf %58, %59 : vector<16x64xf32>
    %c0_76 = arith.constant 0 : index
    %c0_77 = arith.constant 0 : index
    %c1_78 = arith.constant 1 : index
    %c0_79 = arith.constant 0 : index
    %c0_80 = arith.constant 0 : index
    %61 = vector.load %arg1[%c0_76, %c0_77, %c1_78, %c0_79, %c0_80] : memref<1x1x4x25x64xbf16, #tpu.memory_space<vmem>>, vector<1x1x1x16x64xbf16>
    %62 = vector.shape_cast %61 : vector<1x1x1x16x64xbf16> to vector<16x64xbf16>
    %c0_81 = arith.constant 0 : index
    %c0_82 = arith.constant 0 : index
    %c0_83 = arith.constant 0 : index
    %63 = vector.load %arg2[%c0_81, %c0_82, %c0_83] : memref<9x64x64xbf16, #tpu.memory_space<vmem>>, vector<1x64x64xbf16>
    %64 = vector.shape_cast %63 : vector<1x64x64xbf16> to vector<64x64xbf16>
    %cst_84 = arith.constant dense<0.000000e+00> : vector<16x64xf32>
    %65 = tpu.matmul %62, %64, %cst_84 {dimension_numbers = #tpu.dot_dimension_numbers<[1], [0], [0], [1], [0, 0, 1, 1], [], []>} : vector<16x64xbf16>, vector<64x64xbf16>, vector<16x64xf32> -> vector<16x64xf32>
    %c0_85 = arith.constant 0 : index
    %c0_86 = arith.constant 0 : index
    %c0_87 = arith.constant 0 : index
    %c1_88 = arith.constant 1 : index
    %c0_89 = arith.constant 0 : index
    %66 = vector.load %arg1[%c0_85, %c0_86, %c0_87, %c1_88, %c0_89] : memref<1x1x4x25x64xbf16, #tpu.memory_space<vmem>>, vector<1x1x1x16x64xbf16>
    %67 = vector.shape_cast %66 : vector<1x1x1x16x64xbf16> to vector<16x64xbf16>
    %c1_90 = arith.constant 1 : index
    %c0_91 = arith.constant 0 : index
    %c0_92 = arith.constant 0 : index
    %68 = vector.load %arg2[%c1_90, %c0_91, %c0_92] : memref<9x64x64xbf16, #tpu.memory_space<vmem>>, vector<1x64x64xbf16>
    %69 = vector.shape_cast %68 : vector<1x64x64xbf16> to vector<64x64xbf16>
    %cst_93 = arith.constant dense<0.000000e+00> : vector<16x64xf32>
    %70 = tpu.matmul %67, %69, %cst_93 {dimension_numbers = #tpu.dot_dimension_numbers<[1], [0], [0], [1], [0, 0, 1, 1], [], []>} : vector<16x64xbf16>, vector<64x64xbf16>, vector<16x64xf32> -> vector<16x64xf32>
    %71 = arith.addf %65, %70 : vector<16x64xf32>
    %c0_94 = arith.constant 0 : index
    %c0_95 = arith.constant 0 : index
    %c1_96 = arith.constant 1 : index
    %c1_97 = arith.constant 1 : index
    %c0_98 = arith.constant 0 : index
    %72 = vector.load %arg1[%c0_94, %c0_95, %c1_96, %c1_97, %c0_98] : memref<1x1x4x25x64xbf16, #tpu.memory_space<vmem>>, vector<1x1x1x16x64xbf16>
    %73 = vector.shape_cast %72 : vector<1x1x1x16x64xbf16> to vector<16x64xbf16>
    %c2_99 = arith.constant 2 : index
    %c0_100 = arith.constant 0 : index
    %c0_101 = arith.constant 0 : index
    %74 = vector.load %arg2[%c2_99, %c0_100, %c0_101] : memref<9x64x64xbf16, #tpu.memory_space<vmem>>, vector<1x64x64xbf16>
    %75 = vector.shape_cast %74 : vector<1x64x64xbf16> to vector<64x64xbf16>
    %cst_102 = arith.constant dense<0.000000e+00> : vector<16x64xf32>
    %76 = tpu.matmul %73, %75, %cst_102 {dimension_numbers = #tpu.dot_dimension_numbers<[1], [0], [0], [1], [0, 0, 1, 1], [], []>} : vector<16x64xbf16>, vector<64x64xbf16>, vector<16x64xf32> -> vector<16x64xf32>
    %77 = arith.addf %71, %76 : vector<16x64xf32>
    %c0_103 = arith.constant 0 : index
    %c0_104 = arith.constant 0 : index
    %c3_105 = arith.constant 3 : index
    %c0_106 = arith.constant 0 : index
    %c0_107 = arith.constant 0 : index
    %78 = vector.load %arg1[%c0_103, %c0_104, %c3_105, %c0_106, %c0_107] : memref<1x1x4x25x64xbf16, #tpu.memory_space<vmem>>, vector<1x1x1x16x64xbf16>
    %79 = vector.shape_cast %78 : vector<1x1x1x16x64xbf16> to vector<16x64xbf16>
    %c3_108 = arith.constant 3 : index
    %c0_109 = arith.constant 0 : index
    %c0_110 = arith.constant 0 : index
    %80 = vector.load %arg2[%c3_108, %c0_109, %c0_110] : memref<9x64x64xbf16, #tpu.memory_space<vmem>>, vector<1x64x64xbf16>
    %81 = vector.shape_cast %80 : vector<1x64x64xbf16> to vector<64x64xbf16>
    %cst_111 = arith.constant dense<0.000000e+00> : vector<16x64xf32>
    %82 = tpu.matmul %79, %81, %cst_111 {dimension_numbers = #tpu.dot_dimension_numbers<[1], [0], [0], [1], [0, 0, 1, 1], [], []>} : vector<16x64xbf16>, vector<64x64xbf16>, vector<16x64xf32> -> vector<16x64xf32>
    %83 = arith.addf %77, %82 : vector<16x64xf32>
    %c0_112 = arith.constant 0 : index
    %c0_113 = arith.constant 0 : index
    %c2_114 = arith.constant 2 : index
    %c1_115 = arith.constant 1 : index
    %c0_116 = arith.constant 0 : index
    %84 = vector.load %arg1[%c0_112, %c0_113, %c2_114, %c1_115, %c0_116] : memref<1x1x4x25x64xbf16, #tpu.memory_space<vmem>>, vector<1x1x1x16x64xbf16>
    %85 = vector.shape_cast %84 : vector<1x1x1x16x64xbf16> to vector<16x64xbf16>
    %c4_117 = arith.constant 4 : index
    %c0_118 = arith.constant 0 : index
    %c0_119 = arith.constant 0 : index
    %86 = vector.load %arg2[%c4_117, %c0_118, %c0_119] : memref<9x64x64xbf16, #tpu.memory_space<vmem>>, vector<1x64x64xbf16>
    %87 = vector.shape_cast %86 : vector<1x64x64xbf16> to vector<64x64xbf16>
    %cst_120 = arith.constant dense<0.000000e+00> : vector<16x64xf32>
    %88 = tpu.matmul %85, %87, %cst_120 {dimension_numbers = #tpu.dot_dimension_numbers<[1], [0], [0], [1], [0, 0, 1, 1], [], []>} : vector<16x64xbf16>, vector<64x64xbf16>, vector<16x64xf32> -> vector<16x64xf32>
    %89 = arith.addf %83, %88 : vector<16x64xf32>
    %c0_121 = arith.constant 0 : index
    %c0_122 = arith.constant 0 : index
    %c3_123 = arith.constant 3 : index
    %c1_124 = arith.constant 1 : index
    %c0_125 = arith.constant 0 : index
    %90 = vector.load %arg1[%c0_121, %c0_122, %c3_123, %c1_124, %c0_125] : memref<1x1x4x25x64xbf16, #tpu.memory_space<vmem>>, vector<1x1x1x16x64xbf16>
    %91 = vector.shape_cast %90 : vector<1x1x1x16x64xbf16> to vector<16x64xbf16>
    %c5_126 = arith.constant 5 : index
    %c0_127 = arith.constant 0 : index
    %c0_128 = arith.constant 0 : index
    %92 = vector.load %arg2[%c5_126, %c0_127, %c0_128] : memref<9x64x64xbf16, #tpu.memory_space<vmem>>, vector<1x64x64xbf16>
    %93 = vector.shape_cast %92 : vector<1x64x64xbf16> to vector<64x64xbf16>
    %cst_129 = arith.constant dense<0.000000e+00> : vector<16x64xf32>
    %94 = tpu.matmul %91, %93, %cst_129 {dimension_numbers = #tpu.dot_dimension_numbers<[1], [0], [0], [1], [0, 0, 1, 1], [], []>} : vector<16x64xbf16>, vector<64x64xbf16>, vector<16x64xf32> -> vector<16x64xf32>
    %95 = arith.addf %89, %94 : vector<16x64xf32>
    %c0_130 = arith.constant 0 : index
    %c0_131 = arith.constant 0 : index
    %c1_132 = arith.constant 1 : index
    %c5_133 = arith.constant 5 : index
    %c0_134 = arith.constant 0 : index
    %96 = vector.load %arg1[%c0_130, %c0_131, %c1_132, %c5_133, %c0_134] : memref<1x1x4x25x64xbf16, #tpu.memory_space<vmem>>, vector<1x1x1x16x64xbf16>
    %97 = vector.shape_cast %96 : vector<1x1x1x16x64xbf16> to vector<16x64xbf16>
    %c6_135 = arith.constant 6 : index
    %c0_136 = arith.constant 0 : index
    %c0_137 = arith.constant 0 : index
    %98 = vector.load %arg2[%c6_135, %c0_136, %c0_137] : memref<9x64x64xbf16, #tpu.memory_space<vmem>>, vector<1x64x64xbf16>
    %99 = vector.shape_cast %98 : vector<1x64x64xbf16> to vector<64x64xbf16>
    %cst_138 = arith.constant dense<0.000000e+00> : vector<16x64xf32>
    %100 = tpu.matmul %97, %99, %cst_138 {dimension_numbers = #tpu.dot_dimension_numbers<[1], [0], [0], [1], [0, 0, 1, 1], [], []>} : vector<16x64xbf16>, vector<64x64xbf16>, vector<16x64xf32> -> vector<16x64xf32>
    %101 = arith.addf %95, %100 : vector<16x64xf32>
    %c0_139 = arith.constant 0 : index
    %c0_140 = arith.constant 0 : index
    %c0_141 = arith.constant 0 : index
    %c6_142 = arith.constant 6 : index
    %c0_143 = arith.constant 0 : index
    %102 = vector.load %arg1[%c0_139, %c0_140, %c0_141, %c6_142, %c0_143] : memref<1x1x4x25x64xbf16, #tpu.memory_space<vmem>>, vector<1x1x1x16x64xbf16>
    %103 = vector.shape_cast %102 : vector<1x1x1x16x64xbf16> to vector<16x64xbf16>
    %c7_144 = arith.constant 7 : index
    %c0_145 = arith.constant 0 : index
    %c0_146 = arith.constant 0 : index
    %104 = vector.load %arg2[%c7_144, %c0_145, %c0_146] : memref<9x64x64xbf16, #tpu.memory_space<vmem>>, vector<1x64x64xbf16>
    %105 = vector.shape_cast %104 : vector<1x64x64xbf16> to vector<64x64xbf16>
    %cst_147 = arith.constant dense<0.000000e+00> : vector<16x64xf32>
    %106 = tpu.matmul %103, %105, %cst_147 {dimension_numbers = #tpu.dot_dimension_numbers<[1], [0], [0], [1], [0, 0, 1, 1], [], []>} : vector<16x64xbf16>, vector<64x64xbf16>, vector<16x64xf32> -> vector<16x64xf32>
    %107 = arith.addf %101, %106 : vector<16x64xf32>
    %c0_148 = arith.constant 0 : index
    %c0_149 = arith.constant 0 : index
    %c1_150 = arith.constant 1 : index
    %c6_151 = arith.constant 6 : index
    %c0_152 = arith.constant 0 : index
    %108 = vector.load %arg1[%c0_148, %c0_149, %c1_150, %c6_151, %c0_152] : memref<1x1x4x25x64xbf16, #tpu.memory_space<vmem>>, vector<1x1x1x16x64xbf16>
    %109 = vector.shape_cast %108 : vector<1x1x1x16x64xbf16> to vector<16x64xbf16>
    %c8_153 = arith.constant 8 : index
    %c0_154 = arith.constant 0 : index
    %c0_155 = arith.constant 0 : index
    %110 = vector.load %arg2[%c8_153, %c0_154, %c0_155] : memref<9x64x64xbf16, #tpu.memory_space<vmem>>, vector<1x64x64xbf16>
    %111 = vector.shape_cast %110 : vector<1x64x64xbf16> to vector<64x64xbf16>
    %cst_156 = arith.constant dense<0.000000e+00> : vector<16x64xf32>
    %112 = tpu.matmul %109, %111, %cst_156 {dimension_numbers = #tpu.dot_dimension_numbers<[1], [0], [0], [1], [0, 0, 1, 1], [], []>} : vector<16x64xbf16>, vector<64x64xbf16>, vector<16x64xf32> -> vector<16x64xf32>
    %113 = arith.addf %107, %112 : vector<16x64xf32>
    %114 = vector.broadcast %0 : vector<1x64xf32> to vector<16x64xf32>
    %115 = arith.mulf %113, %114 : vector<16x64xf32>
    %116 = vector.broadcast %1 : vector<1x64xf32> to vector<16x64xf32>
    %117 = arith.addf %115, %116 : vector<16x64xf32>
    %cst_157 = arith.constant 0.000000e+00 : f32
    %118 = vector.broadcast %cst_157 : f32 to vector<16x64xf32>
    %119 = arith.maximumf %117, %118 : vector<16x64xf32>
    %120 = arith.maximumf %60, %119 : vector<16x64xf32>
    %c0_158 = arith.constant 0 : index
    %c0_159 = arith.constant 0 : index
    %c2_160 = arith.constant 2 : index
    %c0_161 = arith.constant 0 : index
    %c0_162 = arith.constant 0 : index
    %121 = vector.load %arg1[%c0_158, %c0_159, %c2_160, %c0_161, %c0_162] : memref<1x1x4x25x64xbf16, #tpu.memory_space<vmem>>, vector<1x1x1x16x64xbf16>
    %122 = vector.shape_cast %121 : vector<1x1x1x16x64xbf16> to vector<16x64xbf16>
    %c0_163 = arith.constant 0 : index
    %c0_164 = arith.constant 0 : index
    %c0_165 = arith.constant 0 : index
    %123 = vector.load %arg2[%c0_163, %c0_164, %c0_165] : memref<9x64x64xbf16, #tpu.memory_space<vmem>>, vector<1x64x64xbf16>
    %124 = vector.shape_cast %123 : vector<1x64x64xbf16> to vector<64x64xbf16>
    %cst_166 = arith.constant dense<0.000000e+00> : vector<16x64xf32>
    %125 = tpu.matmul %122, %124, %cst_166 {dimension_numbers = #tpu.dot_dimension_numbers<[1], [0], [0], [1], [0, 0, 1, 1], [], []>} : vector<16x64xbf16>, vector<64x64xbf16>, vector<16x64xf32> -> vector<16x64xf32>
    %c0_167 = arith.constant 0 : index
    %c0_168 = arith.constant 0 : index
    %c3_169 = arith.constant 3 : index
    %c0_170 = arith.constant 0 : index
    %c0_171 = arith.constant 0 : index
    %126 = vector.load %arg1[%c0_167, %c0_168, %c3_169, %c0_170, %c0_171] : memref<1x1x4x25x64xbf16, #tpu.memory_space<vmem>>, vector<1x1x1x16x64xbf16>
    %127 = vector.shape_cast %126 : vector<1x1x1x16x64xbf16> to vector<16x64xbf16>
    %c1_172 = arith.constant 1 : index
    %c0_173 = arith.constant 0 : index
    %c0_174 = arith.constant 0 : index
    %128 = vector.load %arg2[%c1_172, %c0_173, %c0_174] : memref<9x64x64xbf16, #tpu.memory_space<vmem>>, vector<1x64x64xbf16>
    %129 = vector.shape_cast %128 : vector<1x64x64xbf16> to vector<64x64xbf16>
    %cst_175 = arith.constant dense<0.000000e+00> : vector<16x64xf32>
    %130 = tpu.matmul %127, %129, %cst_175 {dimension_numbers = #tpu.dot_dimension_numbers<[1], [0], [0], [1], [0, 0, 1, 1], [], []>} : vector<16x64xbf16>, vector<64x64xbf16>, vector<16x64xf32> -> vector<16x64xf32>
    %131 = arith.addf %125, %130 : vector<16x64xf32>
    %c0_176 = arith.constant 0 : index
    %c0_177 = arith.constant 0 : index
    %c2_178 = arith.constant 2 : index
    %c1_179 = arith.constant 1 : index
    %c0_180 = arith.constant 0 : index
    %132 = vector.load %arg1[%c0_176, %c0_177, %c2_178, %c1_179, %c0_180] : memref<1x1x4x25x64xbf16, #tpu.memory_space<vmem>>, vector<1x1x1x16x64xbf16>
    %133 = vector.shape_cast %132 : vector<1x1x1x16x64xbf16> to vector<16x64xbf16>
    %c2_181 = arith.constant 2 : index
    %c0_182 = arith.constant 0 : index
    %c0_183 = arith.constant 0 : index
    %134 = vector.load %arg2[%c2_181, %c0_182, %c0_183] : memref<9x64x64xbf16, #tpu.memory_space<vmem>>, vector<1x64x64xbf16>
    %135 = vector.shape_cast %134 : vector<1x64x64xbf16> to vector<64x64xbf16>
    %cst_184 = arith.constant dense<0.000000e+00> : vector<16x64xf32>
    %136 = tpu.matmul %133, %135, %cst_184 {dimension_numbers = #tpu.dot_dimension_numbers<[1], [0], [0], [1], [0, 0, 1, 1], [], []>} : vector<16x64xbf16>, vector<64x64xbf16>, vector<16x64xf32> -> vector<16x64xf32>
    %137 = arith.addf %131, %136 : vector<16x64xf32>
    %c0_185 = arith.constant 0 : index
    %c0_186 = arith.constant 0 : index
    %c0_187 = arith.constant 0 : index
    %c5_188 = arith.constant 5 : index
    %c0_189 = arith.constant 0 : index
    %138 = vector.load %arg1[%c0_185, %c0_186, %c0_187, %c5_188, %c0_189] : memref<1x1x4x25x64xbf16, #tpu.memory_space<vmem>>, vector<1x1x1x16x64xbf16>
    %139 = vector.shape_cast %138 : vector<1x1x1x16x64xbf16> to vector<16x64xbf16>
    %c3_190 = arith.constant 3 : index
    %c0_191 = arith.constant 0 : index
    %c0_192 = arith.constant 0 : index
    %140 = vector.load %arg2[%c3_190, %c0_191, %c0_192] : memref<9x64x64xbf16, #tpu.memory_space<vmem>>, vector<1x64x64xbf16>
    %141 = vector.shape_cast %140 : vector<1x64x64xbf16> to vector<64x64xbf16>
    %cst_193 = arith.constant dense<0.000000e+00> : vector<16x64xf32>
    %142 = tpu.matmul %139, %141, %cst_193 {dimension_numbers = #tpu.dot_dimension_numbers<[1], [0], [0], [1], [0, 0, 1, 1], [], []>} : vector<16x64xbf16>, vector<64x64xbf16>, vector<16x64xf32> -> vector<16x64xf32>
    %143 = arith.addf %137, %142 : vector<16x64xf32>
    %c0_194 = arith.constant 0 : index
    %c0_195 = arith.constant 0 : index
    %c1_196 = arith.constant 1 : index
    %c5_197 = arith.constant 5 : index
    %c0_198 = arith.constant 0 : index
    %144 = vector.load %arg1[%c0_194, %c0_195, %c1_196, %c5_197, %c0_198] : memref<1x1x4x25x64xbf16, #tpu.memory_space<vmem>>, vector<1x1x1x16x64xbf16>
    %145 = vector.shape_cast %144 : vector<1x1x1x16x64xbf16> to vector<16x64xbf16>
    %c4_199 = arith.constant 4 : index
    %c0_200 = arith.constant 0 : index
    %c0_201 = arith.constant 0 : index
    %146 = vector.load %arg2[%c4_199, %c0_200, %c0_201] : memref<9x64x64xbf16, #tpu.memory_space<vmem>>, vector<1x64x64xbf16>
    %147 = vector.shape_cast %146 : vector<1x64x64xbf16> to vector<64x64xbf16>
    %cst_202 = arith.constant dense<0.000000e+00> : vector<16x64xf32>
    %148 = tpu.matmul %145, %147, %cst_202 {dimension_numbers = #tpu.dot_dimension_numbers<[1], [0], [0], [1], [0, 0, 1, 1], [], []>} : vector<16x64xbf16>, vector<64x64xbf16>, vector<16x64xf32> -> vector<16x64xf32>
    %149 = arith.addf %143, %148 : vector<16x64xf32>
    %c0_203 = arith.constant 0 : index
    %c0_204 = arith.constant 0 : index
    %c0_205 = arith.constant 0 : index
    %c6_206 = arith.constant 6 : index
    %c0_207 = arith.constant 0 : index
    %150 = vector.load %arg1[%c0_203, %c0_204, %c0_205, %c6_206, %c0_207] : memref<1x1x4x25x64xbf16, #tpu.memory_space<vmem>>, vector<1x1x1x16x64xbf16>
    %151 = vector.shape_cast %150 : vector<1x1x1x16x64xbf16> to vector<16x64xbf16>
    %c5_208 = arith.constant 5 : index
    %c0_209 = arith.constant 0 : index
    %c0_210 = arith.constant 0 : index
    %152 = vector.load %arg2[%c5_208, %c0_209, %c0_210] : memref<9x64x64xbf16, #tpu.memory_space<vmem>>, vector<1x64x64xbf16>
    %153 = vector.shape_cast %152 : vector<1x64x64xbf16> to vector<64x64xbf16>
    %cst_211 = arith.constant dense<0.000000e+00> : vector<16x64xf32>
    %154 = tpu.matmul %151, %153, %cst_211 {dimension_numbers = #tpu.dot_dimension_numbers<[1], [0], [0], [1], [0, 0, 1, 1], [], []>} : vector<16x64xbf16>, vector<64x64xbf16>, vector<16x64xf32> -> vector<16x64xf32>
    %155 = arith.addf %149, %154 : vector<16x64xf32>
    %c0_212 = arith.constant 0 : index
    %c0_213 = arith.constant 0 : index
    %c2_214 = arith.constant 2 : index
    %c5_215 = arith.constant 5 : index
    %c0_216 = arith.constant 0 : index
    %156 = vector.load %arg1[%c0_212, %c0_213, %c2_214, %c5_215, %c0_216] : memref<1x1x4x25x64xbf16, #tpu.memory_space<vmem>>, vector<1x1x1x16x64xbf16>
    %157 = vector.shape_cast %156 : vector<1x1x1x16x64xbf16> to vector<16x64xbf16>
    %c6_217 = arith.constant 6 : index
    %c0_218 = arith.constant 0 : index
    %c0_219 = arith.constant 0 : index
    %158 = vector.load %arg2[%c6_217, %c0_218, %c0_219] : memref<9x64x64xbf16, #tpu.memory_space<vmem>>, vector<1x64x64xbf16>
    %159 = vector.shape_cast %158 : vector<1x64x64xbf16> to vector<64x64xbf16>
    %cst_220 = arith.constant dense<0.000000e+00> : vector<16x64xf32>
    %160 = tpu.matmul %157, %159, %cst_220 {dimension_numbers = #tpu.dot_dimension_numbers<[1], [0], [0], [1], [0, 0, 1, 1], [], []>} : vector<16x64xbf16>, vector<64x64xbf16>, vector<16x64xf32> -> vector<16x64xf32>
    %161 = arith.addf %155, %160 : vector<16x64xf32>
    %c0_221 = arith.constant 0 : index
    %c0_222 = arith.constant 0 : index
    %c3_223 = arith.constant 3 : index
    %c5_224 = arith.constant 5 : index
    %c0_225 = arith.constant 0 : index
    %162 = vector.load %arg1[%c0_221, %c0_222, %c3_223, %c5_224, %c0_225] : memref<1x1x4x25x64xbf16, #tpu.memory_space<vmem>>, vector<1x1x1x16x64xbf16>
    %163 = vector.shape_cast %162 : vector<1x1x1x16x64xbf16> to vector<16x64xbf16>
    %c7_226 = arith.constant 7 : index
    %c0_227 = arith.constant 0 : index
    %c0_228 = arith.constant 0 : index
    %164 = vector.load %arg2[%c7_226, %c0_227, %c0_228] : memref<9x64x64xbf16, #tpu.memory_space<vmem>>, vector<1x64x64xbf16>
    %165 = vector.shape_cast %164 : vector<1x64x64xbf16> to vector<64x64xbf16>
    %cst_229 = arith.constant dense<0.000000e+00> : vector<16x64xf32>
    %166 = tpu.matmul %163, %165, %cst_229 {dimension_numbers = #tpu.dot_dimension_numbers<[1], [0], [0], [1], [0, 0, 1, 1], [], []>} : vector<16x64xbf16>, vector<64x64xbf16>, vector<16x64xf32> -> vector<16x64xf32>
    %167 = arith.addf %161, %166 : vector<16x64xf32>
    %c0_230 = arith.constant 0 : index
    %c0_231 = arith.constant 0 : index
    %c2_232 = arith.constant 2 : index
    %c6_233 = arith.constant 6 : index
    %c0_234 = arith.constant 0 : index
    %168 = vector.load %arg1[%c0_230, %c0_231, %c2_232, %c6_233, %c0_234] : memref<1x1x4x25x64xbf16, #tpu.memory_space<vmem>>, vector<1x1x1x16x64xbf16>
    %169 = vector.shape_cast %168 : vector<1x1x1x16x64xbf16> to vector<16x64xbf16>
    %c8_235 = arith.constant 8 : index
    %c0_236 = arith.constant 0 : index
    %c0_237 = arith.constant 0 : index
    %170 = vector.load %arg2[%c8_235, %c0_236, %c0_237] : memref<9x64x64xbf16, #tpu.memory_space<vmem>>, vector<1x64x64xbf16>
    %171 = vector.shape_cast %170 : vector<1x64x64xbf16> to vector<64x64xbf16>
    %cst_238 = arith.constant dense<0.000000e+00> : vector<16x64xf32>
    %172 = tpu.matmul %169, %171, %cst_238 {dimension_numbers = #tpu.dot_dimension_numbers<[1], [0], [0], [1], [0, 0, 1, 1], [], []>} : vector<16x64xbf16>, vector<64x64xbf16>, vector<16x64xf32> -> vector<16x64xf32>
    %173 = arith.addf %167, %172 : vector<16x64xf32>
    %174 = vector.broadcast %0 : vector<1x64xf32> to vector<16x64xf32>
    %175 = arith.mulf %173, %174 : vector<16x64xf32>
    %176 = vector.broadcast %1 : vector<1x64xf32> to vector<16x64xf32>
    %177 = arith.addf %175, %176 : vector<16x64xf32>
    %cst_239 = arith.constant 0.000000e+00 : f32
    %178 = vector.broadcast %cst_239 : f32 to vector<16x64xf32>
    %179 = arith.maximumf %177, %178 : vector<16x64xf32>
    %180 = arith.maximumf %120, %179 : vector<16x64xf32>
    %c0_240 = arith.constant 0 : index
    %c0_241 = arith.constant 0 : index
    %c3_242 = arith.constant 3 : index
    %c0_243 = arith.constant 0 : index
    %c0_244 = arith.constant 0 : index
    %181 = vector.load %arg1[%c0_240, %c0_241, %c3_242, %c0_243, %c0_244] : memref<1x1x4x25x64xbf16, #tpu.memory_space<vmem>>, vector<1x1x1x16x64xbf16>
    %182 = vector.shape_cast %181 : vector<1x1x1x16x64xbf16> to vector<16x64xbf16>
    %c0_245 = arith.constant 0 : index
    %c0_246 = arith.constant 0 : index
    %c0_247 = arith.constant 0 : index
    %183 = vector.load %arg2[%c0_245, %c0_246, %c0_247] : memref<9x64x64xbf16, #tpu.memory_space<vmem>>, vector<1x64x64xbf16>
    %184 = vector.shape_cast %183 : vector<1x64x64xbf16> to vector<64x64xbf16>
    %cst_248 = arith.constant dense<0.000000e+00> : vector<16x64xf32>
    %185 = tpu.matmul %182, %184, %cst_248 {dimension_numbers = #tpu.dot_dimension_numbers<[1], [0], [0], [1], [0, 0, 1, 1], [], []>} : vector<16x64xbf16>, vector<64x64xbf16>, vector<16x64xf32> -> vector<16x64xf32>
    %c0_249 = arith.constant 0 : index
    %c0_250 = arith.constant 0 : index
    %c2_251 = arith.constant 2 : index
    %c1_252 = arith.constant 1 : index
    %c0_253 = arith.constant 0 : index
    %186 = vector.load %arg1[%c0_249, %c0_250, %c2_251, %c1_252, %c0_253] : memref<1x1x4x25x64xbf16, #tpu.memory_space<vmem>>, vector<1x1x1x16x64xbf16>
    %187 = vector.shape_cast %186 : vector<1x1x1x16x64xbf16> to vector<16x64xbf16>
    %c1_254 = arith.constant 1 : index
    %c0_255 = arith.constant 0 : index
    %c0_256 = arith.constant 0 : index
    %188 = vector.load %arg2[%c1_254, %c0_255, %c0_256] : memref<9x64x64xbf16, #tpu.memory_space<vmem>>, vector<1x64x64xbf16>
    %189 = vector.shape_cast %188 : vector<1x64x64xbf16> to vector<64x64xbf16>
    %cst_257 = arith.constant dense<0.000000e+00> : vector<16x64xf32>
    %190 = tpu.matmul %187, %189, %cst_257 {dimension_numbers = #tpu.dot_dimension_numbers<[1], [0], [0], [1], [0, 0, 1, 1], [], []>} : vector<16x64xbf16>, vector<64x64xbf16>, vector<16x64xf32> -> vector<16x64xf32>
    %191 = arith.addf %185, %190 : vector<16x64xf32>
    %c0_258 = arith.constant 0 : index
    %c0_259 = arith.constant 0 : index
    %c3_260 = arith.constant 3 : index
    %c1_261 = arith.constant 1 : index
    %c0_262 = arith.constant 0 : index
    %192 = vector.load %arg1[%c0_258, %c0_259, %c3_260, %c1_261, %c0_262] : memref<1x1x4x25x64xbf16, #tpu.memory_space<vmem>>, vector<1x1x1x16x64xbf16>
    %193 = vector.shape_cast %192 : vector<1x1x1x16x64xbf16> to vector<16x64xbf16>
    %c2_263 = arith.constant 2 : index
    %c0_264 = arith.constant 0 : index
    %c0_265 = arith.constant 0 : index
    %194 = vector.load %arg2[%c2_263, %c0_264, %c0_265] : memref<9x64x64xbf16, #tpu.memory_space<vmem>>, vector<1x64x64xbf16>
    %195 = vector.shape_cast %194 : vector<1x64x64xbf16> to vector<64x64xbf16>
    %cst_266 = arith.constant dense<0.000000e+00> : vector<16x64xf32>
    %196 = tpu.matmul %193, %195, %cst_266 {dimension_numbers = #tpu.dot_dimension_numbers<[1], [0], [0], [1], [0, 0, 1, 1], [], []>} : vector<16x64xbf16>, vector<64x64xbf16>, vector<16x64xf32> -> vector<16x64xf32>
    %197 = arith.addf %191, %196 : vector<16x64xf32>
    %c0_267 = arith.constant 0 : index
    %c0_268 = arith.constant 0 : index
    %c1_269 = arith.constant 1 : index
    %c5_270 = arith.constant 5 : index
    %c0_271 = arith.constant 0 : index
    %198 = vector.load %arg1[%c0_267, %c0_268, %c1_269, %c5_270, %c0_271] : memref<1x1x4x25x64xbf16, #tpu.memory_space<vmem>>, vector<1x1x1x16x64xbf16>
    %199 = vector.shape_cast %198 : vector<1x1x1x16x64xbf16> to vector<16x64xbf16>
    %c3_272 = arith.constant 3 : index
    %c0_273 = arith.constant 0 : index
    %c0_274 = arith.constant 0 : index
    %200 = vector.load %arg2[%c3_272, %c0_273, %c0_274] : memref<9x64x64xbf16, #tpu.memory_space<vmem>>, vector<1x64x64xbf16>
    %201 = vector.shape_cast %200 : vector<1x64x64xbf16> to vector<64x64xbf16>
    %cst_275 = arith.constant dense<0.000000e+00> : vector<16x64xf32>
    %202 = tpu.matmul %199, %201, %cst_275 {dimension_numbers = #tpu.dot_dimension_numbers<[1], [0], [0], [1], [0, 0, 1, 1], [], []>} : vector<16x64xbf16>, vector<64x64xbf16>, vector<16x64xf32> -> vector<16x64xf32>
    %203 = arith.addf %197, %202 : vector<16x64xf32>
    %c0_276 = arith.constant 0 : index
    %c0_277 = arith.constant 0 : index
    %c0_278 = arith.constant 0 : index
    %c6_279 = arith.constant 6 : index
    %c0_280 = arith.constant 0 : index
    %204 = vector.load %arg1[%c0_276, %c0_277, %c0_278, %c6_279, %c0_280] : memref<1x1x4x25x64xbf16, #tpu.memory_space<vmem>>, vector<1x1x1x16x64xbf16>
    %205 = vector.shape_cast %204 : vector<1x1x1x16x64xbf16> to vector<16x64xbf16>
    %c4_281 = arith.constant 4 : index
    %c0_282 = arith.constant 0 : index
    %c0_283 = arith.constant 0 : index
    %206 = vector.load %arg2[%c4_281, %c0_282, %c0_283] : memref<9x64x64xbf16, #tpu.memory_space<vmem>>, vector<1x64x64xbf16>
    %207 = vector.shape_cast %206 : vector<1x64x64xbf16> to vector<64x64xbf16>
    %cst_284 = arith.constant dense<0.000000e+00> : vector<16x64xf32>
    %208 = tpu.matmul %205, %207, %cst_284 {dimension_numbers = #tpu.dot_dimension_numbers<[1], [0], [0], [1], [0, 0, 1, 1], [], []>} : vector<16x64xbf16>, vector<64x64xbf16>, vector<16x64xf32> -> vector<16x64xf32>
    %209 = arith.addf %203, %208 : vector<16x64xf32>
    %c0_285 = arith.constant 0 : index
    %c0_286 = arith.constant 0 : index
    %c1_287 = arith.constant 1 : index
    %c6_288 = arith.constant 6 : index
    %c0_289 = arith.constant 0 : index
    %210 = vector.load %arg1[%c0_285, %c0_286, %c1_287, %c6_288, %c0_289] : memref<1x1x4x25x64xbf16, #tpu.memory_space<vmem>>, vector<1x1x1x16x64xbf16>
    %211 = vector.shape_cast %210 : vector<1x1x1x16x64xbf16> to vector<16x64xbf16>
    %c5_290 = arith.constant 5 : index
    %c0_291 = arith.constant 0 : index
    %c0_292 = arith.constant 0 : index
    %212 = vector.load %arg2[%c5_290, %c0_291, %c0_292] : memref<9x64x64xbf16, #tpu.memory_space<vmem>>, vector<1x64x64xbf16>
    %213 = vector.shape_cast %212 : vector<1x64x64xbf16> to vector<64x64xbf16>
    %cst_293 = arith.constant dense<0.000000e+00> : vector<16x64xf32>
    %214 = tpu.matmul %211, %213, %cst_293 {dimension_numbers = #tpu.dot_dimension_numbers<[1], [0], [0], [1], [0, 0, 1, 1], [], []>} : vector<16x64xbf16>, vector<64x64xbf16>, vector<16x64xf32> -> vector<16x64xf32>
    %215 = arith.addf %209, %214 : vector<16x64xf32>
    %c0_294 = arith.constant 0 : index
    %c0_295 = arith.constant 0 : index
    %c3_296 = arith.constant 3 : index
    %c5_297 = arith.constant 5 : index
    %c0_298 = arith.constant 0 : index
    %216 = vector.load %arg1[%c0_294, %c0_295, %c3_296, %c5_297, %c0_298] : memref<1x1x4x25x64xbf16, #tpu.memory_space<vmem>>, vector<1x1x1x16x64xbf16>
    %217 = vector.shape_cast %216 : vector<1x1x1x16x64xbf16> to vector<16x64xbf16>
    %c6_299 = arith.constant 6 : index
    %c0_300 = arith.constant 0 : index
    %c0_301 = arith.constant 0 : index
    %218 = vector.load %arg2[%c6_299, %c0_300, %c0_301] : memref<9x64x64xbf16, #tpu.memory_space<vmem>>, vector<1x64x64xbf16>
    %219 = vector.shape_cast %218 : vector<1x64x64xbf16> to vector<64x64xbf16>
    %cst_302 = arith.constant dense<0.000000e+00> : vector<16x64xf32>
    %220 = tpu.matmul %217, %219, %cst_302 {dimension_numbers = #tpu.dot_dimension_numbers<[1], [0], [0], [1], [0, 0, 1, 1], [], []>} : vector<16x64xbf16>, vector<64x64xbf16>, vector<16x64xf32> -> vector<16x64xf32>
    %221 = arith.addf %215, %220 : vector<16x64xf32>
    %c0_303 = arith.constant 0 : index
    %c0_304 = arith.constant 0 : index
    %c2_305 = arith.constant 2 : index
    %c6_306 = arith.constant 6 : index
    %c0_307 = arith.constant 0 : index
    %222 = vector.load %arg1[%c0_303, %c0_304, %c2_305, %c6_306, %c0_307] : memref<1x1x4x25x64xbf16, #tpu.memory_space<vmem>>, vector<1x1x1x16x64xbf16>
    %223 = vector.shape_cast %222 : vector<1x1x1x16x64xbf16> to vector<16x64xbf16>
    %c7_308 = arith.constant 7 : index
    %c0_309 = arith.constant 0 : index
    %c0_310 = arith.constant 0 : index
    %224 = vector.load %arg2[%c7_308, %c0_309, %c0_310] : memref<9x64x64xbf16, #tpu.memory_space<vmem>>, vector<1x64x64xbf16>
    %225 = vector.shape_cast %224 : vector<1x64x64xbf16> to vector<64x64xbf16>
    %cst_311 = arith.constant dense<0.000000e+00> : vector<16x64xf32>
    %226 = tpu.matmul %223, %225, %cst_311 {dimension_numbers = #tpu.dot_dimension_numbers<[1], [0], [0], [1], [0, 0, 1, 1], [], []>} : vector<16x64xbf16>, vector<64x64xbf16>, vector<16x64xf32> -> vector<16x64xf32>
    %227 = arith.addf %221, %226 : vector<16x64xf32>
    %c0_312 = arith.constant 0 : index
    %c0_313 = arith.constant 0 : index
    %c3_314 = arith.constant 3 : index
    %c6_315 = arith.constant 6 : index
    %c0_316 = arith.constant 0 : index
    %228 = vector.load %arg1[%c0_312, %c0_313, %c3_314, %c6_315, %c0_316] : memref<1x1x4x25x64xbf16, #tpu.memory_space<vmem>>, vector<1x1x1x16x64xbf16>
    %229 = vector.shape_cast %228 : vector<1x1x1x16x64xbf16> to vector<16x64xbf16>
    %c8_317 = arith.constant 8 : index
    %c0_318 = arith.constant 0 : index
    %c0_319 = arith.constant 0 : index
    %230 = vector.load %arg2[%c8_317, %c0_318, %c0_319] : memref<9x64x64xbf16, #tpu.memory_space<vmem>>, vector<1x64x64xbf16>
    %231 = vector.shape_cast %230 : vector<1x64x64xbf16> to vector<64x64xbf16>
    %cst_320 = arith.constant dense<0.000000e+00> : vector<16x64xf32>
    %232 = tpu.matmul %229, %231, %cst_320 {dimension_numbers = #tpu.dot_dimension_numbers<[1], [0], [0], [1], [0, 0, 1, 1], [], []>} : vector<16x64xbf16>, vector<64x64xbf16>, vector<16x64xf32> -> vector<16x64xf32>
    %233 = arith.addf %227, %232 : vector<16x64xf32>
    %234 = vector.broadcast %0 : vector<1x64xf32> to vector<16x64xf32>
    %235 = arith.mulf %233, %234 : vector<16x64xf32>
    %236 = vector.broadcast %1 : vector<1x64xf32> to vector<16x64xf32>
    %237 = arith.addf %235, %236 : vector<16x64xf32>
    %cst_321 = arith.constant 0.000000e+00 : f32
    %238 = vector.broadcast %cst_321 : f32 to vector<16x64xf32>
    %239 = arith.maximumf %237, %238 : vector<16x64xf32>
    %240 = arith.maximumf %180, %239 : vector<16x64xf32>
    %241 = arith.truncf %240 : vector<16x64xf32> to vector<16x64xbf16>
    %c0_322 = arith.constant 0 : index
    %c0_323 = arith.constant 0 : index
    %c0_324 = arith.constant 0 : index
    %c0_325 = arith.constant 0 : index
    %242 = vector.load %arg4[%c0_322, %c0_323, %c0_324, %c0_325] : memref<1x1x16x64xbf16, #tpu.memory_space<vmem>>, vector<1x1x16x64xbf16>
    %243 = vector.shape_cast %242 : vector<1x1x16x64xbf16> to vector<16x64xbf16>
    %244 = vector.shape_cast %241 : vector<16x64xbf16> to vector<1x1x16x64xbf16>
    tpu.vector_store %arg4[%c0_322, %c0_323, %c0_324, %c0_325], %244 {strides = array<i32>} : memref<1x1x16x64xbf16, #tpu.memory_space<vmem>>, vector<1x1x16x64xbf16>,
    return
  }
  func.func @transform_0(%arg0: i32) -> (i32, i32, i32, i32, i32) {
    %c0_i32 = arith.constant 0 : i32
    %c0_i32_0 = arith.constant 0 : i32
    %c0_i32_1 = arith.constant 0 : i32
    %c0_i32_2 = arith.constant 0 : i32
    %c0_i32_3 = arith.constant 0 : i32
    return %arg0, %c0_i32, %c0_i32_0, %c0_i32_1, %c0_i32_2 : i32, i32, i32, i32, i32
  }
  func.func @transform_1(%arg0: i32) -> (i32, i32, i32) {
    %c0_i32 = arith.constant 0 : i32
    %c0_i32_0 = arith.constant 0 : i32
    %c0_i32_1 = arith.constant 0 : i32
    %c0_i32_2 = arith.constant 0 : i32
    return %c0_i32, %c0_i32_0, %c0_i32_1 : i32, i32, i32
  }
  func.func @transform_2(%arg0: i32) -> (i32, i32) {
    %c0_i32 = arith.constant 0 : i32
    %c0_i32_0 = arith.constant 0 : i32
    %c0_i32_1 = arith.constant 0 : i32
    return %c0_i32, %c0_i32_0 : i32, i32
  }
  func.func @transform_3(%arg0: i32) -> (i32, i32, i32, i32) {
    %c0_i32 = arith.constant 0 : i32
    %c0_i32_0 = arith.constant 0 : i32
    %c0_i32_1 = arith.constant 0 : i32
    %c0_i32_2 = arith.constant 0 : i32
    return %arg0, %c0_i32, %c0_i32_0, %c0_i32_1 : i32, i32, i32, i32
  }
}

module attributes {stable_mosaic.version = 11 : i64} {
  func.func @_fc_kernel(%arg0: i32, %arg1: memref<2x1024xbf16, #tpu.memory_space<vmem>>, %arg2: memref<1024x128xbf16, #tpu.memory_space<vmem>>, %arg3: memref<1x128xf32, #tpu.memory_space<vmem>>, %arg4: memref<128x128xbf16, #tpu.memory_space<vmem>>, %arg5: memref<1x128xf32, #tpu.memory_space<vmem>>, %arg6: memref<2x128xf32, #tpu.memory_space<vmem>>) attributes {dimension_semantics = [#tpu.dimension_semantics<parallel>], iteration_bounds = array<i64: 1>, scalar_prefetch = 0 : i64, scratch_operands = 0 : i64, tpu.core_type = #tpu.core_type<tc>, window_params = [{transform_indices = @transform_0, window_bounds = array<i64: 2, 1024>}, {pipeline_mode = #tpu.pipeline_mode<synchronous>, transform_indices = @transform_1, window_bounds = array<i64: 1024, 128>}, {pipeline_mode = #tpu.pipeline_mode<synchronous>, transform_indices = @transform_2, window_bounds = array<i64: 1, 128>}, {pipeline_mode = #tpu.pipeline_mode<synchronous>, transform_indices = @transform_3, window_bounds = array<i64: 128, 128>}, {pipeline_mode = #tpu.pipeline_mode<synchronous>, transform_indices = @transform_4, window_bounds = array<i64: 1, 128>}, {transform_indices = @transform_5, window_bounds = array<i64: 2, 128>}]} {
    %c0 = arith.constant 0 : index
    %c0_0 = arith.constant 0 : index
    %0 = vector.load %arg1[%c0, %c0_0] : memref<2x1024xbf16, #tpu.memory_space<vmem>>, vector<2x1024xbf16>
    %c0_1 = arith.constant 0 : index
    %c0_2 = arith.constant 0 : index
    %1 = vector.load %arg2[%c0_1, %c0_2] : memref<1024x128xbf16, #tpu.memory_space<vmem>>, vector<1024x128xbf16>
    %cst = arith.constant dense<0.000000e+00> : vector<2x128xf32>
    %2 = tpu.matmul %0, %1, %cst {dimension_numbers = #tpu.dot_dimension_numbers<[1], [0], [0], [1], [0, 0, 1, 1], [], []>} : vector<2x1024xbf16>, vector<1024x128xbf16>, vector<2x128xf32> -> vector<2x128xf32>
    %c0_3 = arith.constant 0 : index
    %c0_4 = arith.constant 0 : index
    %3 = vector.load %arg3[%c0_3, %c0_4] : memref<1x128xf32, #tpu.memory_space<vmem>>, vector<1x128xf32>
    %4 = vector.broadcast %3 : vector<1x128xf32> to vector<2x128xf32>
    %5 = arith.addf %2, %4 : vector<2x128xf32>
    %cst_5 = arith.constant 0.000000e+00 : f32
    %6 = vector.broadcast %cst_5 : f32 to vector<2x128xf32>
    %7 = arith.maximumf %5, %6 : vector<2x128xf32>
    %8 = arith.truncf %7 : vector<2x128xf32> to vector<2x128xbf16>
    %c0_6 = arith.constant 0 : index
    %c0_7 = arith.constant 0 : index
    %9 = vector.load %arg4[%c0_6, %c0_7] : memref<128x128xbf16, #tpu.memory_space<vmem>>, vector<128x128xbf16>
    %cst_8 = arith.constant dense<0.000000e+00> : vector<2x128xf32>
    %10 = tpu.matmul %8, %9, %cst_8 {dimension_numbers = #tpu.dot_dimension_numbers<[1], [0], [0], [1], [0, 0, 1, 1], [], []>} : vector<2x128xbf16>, vector<128x128xbf16>, vector<2x128xf32> -> vector<2x128xf32>
    %c0_9 = arith.constant 0 : index
    %c0_10 = arith.constant 0 : index
    %11 = vector.load %arg5[%c0_9, %c0_10] : memref<1x128xf32, #tpu.memory_space<vmem>>, vector<1x128xf32>
    %12 = vector.broadcast %11 : vector<1x128xf32> to vector<2x128xf32>
    %13 = arith.addf %10, %12 : vector<2x128xf32>
    %c0_11 = arith.constant 0 : index
    %c0_12 = arith.constant 0 : index
    %14 = vector.load %arg6[%c0_11, %c0_12] : memref<2x128xf32, #tpu.memory_space<vmem>>, vector<2x128xf32>
    tpu.vector_store %arg6[%c0_11, %c0_12], %13 {strides = array<i32>} : memref<2x128xf32, #tpu.memory_space<vmem>>, vector<2x128xf32>,
    return
  }
  func.func @transform_0(%arg0: i32) -> (i32, i32) {
    %c0_i32 = arith.constant 0 : i32
    %c0_i32_0 = arith.constant 0 : i32
    return %arg0, %c0_i32 : i32, i32
  }
  func.func @transform_1(%arg0: i32) -> (i32, i32) {
    %c0_i32 = arith.constant 0 : i32
    %c0_i32_0 = arith.constant 0 : i32
    %c0_i32_1 = arith.constant 0 : i32
    return %c0_i32, %c0_i32_0 : i32, i32
  }
  func.func @transform_2(%arg0: i32) -> (i32, i32) {
    %c0_i32 = arith.constant 0 : i32
    %c0_i32_0 = arith.constant 0 : i32
    %c0_i32_1 = arith.constant 0 : i32
    return %c0_i32, %c0_i32_0 : i32, i32
  }
  func.func @transform_3(%arg0: i32) -> (i32, i32) {
    %c0_i32 = arith.constant 0 : i32
    %c0_i32_0 = arith.constant 0 : i32
    %c0_i32_1 = arith.constant 0 : i32
    return %c0_i32, %c0_i32_0 : i32, i32
  }
  func.func @transform_4(%arg0: i32) -> (i32, i32) {
    %c0_i32 = arith.constant 0 : i32
    %c0_i32_0 = arith.constant 0 : i32
    %c0_i32_1 = arith.constant 0 : i32
    return %c0_i32, %c0_i32_0 : i32, i32
  }
  func.func @transform_5(%arg0: i32) -> (i32, i32) {
    %c0_i32 = arith.constant 0 : i32
    %c0_i32_0 = arith.constant 0 : i32
    return %arg0, %c0_i32 : i32, i32
  }
}

</mosaic_0001>

<bundles_post_ra>
// kernel: net_forward.4
= control target key start
LH: loop header
LB: loop body
LE: loop exit
PB: predicated region body
PF: predicated region fallthrough
CT: control target
= control target key end

     0   :  { %s2422_s12 = smov 0   ;;  %s3006_s0 = inlined_call_operand.vmem [shape: bf16[2,4,196,9], index: 0, kind: input, shape index: {}]   ;;  %s3007_s1 = inlined_call_operand.vmem [shape: bf16[9,32], index: 1, kind: input, shape index: {}]   ;;  %s3008_s2 = inlined_call_operand.vmem [shape: f32[2,32], index: 2, kind: input, shape index: {}]   ;;  %s3009_s3 = inlined_call_operand.vmem [shape: bf16[2,196,32], index: 3, kind: output, shape index: {}]  }
   0x1 LB: > { %s1810_s13 = sadd.s32 4294967295, %s2397_s12   ;;  %p1814_p0 = scmp.ge.s32.totalorder %s2397_s12, 1  ;;  %s2397_s12 = sphi %s2422_s12, %s13_s12  }
   0x2   : > { %p137_p1 = scmp.lt.s32.totalorder %s2397_s12, 3 }
   0x4   : > { %p138_p2 = pnand %p1814_p0, %p137_p1 }
   0x5   : > { %vm309_vm0 = vcmask (!%p138_p2), 1043456   ;;  %v2399_v0 = vmov (!%p138_p2), 0.0   ;;  %v2336_v1 = vld [vmem:[%s3007_s1] sm:$0x1f] (!%p138_p2)   ;;  %vm310_vm1 = vcmask (!%p138_p2), 1044480   ;;  %p161_p3 = scmp.lt.s32.totalorder (!%p138_p2), %s1810_s13, 1 }
   0x6   : > { %141 = sbr.rel (%p138_p2) target bundleno = 443 (0x1bb), region = 32  ;;  %2107 = vmatprep.subr.bf16.mxu0 (!%p138_p2), %v2399_v0  ;;  %2161 = vmatprep.subr.bf16.mxu1 (!%p138_p2), %v2399_v0  ;;  %v2400_v2 = vmov (!%p138_p2), 65535   ;;  %vm2401_vm2 = vmmov (!%p138_p2), 0   ;;  %vm269_vm3 = vcmask (!%p138_p2), 72704   ;;  %v2656_v58 = vld [vmem:[%s3008_s2] ss:$0 sm:$0xff] (!%p138_p2) }
   0x7   : > { %v311_v3 = vsel (!%p138_p2), %vm309_vm0, 4294967295, %v2400_v2  ;;  %2109 = vmatprep.mubr.msk.bf16.mxu0 (!%p138_p2), %vm2401_vm2, %v2399_v0  ;;  %2163 = vmatprep.mubr.msk.bf16.mxu1 (!%p138_p2), %vm2401_vm2, %v2399_v0  ;;  %v2661_v59 = vld [vmem:[%s3008_s2 + $0x1] ss:$0 sm:$0xff] (!%p138_p2)  ;;  %vm1728_vm4 = vcmask (!%p138_p2), 257024   ;;  %vm1753_vm5 = vcmask (!%p138_p2), 254976  }
   0x8   : > { %v312_v4 = vsel (!%p138_p2), %vm310_vm1, %v311_v3, 0 }
   0x9   : > { %v314_v5 = vand.u32 (!%p138_p2), %v2336_v1, %v312_v4 }
   0xb   : > { %2108 = vmatpush3.bf16.msra.mxu0 (!%p138_p2), %v314_v5  ;;  %2162 = vmatpush3.bf16.msra.mxu1 (!%p138_p2), %v314_v5 }
   0xc   : > { %2215 = vmatprep.subr.bf16.mxu0 (!%p138_p2), %v2399_v0  ;;  %2269 = vmatprep.subr.bf16.mxu1 (!%p138_p2), %v2399_v0 }
   0xd   : > { %s3011_s13 = smov (!%p161_p3, %s1810_s13), 1 }
   0xe   : > { %s2323_s16 = smul.u32 400, %s3011_s13 }
   0xf   : > { %s2324_s24 = smul.u32 100, %s3011_s13 }
  0x10   : > { %s2446_s19 = scalar_lea.vmem %s3006_s0, %s2323_s16 }
  0x11   : > { %v2337_v6 = vld [vmem:[%s2446_s19] sm:$0xff]   ;;  %v2339_v8 = vld [vmem:[%s2446_s19 + $0x8] sm:$0xff]   ;;  %v2341_v10 = vld [vmem:[%s2446_s19 + $0x10] sm:$0xff]   ;;  %s2828_s27 = scalar_lea.vmem %s3009_s3, %s2324_s24 }
  0x12   : > { %v2338_v7 = vld [vmem:[%s2446_s19 + $0x64] sm:$0xff]   ;;  %2110 = vmatmul.mubr.msk.bf16.vlgmr.msra.gmra.mrb[0].mxu0 %vm269_vm3, %v2337_v6  ;;  %v2340_v9 = vld [vmem:[%s2446_s19 + $0x6c] sm:$0xff]   ;;  %v2342_v11 = vld [vmem:[%s2446_s19 + $0x74] sm:$0xff]  }
  0x13   : > { %2164 = vmatmul.mubr.msk.bf16.vlgmr.msra.gmra.mrb[0].mxu1 %vm269_vm3, %v2338_v7  ;;  %2216 = vmatpush3.bf16.msra.mxu0 %v314_v5  ;;  %v2343_v12 = vld [vmem:[%s2446_s19 + $0x18] sm:$0xff]   ;;  %v2345_v14 = vld [vmem:[%s2446_s19 + $0x20] sm:$0xff]   ;;  %v2347_v16 = vld [vmem:[%s2446_s19 + $0x28] sm:$0xff]  }
  0x14   : > { %2270 = vmatpush3.bf16.msra.mxu1 %v314_v5  ;;  %2113 = vmatprep.mubr.msk.bf16.mxu0 %vm2401_vm2, %v2399_v0  ;;  %v2344_v13 = vld [vmem:[%s2446_s19 + $0x7c] sm:$0xff]   ;;  %v2346_v15 = vld [vmem:[%s2446_s19 + $0x84] sm:$0xff]   ;;  %v2348_v17 = vld [vmem:[%s2446_s19 + $0x8c] sm:$0xff]  }
  0x15   : > { %2167 = vmatprep.mubr.msk.bf16.mxu1 %vm2401_vm2, %v2399_v0  ;;  %v2349_v18 = vld [vmem:[%s2446_s19 + $0x30] sm:$0xff]   ;;  %v2351_v20 = vld [vmem:[%s2446_s19 + $0x38] sm:$0xff]   ;;  %v2353_v22 = vld [vmem:[%s2446_s19 + $0x40] sm:$0xff]  }
  0x16   : > { %v2350_v19 = vld [vmem:[%s2446_s19 + $0x94] sm:$0xff]   ;;  %v2352_v21 = vld [vmem:[%s2446_s19 + $0x9c] sm:$0xff]   ;;  %v2354_v23 = vld [vmem:[%s2446_s19 + $0xa4] sm:$0xff]  }
  0x17   : > { %v2355_v24 = vld [vmem:[%s2446_s19 + $0x48] sm:$0xff]   ;;  %v2357_v26 = vld [vmem:[%s2446_s19 + $0x50] sm:$0xff]   ;;  %v2359_v28 = vld [vmem:[%s2446_s19 + $0x58] sm:$0xff]  }
  0x18   : > { %v2356_v25 = vld [vmem:[%s2446_s19 + $0xac] sm:$0xff]   ;;  %v2358_v27 = vld [vmem:[%s2446_s19 + $0xb4] sm:$0xff]   ;;  %v2360_v29 = vld [vmem:[%s2446_s19 + $0xbc] sm:$0xff]  }
  0x19   : > { %v2361_v30 = vld [vmem:[%s2446_s19 + $0x60] ss:$0 sps:$4 sm:$0x33]   ;;  %v2362_v31 = vld [vmem:[%s2446_s19 + $0xc4] ss:$0 sps:$4 sm:$0x33]  }
  0x1a   : > { %2114 = vmatmul.mubr.msk.bf16.gmra.mrb[4].mxu0 %vm269_vm3, %v2339_v8  ;;  %v2363_v32 = vld [vmem:[%s2446_s19 + $0xc8] sm:$0xff]   ;;  %v2365_v34 = vld [vmem:[%s2446_s19 + $0xd0] sm:$0xff]   ;;  %v2367_v36 = vld [vmem:[%s2446_s19 + $0xd8] sm:$0xff]  }
  0x1b   : > { %2168 = vmatmul.mubr.msk.bf16.gmra.mrb[4].mxu1 %vm269_vm3, %v2340_v9  ;;  %2117 = vmatprep.mubr.msk.bf16.mxu0 %vm2401_vm2, %v2399_v0  ;;  %v2364_v33 = vld [vmem:[%s2446_s19 + $0x12c] sm:$0xff]   ;;  %v2366_v35 = vld [vmem:[%s2446_s19 + $0x134] sm:$0xff]   ;;  %v2368_v37 = vld [vmem:[%s2446_s19 + $0x13c] sm:$0xff]  }
  0x1c   : > { %2171 = vmatprep.mubr.msk.bf16.mxu1 %vm2401_vm2, %v2399_v0  ;;  %v2369_v38 = vld [vmem:[%s2446_s19 + $0xe0] sm:$0xff]   ;;  %v2371_v40 = vld [vmem:[%s2446_s19 + $0xe8] sm:$0xff]   ;;  %v2373_v42 = vld [vmem:[%s2446_s19 + $0xf0] sm:$0xff]  }
  0x1d   : > { %v2370_v39 = vld [vmem:[%s2446_s19 + $0x144] sm:$0xff]   ;;  %v2372_v41 = vld [vmem:[%s2446_s19 + $0x14c] sm:$0xff]   ;;  %v2374_v43 = vld [vmem:[%s2446_s19 + $0x154] sm:$0xff]  }
  0x1e   : > { %v2375_v44 = vld [vmem:[%s2446_s19 + $0xf8] sm:$0xff]   ;;  %v2377_v46 = vld [vmem:[%s2446_s19 + $0x100] sm:$0xff]   ;;  %v2379_v48 = vld [vmem:[%s2446_s19 + $0x108] sm:$0xff]  }
  0x1f   : > { %v2376_v45 = vld [vmem:[%s2446_s19 + $0x15c] sm:$0xff]   ;;  %v2378_v47 = vld [vmem:[%s2446_s19 + $0x164] sm:$0xff]   ;;  %v2380_v49 = vld [vmem:[%s2446_s19 + $0x16c] sm:$0xff]  }
  0x20   : > { %v2381_v50 = vld [vmem:[%s2446_s19 + $0x110] sm:$0xff]   ;;  %v2383_v52 = vld [vmem:[%s2446_s19 + $0x118] sm:$0xff]   ;;  %v2385_v54 = vld [vmem:[%s2446_s19 + $0x120] sm:$0xff]  }
  0x21   : > { %v2382_v51 = vld [vmem:[%s2446_s19 + $0x174] sm:$0xff]   ;;  %v2384_v53 = vld [vmem:[%s2446_s19 + $0x17c] sm:$0xff]   ;;  %v2386_v55 = vld [vmem:[%s2446_s19 + $0x184] sm:$0xff]  }
  0x22   : > { %2118 = vmatmul.mubr.msk.bf16.gmra.mrb[8].mxu0 %vm269_vm3, %v2341_v10  ;;  %v2387_v56 = vld [vmem:[%s2446_s19 + $0x128] ss:$0 sps:$4 sm:$0x33]   ;;  %v2388_v57 = vld [vmem:[%s2446_s19 + $0x18c] ss:$0 sps:$4 sm:$0x33]  }
  0x23   : > { %2172 = vmatmul.mubr.msk.bf16.gmra.mrb[8].mxu1 %vm269_vm3, %v2342_v11  ;;  %2121 = vmatprep.mubr.msk.bf16.mxu0 %vm2401_vm2, %v2399_v0 }
  0x24   : > { %2175 = vmatprep.mubr.msk.bf16.mxu1 %vm2401_vm2, %v2399_v0 }
  0x2a   : > { %2122 = vmatmul.mubr.msk.bf16.gmra.mrb[12].mxu0 %vm269_vm3, %v2343_v12 }
  0x2b   : > { %2176 = vmatmul.mubr.msk.bf16.gmra.mrb[12].mxu1 %vm269_vm3, %v2344_v13  ;;  %2125 = vmatprep.mubr.msk.bf16.mxu0 %vm2401_vm2, %v2399_v0 }
  0x2c   : > { %2179 = vmatprep.mubr.msk.bf16.mxu1 %vm2401_vm2, %v2399_v0 }
  0x32   : > { %2126 = vmatmul.mubr.msk.bf16.gmra.mrb[16].mxu0 %vm269_vm3, %v2345_v14 }
  0x33   : > { %2180 = vmatmul.mubr.msk.bf16.gmra.mrb[16].mxu1 %vm269_vm3, %v2346_v15  ;;  %2129 = vmatprep.mubr.msk.bf16.mxu0 %vm2401_vm2, %v2399_v0 }
  0x34   : > { %2183 = vmatprep.mubr.msk.bf16.mxu1 %vm2401_vm2, %v2399_v0 }
  0x3a   : > { %2130 = vmatmul.mubr.msk.bf16.gmra.mrb[20].mxu0 %vm269_vm3, %v2347_v16 }
  0x3b   : > { %2184 = vmatmul.mubr.msk.bf16.gmra.mrb[20].mxu1 %vm269_vm3, %v2348_v17  ;;  %2133 = vmatprep.mubr.msk.bf16.mxu0 %vm2401_vm2, %v2399_v0 }
  0x3c   : > { %2187 = vmatprep.mubr.msk.bf16.mxu1 %vm2401_vm2, %v2399_v0 }
  0x42   : > { %2134 = vmatmul.mubr.msk.bf16.gmra.mrb[24].mxu0 %vm269_vm3, %v2349_v18 }
  0x43   : > { %2188 = vmatmul.mubr.msk.bf16.gmra.mrb[24].mxu1 %vm269_vm3, %v2350_v19  ;;  %2137 = vmatprep.mubr.msk.bf16.mxu0 %vm2401_vm2, %v2399_v0 }
  0x44   : > { %2191 = vmatprep.mubr.msk.bf16.mxu1 %vm2401_vm2, %v2399_v0 }
  0x4a   : > { %2138 = vmatmul.mubr.msk.bf16.gmra.mrb[28].mxu0 %vm269_vm3, %v2351_v20 }
  0x4b   : > { %2192 = vmatmul.mubr.msk.bf16.gmra.mrb[28].mxu1 %vm269_vm3, %v2352_v21  ;;  %2141 = vmatprep.mubr.msk.bf16.mxu0 %vm2401_vm2, %v2399_v0 }
  0x4c   : > { %2195 = vmatprep.mubr.msk.bf16.mxu1 %vm2401_vm2, %v2399_v0 }
  0x52   : > { %2142 = vmatmul.mubr.msk.bf16.gmra.mrb[32].mxu0 %vm269_vm3, %v2353_v22 }
  0x53   : > { %2196 = vmatmul.mubr.msk.bf16.gmra.mrb[32].mxu1 %vm269_vm3, %v2354_v23  ;;  %2145 = vmatprep.mubr.msk.bf16.mxu0 %vm2401_vm2, %v2399_v0 }
  0x54   : > { %2199 = vmatprep.mubr.msk.bf16.mxu1 %vm2401_vm2, %v2399_v0 }
  0x5a   : > { %2146 = vmatmul.mubr.msk.bf16.gmra.mrb[36].mxu0 %vm269_vm3, %v2355_v24 }
  0x5b   : > { %2200 = vmatmul.mubr.msk.bf16.gmra.mrb[36].mxu1 %vm269_vm3, %v2356_v25  ;;  %2149 = vmatprep.mubr.msk.bf16.mxu0 %vm2401_vm2, %v2399_v0 }
  0x5c   : > { %2203 = vmatprep.mubr.msk.bf16.mxu1 %vm2401_vm2, %v2399_v0 }
  0x62   : > { %2150 = vmatmul.mubr.msk.bf16.gmra.mrb[40].mxu0 %vm269_vm3, %v2357_v26 }
  0x63   : > { %2204 = vmatmul.mubr.msk.bf16.gmra.mrb[40].mxu1 %vm269_vm3, %v2358_v27  ;;  %2153 = vmatprep.mubr.msk.bf16.mxu0 %vm2401_vm2, %v2399_v0 }
  0x64   : > { %2207 = vmatprep.mubr.msk.bf16.mxu1 %vm2401_vm2, %v2399_v0 }
  0x6a   : > { %2154 = vmatmul.mubr.msk.bf16.gmra.mrb[44].mxu0 %vm269_vm3, %v2359_v28 }
  0x6b   : > { %2208 = vmatmul.mubr.msk.bf16.gmra.mrb[44].mxu1 %vm269_vm3, %v2360_v29  ;;  %2157 = vmatprep.mubr.msk.bf16.mxu0 %vm2401_vm2, %v2399_v0 }
  0x6c   : > { %2211 = vmatprep.mubr.msk.bf16.mxu1 %vm2401_vm2, %v2399_v0 }
  0x72   : > { %2158 = vmatmul.mubr.msk.bf16.gmra.mrb[48].mxu0 %vm269_vm3, %v2361_v30 }
  0x73   : > { %2212 = vmatmul.mubr.msk.bf16.gmra.mrb[48].mxu1 %vm269_vm3, %v2362_v31  ;;  %2217 = vmatprep.mubr.msk.bf16.mxu0 %vm2401_vm2, %v2399_v0 }
  0x74   : > { %2271 = vmatprep.mubr.msk.bf16.mxu1 %vm2401_vm2, %v2399_v0 }
  0x7a   : > { %2218 = vmatmul.mubr.msk.bf16.vlgmr.msra.gmra.mrb[52].mxu0 %vm269_vm3, %v2363_v32 }
  0x7b   : > { %2272 = vmatmul.mubr.msk.bf16.vlgmr.msra.gmra.mrb[52].mxu1 %vm269_vm3, %v2364_v33  ;;  %2221 = vmatprep.mubr.msk.bf16.mxu0 %vm2401_vm2, %v2399_v0 }
  0x7c   : > { %2275 = vmatprep.mubr.msk.bf16.mxu1 %vm2401_vm2, %v2399_v0 }
  0x82   : > { %2222 = vmatmul.mubr.msk.bf16.gmra.mrb[56].mxu0 %vm269_vm3, %v2365_v34 }
  0x83   : > { %2276 = vmatmul.mubr.msk.bf16.gmra.mrb[56].mxu1 %vm269_vm3, %v2366_v35  ;;  %2225 = vmatprep.mubr.msk.bf16.mxu0 %vm2401_vm2, %v2399_v0 }
  0x84   : > { %2279 = vmatprep.mubr.msk.bf16.mxu1 %vm2401_vm2, %v2399_v0 }
  0x8a   : > { %2226 = vmatmul.mubr.msk.bf16.gmra.mrb[60].mxu0 %vm269_vm3, %v2367_v36 }
  0x8b   : > { %2280 = vmatmul.mubr.msk.bf16.gmra.mrb[60].mxu1 %vm269_vm3, %v2368_v37  ;;  %2229 = vmatprep.mubr.msk.bf16.mxu0 %vm2401_vm2, %v2399_v0 }
  0x8c   : > { %2283 = vmatprep.mubr.msk.bf16.mxu1 %vm2401_vm2, %v2399_v0 }
  0x92   : > { %2230 = vmatmul.mubr.msk.bf16.gmra.mrb[64].mxu0 %vm269_vm3, %v2369_v38 }
  0x93   : > { %2284 = vmatmul.mubr.msk.bf16.gmra.mrb[64].mxu1 %vm269_vm3, %v2370_v39  ;;  %2233 = vmatprep.mubr.msk.bf16.mxu0 %vm2401_vm2, %v2399_v0 }
  0x94   : > { %2287 = vmatprep.mubr.msk.bf16.mxu1 %vm2401_vm2, %v2399_v0 }
  0x9a   : > { %2234 = vmatmul.mubr.msk.bf16.gmra.mrb[68].mxu0 %vm269_vm3, %v2371_v40 }
  0x9b   : > { %2288 = vmatmul.mubr.msk.bf16.gmra.mrb[68].mxu1 %vm269_vm3, %v2372_v41  ;;  %2237 = vmatprep.mubr.msk.bf16.mxu0 %vm2401_vm2, %v2399_v0 }
  0x9c   : > { %2291 = vmatprep.mubr.msk.bf16.mxu1 %vm2401_vm2, %v2399_v0 }
  0xa2   : > { %2238 = vmatmul.mubr.msk.bf16.gmra.mrb[72].mxu0 %vm269_vm3, %v2373_v42 }
  0xa3   : > { %2292 = vmatmul.mubr.msk.bf16.gmra.mrb[72].mxu1 %vm269_vm3, %v2374_v43  ;;  %2241 = vmatprep.mubr.msk.bf16.mxu0 %vm2401_vm2, %v2399_v0 }
  0xa4   : > { %2295 = vmatprep.mubr.msk.bf16.mxu1 %vm2401_vm2, %v2399_v0 }
  0xaa   : > { %2242 = vmatmul.mubr.msk.bf16.gmra.mrb[76].mxu0 %vm269_vm3, %v2375_v44 }
  0xab   : > { %2296 = vmatmul.mubr.msk.bf16.gmra.mrb[76].mxu1 %vm269_vm3, %v2376_v45  ;;  %2245 = vmatprep.mubr.msk.bf16.mxu0 %vm2401_vm2, %v2399_v0 }
  0xac   : > { %2299 = vmatprep.mubr.msk.bf16.mxu1 %vm2401_vm2, %v2399_v0 }
  0xb2   : > { %2246 = vmatmul.mubr.msk.bf16.gmra.mrb[80].mxu0 %vm269_vm3, %v2377_v46 }
  0xb3   : > { %2300 = vmatmul.mubr.msk.bf16.gmra.mrb[80].mxu1 %vm269_vm3, %v2378_v47  ;;  %2249 = vmatprep.mubr.msk.bf16.mxu0 %vm2401_vm2, %v2399_v0 }
  0xb4   : > { %2303 = vmatprep.mubr.msk.bf16.mxu1 %vm2401_vm2, %v2399_v0 }
  0xba   : > { %2250 = vmatmul.mubr.msk.bf16.gmra.mrb[84].mxu0 %vm269_vm3, %v2379_v48 }
  0xbb   : > { %2304 = vmatmul.mubr.msk.bf16.gmra.mrb[84].mxu1 %vm269_vm3, %v2380_v49  ;;  %2253 = vmatprep.mubr.msk.bf16.mxu0 %vm2401_vm2, %v2399_v0 }
  0xbc   : > { %2307 = vmatprep.mubr.msk.bf16.mxu1 %vm2401_vm2, %v2399_v0 }
  0xc2   : > { %2254 = vmatmul.mubr.msk.bf16.gmra.mrb[88].mxu0 %vm269_vm3, %v2381_v50 }
  0xc3   : > { %2308 = vmatmul.mubr.msk.bf16.gmra.mrb[88].mxu1 %vm269_vm3, %v2382_v51  ;;  %2257 = vmatprep.mubr.msk.bf16.mxu0 %vm2401_vm2, %v2399_v0 }
  0xc4   : > { %2311 = vmatprep.mubr.msk.bf16.mxu1 %vm2401_vm2, %v2399_v0 }
  0xca   : > { %2258 = vmatmul.mubr.msk.bf16.gmra.mrb[92].mxu0 %vm269_vm3, %v2383_v52 }
  0xcb   : > { %2312 = vmatmul.mubr.msk.bf16.gmra.mrb[92].mxu1 %vm269_vm3, %v2384_v53  ;;  %2261 = vmatprep.mubr.msk.bf16.mxu0 %vm2401_vm2, %v2399_v0 }
  0xcc   : > { %2315 = vmatprep.mubr.msk.bf16.mxu1 %vm2401_vm2, %v2399_v0 }
  0xd2   : > { %2262 = vmatmul.mubr.msk.bf16.gmra.mrb[96].mxu0 %vm269_vm3, %v2385_v54 }
  0xd3   : > { %2316 = vmatmul.mubr.msk.bf16.gmra.mrb[96].mxu1 %vm269_vm3, %v2386_v55  ;;  %2265 = vmatprep.mubr.msk.bf16.mxu0 %vm2401_vm2, %v2399_v0 }
  0xd4   : > { %2319 = vmatprep.mubr.msk.bf16.mxu1 %vm2401_vm2, %v2399_v0 }
  0xda   : > { %2266 = vmatmul.mubr.msk.bf16.gmra.mrb[100].mxu0 %vm269_vm3, %v2387_v56 }
  0xdb   : > { %2320 = vmatmul.mubr.msk.bf16.gmra.mrb[100].mxu1 %vm269_vm3, %v2388_v57 }
  0xe5   : > { %v350_v60 = vpop.f32.mrb[0].mxu0 }
  0xe6   : > { %v456_v61 = vmul.f32 %v2656_v58, %v350_v60  ;;  %v697_v62 = vpop.f32.mrb[0].mxu1  ;;  %v2111_v63 = vpop.f32.mrb[1].mxu0 }
  0xe7   : > { %v799_v0 = vmul.f32 %v2656_v58, %v697_v62  ;;  %v2165_v1 = vpop.f32.mrb[1].mxu1  ;;  %v353_v2 = vpop.f32.mrb[2].mxu0 }
  0xe8   : > { %v485_v3 = vadd.f32 %v2661_v59, %v456_v61  ;;  %v457_v4 = vmul.f32 %v2656_v58, %v353_v2  ;;  %v700_v5 = vpop.f32.mrb[2].mxu1  ;;  %v2112_v6 = vpop.f32.mrb[3].mxu0 }
  0xe9   : > { %v824_v7 = vadd.f32 %v2661_v59, %v799_v0  ;;  %v800_v8 = vmul.f32 %v2656_v58, %v700_v5  ;;  %v2166_v9 = vpop.f32.mrb[3].mxu1 }
  0xea   : > { %v510_v10 = vmax.f32 %v485_v3, 0.0  ;;  %v486_v11 = vadd.f32 %v2661_v59, %v457_v4 }
  0xeb   : > { %v849_v12 = vmax.f32 %v824_v7, 0.0  ;;  %v825_v13 = vadd.f32 %v2661_v59, %v800_v8 }
  0xec   : > { %v511_v14 = vmax.f32 %v486_v11, 0.0 }
  0xed   : > { %v2671_v15 = vmax.f32 %v510_v10, %v849_v12  ;;  %v850_v16 = vmax.f32 %v825_v13, 0.0  ;;  %v358_v17 = vpop.f32.mrb[4].mxu0 }
  0xee   : > { %v458_v18 = vmul.f32 %v2656_v58, %v358_v17  ;;  %v705_v19 = vpop.f32.mrb[4].mxu1  ;;  %v2115_v20 = vpop.f32.mrb[5].mxu0 }
  0xef   : > { %v2674_v21 = vmax.f32 %v511_v14, %v850_v16  ;;  %v801_v22 = vmul.f32 %v2656_v58, %v705_v19  ;;  %v2169_v23 = vpop.f32.mrb[5].mxu1  ;;  %v361_v24 = vpop.f32.mrb[6].mxu0 }
  0xf0   : > { %v487_v25 = vadd.f32 %v2661_v59, %v458_v18  ;;  %v459_v26 = vmul.f32 %v2656_v58, %v361_v24  ;;  %v708_v27 = vpop.f32.mrb[6].mxu1  ;;  %v2116_v28 = vpop.f32.mrb[7].mxu0 }
  0xf1   : > { %v826_v29 = vadd.f32 %v2661_v59, %v801_v22  ;;  %v802_v30 = vmul.f32 %v2656_v58, %v708_v27  ;;  %v2170_v31 = vpop.f32.mrb[7].mxu1 }
  0xf2   : > { %v512_v32 = vmax.f32 %v487_v25, 0.0  ;;  %v488_v33 = vadd.f32 %v2661_v59, %v459_v26 }
  0xf3   : > { %v851_v34 = vmax.f32 %v826_v29, 0.0  ;;  %v827_v35 = vadd.f32 %v2661_v59, %v802_v30 }
  0xf4   : > { %v513_v36 = vmax.f32 %v488_v33, 0.0 }
  0xf5   : > { %v2683_v37 = vmax.f32 %v512_v32, %v851_v34  ;;  %v852_v38 = vmax.f32 %v827_v35, 0.0  ;;  %v366_v39 = vpop.f32.mrb[8].mxu0 }
  0xf6   : > { %v460_v40 = vmul.f32 %v2656_v58, %v366_v39  ;;  %v713_v41 = vpop.f32.mrb[8].mxu1  ;;  %v2119_v42 = vpop.f32.mrb[9].mxu0 }
  0xf7   : > { %v2686_v43 = vmax.f32 %v513_v36, %v852_v38  ;;  %v803_v44 = vmul.f32 %v2656_v58, %v713_v41  ;;  %v2173_v45 = vpop.f32.mrb[9].mxu1  ;;  %v369_v46 = vpop.f32.mrb[10].mxu0 }
  0xf8   : > { %v489_v47 = vadd.f32 %v2661_v59, %v460_v40  ;;  %v461_v48 = vmul.f32 %v2656_v58, %v369_v46  ;;  %v716_v49 = vpop.f32.mrb[10].mxu1  ;;  %v2120_v50 = vpop.f32.mrb[11].mxu0 }
  0xf9   : > { %v828_v51 = vadd.f32 %v2661_v59, %v803_v44  ;;  %v804_v52 = vmul.f32 %v2656_v58, %v716_v49  ;;  %v2174_v53 = vpop.f32.mrb[11].mxu1 }
  0xfa   : > { %v514_v54 = vmax.f32 %v489_v47, 0.0  ;;  %v490_v55 = vadd.f32 %v2661_v59, %v461_v48 }
  0xfb   : > { %v853_v56 = vmax.f32 %v828_v51, 0.0  ;;  %v829_v57 = vadd.f32 %v2661_v59, %v804_v52 }
  0xfc   : > { %v515_v60 = vmax.f32 %v490_v55, 0.0 }
  0xfd   : > { %v2695_v61 = vmax.f32 %v514_v54, %v853_v56  ;;  %v854_v62 = vmax.f32 %v829_v57, 0.0  ;;  %v374_v63 = vpop.f32.mrb[12].mxu0 }
  0xfe   : > { %v462_v0 = vmul.f32 %v2656_v58, %v374_v63  ;;  %v721_v1 = vpop.f32.mrb[12].mxu1  ;;  %v2123_v2 = vpop.f32.mrb[13].mxu0 }
  0xff   : > { %v2698_v3 = vmax.f32 %v515_v60, %v854_v62  ;;  %v805_v4 = vmul.f32 %v2656_v58, %v721_v1  ;;  %v2177_v5 = vpop.f32.mrb[13].mxu1  ;;  %v377_v6 = vpop.f32.mrb[14].mxu0 }
 0x100   : > { %v491_v7 = vadd.f32 %v2661_v59, %v462_v0  ;;  %v463_v8 = vmul.f32 %v2656_v58, %v377_v6  ;;  %v724_v9 = vpop.f32.mrb[14].mxu1  ;;  %v2124_v10 = vpop.f32.mrb[15].mxu0 }
 0x101   : > { %v830_v11 = vadd.f32 %v2661_v59, %v805_v4  ;;  %v806_v12 = vmul.f32 %v2656_v58, %v724_v9  ;;  %v2178_v13 = vpop.f32.mrb[15].mxu1 }
 0x102   : > { %v516_v14 = vmax.f32 %v491_v7, 0.0  ;;  %v492_v16 = vadd.f32 %v2661_v59, %v463_v8 }
 0x103   : > { %v855_v17 = vmax.f32 %v830_v11, 0.0  ;;  %v831_v18 = vadd.f32 %v2661_v59, %v806_v12 }
 0x104   : > { %v517_v19 = vmax.f32 %v492_v16, 0.0 }
 0x105   : > { %v2707_v20 = vmax.f32 %v516_v14, %v855_v17  ;;  %v856_v22 = vmax.f32 %v831_v18, 0.0  ;;  %v382_v23 = vpop.f32.mrb[16].mxu0 }
 0x106   : > { %v464_v24 = vmul.f32 %v2656_v58, %v382_v23  ;;  %v729_v25 = vpop.f32.mrb[16].mxu1  ;;  %v2127_v26 = vpop.f32.mrb[17].mxu0 }
 0x107   : > { %v2710_v27 = vmax.f32 %v517_v19, %v856_v22  ;;  %v807_v28 = vmul.f32 %v2656_v58, %v729_v25  ;;  %v2181_v29 = vpop.f32.mrb[17].mxu1  ;;  %v385_v30 = vpop.f32.mrb[18].mxu0 }
 0x108   : > { %v493_v31 = vadd.f32 %v2661_v59, %v464_v24  ;;  %v465_v32 = vmul.f32 %v2656_v58, %v385_v30  ;;  %v732_v33 = vpop.f32.mrb[18].mxu1  ;;  %v2128_v34 = vpop.f32.mrb[19].mxu0 }
 0x109   : > { %v832_v35 = vadd.f32 %v2661_v59, %v807_v28  ;;  %v808_v36 = vmul.f32 %v2656_v58, %v732_v33  ;;  %v2182_v38 = vpop.f32.mrb[19].mxu1 }
 0x10a   : > { %v518_v39 = vmax.f32 %v493_v31, 0.0  ;;  %v494_v40 = vadd.f32 %v2661_v59, %v465_v32 }
 0x10b   : > { %v857_v41 = vmax.f32 %v832_v35, 0.0  ;;  %v833_v42 = vadd.f32 %v2661_v59, %v808_v36 }
 0x10c   : > { %v519_v44 = vmax.f32 %v494_v40, 0.0 }
 0x10d   : > { %v2719_v45 = vmax.f32 %v518_v39, %v857_v41  ;;  %v858_v46 = vmax.f32 %v833_v42, 0.0  ;;  %v390_v47 = vpop.f32.mrb[20].mxu0 }
 0x10e   : > { %v466_v48 = vmul.f32 %v2656_v58, %v390_v47  ;;  %v737_v49 = vpop.f32.mrb[20].mxu1  ;;  %v2131_v50 = vpop.f32.mrb[21].mxu0 }
 0x10f   : > { %v2722_v51 = vmax.f32 %v519_v44, %v858_v46  ;;  %v809_v52 = vmul.f32 %v2656_v58, %v737_v49  ;;  %v2185_v53 = vpop.f32.mrb[21].mxu1  ;;  %v393_v54 = vpop.f32.mrb[22].mxu0 }
 0x110   : > { %v495_v55 = vadd.f32 %v2661_v59, %v466_v48  ;;  %v467_v56 = vmul.f32 %v2656_v58, %v393_v54  ;;  %v740_v57 = vpop.f32.mrb[22].mxu1  ;;  %v2132_v60 = vpop.f32.mrb[23].mxu0 }
 0x111   : > { %v834_v62 = vadd.f32 %v2661_v59, %v809_v52  ;;  %v810_v63 = vmul.f32 %v2656_v58, %v740_v57  ;;  %v2186_v0 = vpop.f32.mrb[23].mxu1 }
 0x112   : > { %v520_v1 = vmax.f32 %v495_v55, 0.0  ;;  %v496_v2 = vadd.f32 %v2661_v59, %v467_v56 }
 0x113   : > { %v859_v4 = vmax.f32 %v834_v62, 0.0  ;;  %v835_v5 = vadd.f32 %v2661_v59, %v810_v63 }
 0x114   : > { %v521_v6 = vmax.f32 %v496_v2, 0.0 }
 0x115   : > { %v2731_v7 = vmax.f32 %v520_v1, %v859_v4  ;;  %v860_v8 = vmax.f32 %v835_v5, 0.0  ;;  %v398_v9 = vpop.f32.mrb[24].mxu0 }
 0x116   : > { %v468_v10 = vmul.f32 %v2656_v58, %v398_v9  ;;  %v745_v11 = vpop.f32.mrb[24].mxu1  ;;  %v2135_v12 = vpop.f32.mrb[25].mxu0 }
 0x117   : > { %v2734_v13 = vmax.f32 %v521_v6, %v860_v8  ;;  %v811_v14 = vmul.f32 %v2656_v58, %v745_v11  ;;  %v2189_v16 = vpop.f32.mrb[25].mxu1  ;;  %v401_v17 = vpop.f32.mrb[26].mxu0 }
 0x118   : > { %v497_v18 = vadd.f32 %v2661_v59, %v468_v10  ;;  %v469_v19 = vmul.f32 %v2656_v58, %v401_v17  ;;  %v748_v22 = vpop.f32.mrb[26].mxu1  ;;  %v2136_v23 = vpop.f32.mrb[27].mxu0 }
 0x119   : > { %v836_v24 = vadd.f32 %v2661_v59, %v811_v14  ;;  %v812_v25 = vmul.f32 %v2656_v58, %v748_v22  ;;  %v2190_v26 = vpop.f32.mrb[27].mxu1 }
 0x11a   : > { %v522_v28 = vmax.f32 %v497_v18, 0.0  ;;  %v498_v29 = vadd.f32 %v2661_v59, %v469_v19 }
 0x11b   : > { %v861_v30 = vmax.f32 %v836_v24, 0.0  ;;  %v837_v31 = vadd.f32 %v2661_v59, %v812_v25 }
 0x11c   : > { %v523_v32 = vmax.f32 %v498_v29, 0.0 }
 0x11d   : > { %v2743_v33 = vmax.f32 %v522_v28, %v861_v30  ;;  %v862_v34 = vmax.f32 %v837_v31, 0.0  ;;  %v406_v35 = vpop.f32.mrb[28].mxu0 }
 0x11e   : > { %v470_v36 = vmul.f32 %v2656_v58, %v406_v35  ;;  %v753_v38 = vpop.f32.mrb[28].mxu1  ;;  %v2139_v39 = vpop.f32.mrb[29].mxu0 }
 0x11f   : > { %v2746_v40 = vmax.f32 %v523_v32, %v862_v34  ;;  %v813_v41 = vmul.f32 %v2656_v58, %v753_v38  ;;  %v2193_v42 = vpop.f32.mrb[29].mxu1  ;;  %v409_v44 = vpop.f32.mrb[30].mxu0 }
 0x120   : > { %v499_v46 = vadd.f32 %v2661_v59, %v470_v36  ;;  %v471_v47 = vmul.f32 %v2656_v58, %v409_v44  ;;  %v756_v48 = vpop.f32.mrb[30].mxu1  ;;  %v2140_v49 = vpop.f32.mrb[31].mxu0 }
 0x121   : > { %v838_v50 = vadd.f32 %v2661_v59, %v813_v41  ;;  %v814_v52 = vmul.f32 %v2656_v58, %v756_v48  ;;  %v2194_v53 = vpop.f32.mrb[31].mxu1 }
 0x122   : > { %v524_v54 = vmax.f32 %v499_v46, 0.0  ;;  %v500_v55 = vadd.f32 %v2661_v59, %v471_v47 }
 0x123   : > { %v863_v56 = vmax.f32 %v838_v50, 0.0  ;;  %v839_v57 = vadd.f32 %v2661_v59, %v814_v52 }
 0x124   : > { %v525_v60 = vmax.f32 %v500_v55, 0.0 }
 0x125   : > { %v2755_v62 = vmax.f32 %v524_v54, %v863_v56  ;;  %v864_v63 = vmax.f32 %v839_v57, 0.0  ;;  %v414_v0 = vpop.f32.mrb[32].mxu0 }
 0x126   : > { %v472_v1 = vmul.f32 %v2656_v58, %v414_v0  ;;  %v761_v2 = vpop.f32.mrb[32].mxu1  ;;  %v2143_v4 = vpop.f32.mrb[33].mxu0 }
 0x127   : > { %v2758_v5 = vmax.f32 %v525_v60, %v864_v63  ;;  %v815_v6 = vmul.f32 %v2656_v58, %v761_v2  ;;  %v2197_v8 = vpop.f32.mrb[33].mxu1  ;;  %v417_v9 = vpop.f32.mrb[34].mxu0 }
 0x128   : > { %v501_v10 = vadd.f32 %v2661_v59, %v472_v1  ;;  %v473_v11 = vmul.f32 %v2656_v58, %v417_v9  ;;  %v764_v12 = vpop.f32.mrb[34].mxu1  ;;  %v2144_v14 = vpop.f32.mrb[35].mxu0 }
 0x129   : > { %v840_v16 = vadd.f32 %v2661_v59, %v815_v6  ;;  %v816_v17 = vmul.f32 %v2656_v58, %v764_v12  ;;  %v2198_v18 = vpop.f32.mrb[35].mxu1 }
 0x12a   : > { %v526_v19 = vmax.f32 %v501_v10, 0.0  ;;  %v502_v22 = vadd.f32 %v2661_v59, %v473_v11 }
 0x12b   : > { %v865_v23 = vmax.f32 %v840_v16, 0.0  ;;  %v841_v24 = vadd.f32 %v2661_v59, %v816_v17 }
 0x12c   : > { %v527_v25 = vmax.f32 %v502_v22, 0.0 }
 0x12d   : > { %v2767_v26 = vmax.f32 %v526_v19, %v865_v23  ;;  %v866_v28 = vmax.f32 %v841_v24, 0.0  ;;  %v422_v29 = vpop.f32.mrb[36].mxu0 }
 0x12e   : > { %v474_v30 = vmul.f32 %v2656_v58, %v422_v29  ;;  %v769_v31 = vpop.f32.mrb[36].mxu1  ;;  %v2147_v32 = vpop.f32.mrb[37].mxu0 }
 0x12f   : > { %v2770_v34 = vmax.f32 %v527_v25, %v866_v28  ;;  %v817_v35 = vmul.f32 %v2656_v58, %v769_v31  ;;  %v2201_v36 = vpop.f32.mrb[37].mxu1  ;;  %v425_v38 = vpop.f32.mrb[38].mxu0 }
 0x130   : > { %v503_v39 = vadd.f32 %v2661_v59, %v474_v30  ;;  %v475_v41 = vmul.f32 %v2656_v58, %v425_v38  ;;  %v772_v42 = vpop.f32.mrb[38].mxu1  ;;  %v2148_v44 = vpop.f32.mrb[39].mxu0 }
 0x131   : > { %v842_v46 = vadd.f32 %v2661_v59, %v817_v35  ;;  %v818_v47 = vmul.f32 %v2656_v58, %v772_v42  ;;  %v2202_v48 = vpop.f32.mrb[39].mxu1 }
 0x132   : > { %v528_v49 = vmax.f32 %v503_v39, 0.0  ;;  %v504_v50 = vadd.f32 %v2661_v59, %v475_v41 }
 0x133   : > { %v867_v52 = vmax.f32 %v842_v46, 0.0  ;;  %v843_v53 = vadd.f32 %v2661_v59, %v818_v47 }
 0x134   : > { %v529_v54 = vmax.f32 %v504_v50, 0.0 }
 0x135   : > { %v2779_v55 = vmax.f32 %v528_v49, %v867_v52  ;;  %v868_v56 = vmax.f32 %v843_v53, 0.0  ;;  %v430_v57 = vpop.f32.mrb[40].mxu0 }
 0x136   : > { %v476_v60 = vmul.f32 %v2656_v58, %v430_v57  ;;  %v777_v63 = vpop.f32.mrb[40].mxu1  ;;  %v2151_v0 = vpop.f32.mrb[41].mxu0 }
 0x137   : > { %v2782_v1 = vmax.f32 %v529_v54, %v868_v56  ;;  %v819_v2 = vmul.f32 %v2656_v58, %v777_v63  ;;  %v2205_v4 = vpop.f32.mrb[41].mxu1  ;;  %v433_v6 = vpop.f32.mrb[42].mxu0 }
 0x138   : > { %v505_v8 = vadd.f32 %v2661_v59, %v476_v60  ;;  %v477_v9 = vmul.f32 %v2656_v58, %v433_v6  ;;  %v780_v10 = vpop.f32.mrb[42].mxu1  ;;  %v2152_v11 = vpop.f32.mrb[43].mxu0 }
 0x139   : > { %v844_v12 = vadd.f32 %v2661_v59, %v819_v2  ;;  %v820_v14 = vmul.f32 %v2656_v58, %v780_v10  ;;  %v2206_v16 = vpop.f32.mrb[43].mxu1 }
 0x13a   : > { %v530_v17 = vmax.f32 %v505_v8, 0.0  ;;  %v506_v18 = vadd.f32 %v2661_v59, %v477_v9 }
 0x13b   : > { %v869_v19 = vmax.f32 %v844_v12, 0.0  ;;  %v845_v22 = vadd.f32 %v2661_v59, %v820_v14 }
 0x13c   : > { %v531_v23 = vmax.f32 %v506_v18, 0.0 }
 0x13d   : > { %v2791_v24 = vmax.f32 %v530_v17, %v869_v19  ;;  %v870_v25 = vmax.f32 %v845_v22, 0.0  ;;  %v438_v28 = vpop.f32.mrb[44].mxu0 }
 0x13e   : > { %v478_v29 = vmul.f32 %v2656_v58, %v438_v28  ;;  %v785_v30 = vpop.f32.mrb[44].mxu1  ;;  %v2155_v31 = vpop.f32.mrb[45].mxu0 }
 0x13f   : > { %v2794_v32 = vmax.f32 %v531_v23, %v870_v25  ;;  %v821_v35 = vmul.f32 %v2656_v58, %v785_v30  ;;  %v2209_v36 = vpop.f32.mrb[45].mxu1  ;;  %v441_v38 = vpop.f32.mrb[46].mxu0 }
 0x140   : > { %v507_v39 = vadd.f32 %v2661_v59, %v478_v29  ;;  %v479_v41 = vmul.f32 %v2656_v58, %v441_v38  ;;  %v788_v42 = vpop.f32.mrb[46].mxu1  ;;  %v2156_v44 = vpop.f32.mrb[47].mxu0 }
 0x141   : > { %v846_v46 = vadd.f32 %v2661_v59, %v821_v35  ;;  %v822_v47 = vmul.f32 %v2656_v58, %v788_v42  ;;  %v2210_v48 = vpop.f32.mrb[47].mxu1 }
 0x142   : > { %v532_v49 = vmax.f32 %v507_v39, 0.0  ;;  %v508_v50 = vadd.f32 %v2661_v59, %v479_v41 }
 0x143   : > { %v871_v52 = vmax.f32 %v846_v46, 0.0  ;;  %v847_v53 = vadd.f32 %v2661_v59, %v822_v47 }
 0x144   : > { %v533_v54 = vmax.f32 %v508_v50, 0.0 }
 0x145   : > { %v2803_v56 = vmax.f32 %v532_v49, %v871_v52  ;;  %v872_v57 = vmax.f32 %v847_v53, 0.0  ;;  %v446_v60 = vpop.f32.mrb[48].mxu0 }
 0x146   : > { %v480_v63 = vmul.f32 %v2656_v58, %v446_v60  ;;  %v793_v0 = vpop.f32.mrb[48].mxu1  ;;  %v2159_v2 = vpop.f32.mrb[49].mxu0 }
 0x147   : > { %v2806_v4 = vmax.f32 %v533_v54, %v872_v57  ;;  %v823_v6 = vmul.f32 %v2656_v58, %v793_v0  ;;  %v2213_v8 = vpop.f32.mrb[49].mxu1  ;;  %v449_v9 = vpop.f32.mrb[50].mxu0 }
 0x148   : > { %v509_v10 = vadd.f32 %v2661_v59, %v480_v63  ;;  %v796_v11 = vpop.f32.mrb[50].mxu1  ;;  %v2160_v12 = vpop.f32.mrb[51].mxu0 }
 0x149   : > { %v848_v14 = vadd.f32 %v2661_v59, %v823_v6  ;;  %v2214_v16 = vpop.f32.mrb[51].mxu1 }
 0x14a   : > { %v534_v17 = vmax.f32 %v509_v10, 0.0 }
 0x14b   : > { %v873_v18 = vmax.f32 %v848_v14, 0.0 }
 0x14d   : > { %v2811_v19 = vmax.f32 %v534_v17, %v873_v18  ;;  %v1061_v22 = vpop.f32.mrb[52].mxu0 }
 0x14e   : > { %v1163_v23 = vmul.f32 %v2656_v58, %v1061_v22  ;;  %v1425_v25 = vpop.f32.mrb[52].mxu1  ;;  %v2219_v28 = vpop.f32.mrb[53].mxu0 }
 0x14f   : > { %v1527_v29 = vmul.f32 %v2656_v58, %v1425_v25  ;;  %v2273_v30 = vpop.f32.mrb[53].mxu1  ;;  %v1064_v31 = vpop.f32.mrb[54].mxu0 }
 0x150   : > { %v1188_v35 = vadd.f32 %v2661_v59, %v1163_v23  ;;  %v1164_v36 = vmul.f32 %v2656_v58, %v1064_v31  ;;  %v1428_v38 = vpop.f32.mrb[54].mxu1  ;;  %v2220_v39 = vpop.f32.mrb[55].mxu0 }
 0x151   : > { %v1552_v41 = vadd.f32 %v2661_v59, %v1527_v29  ;;  %v1528_v42 = vmul.f32 %v2656_v58, %v1428_v38  ;;  %v2274_v44 = vpop.f32.mrb[55].mxu1 }
 0x152   : > { %v1213_v46 = vmax.f32 %v1188_v35, 0.0  ;;  %v1189_v47 = vadd.f32 %v2661_v59, %v1164_v36 }
 0x153   : > { %v1577_v48 = vmax.f32 %v1552_v41, 0.0  ;;  %v1553_v49 = vadd.f32 %v2661_v59, %v1528_v42 }
 0x154   : > { %v1238_v50 = vmax.f32 %v2671_v15, %v1213_v46  ;;  %v1214_v52 = vmax.f32 %v1189_v47, 0.0 }
 0x155   : > { %v1069_v53 = vpop.f32.mrb[56].mxu0  ;;  %v1578_v60 = vmax.f32 %v1553_v49, 0.0 }
 0x156   : > { %v1602_v54 = vmax.f32 %v1238_v50, %v1577_v48  ;;  %v1239_v57 = vmax.f32 %v2674_v21, %v1214_v52  ;;  %v1165_v63 = vmul.f32 %v2656_v58, %v1069_v53  ;;  %v1433_v0 = vpop.f32.mrb[56].mxu1  ;;  %v2223_v2 = vpop.f32.mrb[57].mxu0 }
 0x157   : > { %v1529_v6 = vmul.f32 %v2656_v58, %v1433_v0  ;;  %v2277_v15 = vpop.f32.mrb[57].mxu1  ;;  %v1072_v8 = vpop.f32.mrb[58].mxu0 }
 0x158   : > { %v2026_v9 = vpack.c.bf16 %v1602_v54, %v1602_v54  ;;  %v1603_v10 = vmax.f32 %v1239_v57, %v1578_v60  ;;  %v1190_v21 = vadd.f32 %v2661_v59, %v1165_v63  ;;  %v1166_v11 = vmul.f32 %v2656_v58, %v1072_v8  ;;  %v1436_v12 = vpop.f32.mrb[58].mxu1  ;;  %v2224_v14 = vpop.f32.mrb[59].mxu0 }
 0x159   : > { %v1554_v16 = vadd.f32 %v2661_v59, %v1529_v6  ;;  %v1530_v17 = vmul.f32 %v2656_v58, %v1436_v12  ;;  %v2278_v18 = vpop.f32.mrb[59].mxu1 }
 0x15a   : > { %1729 = vst.msk [vmem:[%s2828_s27] sm:$0xf] %vm1728_vm4, %v2026_v9  ;;  %v2027_v22 = vpack.c.bf16 %v1603_v10, %v1603_v10  ;;  %v1215_v23 = vmax.f32 %v1190_v21, 0.0  ;;  %v1191_v25 = vadd.f32 %v2661_v59, %v1166_v11 }
 0x15b   : > { %v1579_v28 = vmax.f32 %v1554_v16, 0.0  ;;  %v1555_v29 = vadd.f32 %v2661_v59, %v1530_v17 }
 0x15c   : > { %1730 = vst.msk [vmem:[%s2828_s27 + $0x4] sm:$0xf] %vm1728_vm4, %v2027_v22  ;;  %v1240_v30 = vmax.f32 %v2683_v37, %v1215_v23  ;;  %v1216_v31 = vmax.f32 %v1191_v25, 0.0 }
 0x15d   : > { %v1077_v35 = vpop.f32.mrb[60].mxu0  ;;  %v1580_v39 = vmax.f32 %v1555_v29, 0.0 }
 0x15e   : > { %v1604_v36 = vmax.f32 %v1240_v30, %v1579_v28  ;;  %v1241_v38 = vmax.f32 %v2686_v43, %v1216_v31  ;;  %v1167_v41 = vmul.f32 %v2656_v58, %v1077_v35  ;;  %v1441_v42 = vpop.f32.mrb[60].mxu1  ;;  %v2227_v44 = vpop.f32.mrb[61].mxu0 }
 0x15f   : > { %v1531_v46 = vmul.f32 %v2656_v58, %v1441_v42  ;;  %v2281_v47 = vpop.f32.mrb[61].mxu1  ;;  %v1080_v48 = vpop.f32.mrb[62].mxu0 }
 0x160   : > { %v2028_v49 = vpack.c.bf16 %v1604_v36, %v1604_v36  ;;  %v1605_v50 = vmax.f32 %v1241_v38, %v1580_v39  ;;  %v1192_v37 = vadd.f32 %v2661_v59, %v1167_v41  ;;  %v1168_v52 = vmul.f32 %v2656_v58, %v1080_v48  ;;  %v1444_v53 = vpop.f32.mrb[62].mxu1  ;;  %v2228_v54 = vpop.f32.mrb[63].mxu0 }
 0x161   : > { %v1556_v43 = vadd.f32 %v2661_v59, %v1531_v46  ;;  %v1532_v57 = vmul.f32 %v2656_v58, %v1444_v53  ;;  %v2282_v60 = vpop.f32.mrb[63].mxu1 }
 0x162   : > { %1731 = vst.msk [vmem:[%s2828_s27 + $0x8] sm:$0xf] %vm1728_vm4, %v2028_v49  ;;  %v2029_v63 = vpack.c.bf16 %v1605_v50, %v1605_v50  ;;  %v1217_v0 = vmax.f32 %v1192_v37, 0.0  ;;  %v1193_v2 = vadd.f32 %v2661_v59, %v1168_v52 }
 0x163   : > { %v1581_v6 = vmax.f32 %v1556_v43, 0.0  ;;  %v1557_v15 = vadd.f32 %v2661_v59, %v1532_v57 }
 0x164   : > { %1732 = vst.msk [vmem:[%s2828_s27 + $0xc] sm:$0xf] %vm1728_vm4, %v2029_v63  ;;  %v1242_v8 = vmax.f32 %v2695_v61, %v1217_v0  ;;  %v1218_v9 = vmax.f32 %v1193_v2, 0.0 }
 0x165   : > { %v1085_v10 = vpop.f32.mrb[64].mxu0  ;;  %v1582_v12 = vmax.f32 %v1557_v15, 0.0 }
 0x166   : > { %v1606_v21 = vmax.f32 %v1242_v8, %v1581_v6  ;;  %v1243_v11 = vmax.f32 %v2698_v3, %v1218_v9  ;;  %v1169_v14 = vmul.f32 %v2656_v58, %v1085_v10  ;;  %v1449_v16 = vpop.f32.mrb[64].mxu1  ;;  %v2231_v17 = vpop.f32.mrb[65].mxu0 }
 0x167   : > { %v1533_v18 = vmul.f32 %v2656_v58, %v1449_v16  ;;  %v2285_v22 = vpop.f32.mrb[65].mxu1  ;;  %v1088_v23 = vpop.f32.mrb[66].mxu0 }
 0x168   : > { %v2030_v25 = vpack.c.bf16 %v1606_v21, %v1606_v21  ;;  %v1607_v28 = vmax.f32 %v1243_v11, %v1582_v12  ;;  %v1194_v61 = vadd.f32 %v2661_v59, %v1169_v14  ;;  %v1170_v29 = vmul.f32 %v2656_v58, %v1088_v23  ;;  %v1452_v30 = vpop.f32.mrb[66].mxu1  ;;  %v2232_v31 = vpop.f32.mrb[67].mxu0 }
 0x169   : > { %v1558_v3 = vadd.f32 %v2661_v59, %v1533_v18  ;;  %v1534_v35 = vmul.f32 %v2656_v58, %v1452_v30  ;;  %v2286_v36 = vpop.f32.mrb[67].mxu1 }
 0x16a   : > { %1733 = vst.msk [vmem:[%s2828_s27 + $0x10] sm:$0xf] %vm1728_vm4, %v2030_v25  ;;  %v2031_v38 = vpack.c.bf16 %v1607_v28, %v1607_v28  ;;  %v1219_v39 = vmax.f32 %v1194_v61, 0.0  ;;  %v1195_v41 = vadd.f32 %v2661_v59, %v1170_v29 }
 0x16b   : > { %v1583_v42 = vmax.f32 %v1558_v3, 0.0  ;;  %v1559_v44 = vadd.f32 %v2661_v59, %v1534_v35 }
 0x16c   : > { %1734 = vst.msk [vmem:[%s2828_s27 + $0x14] sm:$0xf] %vm1728_vm4, %v2031_v38  ;;  %v1244_v46 = vmax.f32 %v2707_v20, %v1219_v39  ;;  %v1220_v47 = vmax.f32 %v1195_v41, 0.0 }
 0x16d   : > { %v1093_v48 = vpop.f32.mrb[68].mxu0  ;;  %v1584_v37 = vmax.f32 %v1559_v44, 0.0 }
 0x16e   : > { %v1608_v49 = vmax.f32 %v1244_v46, %v1583_v42  ;;  %v1245_v50 = vmax.f32 %v2710_v27, %v1220_v47  ;;  %v1171_v52 = vmul.f32 %v2656_v58, %v1093_v48  ;;  %v1457_v53 = vpop.f32.mrb[68].mxu1  ;;  %v2235_v54 = vpop.f32.mrb[69].mxu0 }
 0x16f   : > { %v1535_v43 = vmul.f32 %v2656_v58, %v1457_v53  ;;  %v2289_v57 = vpop.f32.mrb[69].mxu1  ;;  %v1096_v60 = vpop.f32.mrb[70].mxu0 }
 0x170   : > { %v2032_v63 = vpack.c.bf16 %v1608_v49, %v1608_v49  ;;  %v1609_v0 = vmax.f32 %v1245_v50, %v1584_v37  ;;  %v1196_v20 = vadd.f32 %v2661_v59, %v1171_v52  ;;  %v1172_v2 = vmul.f32 %v2656_v58, %v1096_v60  ;;  %v1460_v6 = vpop.f32.mrb[70].mxu1  ;;  %v2236_v15 = vpop.f32.mrb[71].mxu0 }
 0x171   : > { %v1560_v27 = vadd.f32 %v2661_v59, %v1535_v43  ;;  %v1536_v8 = vmul.f32 %v2656_v58, %v1460_v6  ;;  %v2290_v9 = vpop.f32.mrb[71].mxu1 }
 0x172   : > { %1735 = vst.msk [vmem:[%s2828_s27 + $0x18] sm:$0xf] %vm1728_vm4, %v2032_v63  ;;  %v2033_v10 = vpack.c.bf16 %v1609_v0, %v1609_v0  ;;  %v1221_v21 = vmax.f32 %v1196_v20, 0.0  ;;  %v1197_v11 = vadd.f32 %v2661_v59, %v1172_v2 }
 0x173   : > { %v1585_v12 = vmax.f32 %v1560_v27, 0.0  ;;  %v1561_v14 = vadd.f32 %v2661_v59, %v1536_v8 }
 0x174   : > { %1736 = vst.msk [vmem:[%s2828_s27 + $0x1c] sm:$0xf] %vm1728_vm4, %v2033_v10  ;;  %v1246_v16 = vmax.f32 %v2719_v45, %v1221_v21  ;;  %v1222_v17 = vmax.f32 %v1197_v11, 0.0 }
 0x175   : > { %v1101_v18 = vpop.f32.mrb[72].mxu0  ;;  %v1586_v25 = vmax.f32 %v1561_v14, 0.0 }
 0x176   : > { %v1610_v22 = vmax.f32 %v1246_v16, %v1585_v12  ;;  %v1247_v23 = vmax.f32 %v2722_v51, %v1222_v17  ;;  %v1173_v28 = vmul.f32 %v2656_v58, %v1101_v18  ;;  %v1465_v61 = vpop.f32.mrb[72].mxu1  ;;  %v2239_v29 = vpop.f32.mrb[73].mxu0 }
 0x177   : > { %v1537_v30 = vmul.f32 %v2656_v58, %v1465_v61  ;;  %v2293_v31 = vpop.f32.mrb[73].mxu1  ;;  %v1104_v3 = vpop.f32.mrb[74].mxu0 }
 0x178   : > { %v2034_v35 = vpack.c.bf16 %v1610_v22, %v1610_v22  ;;  %v1611_v36 = vmax.f32 %v1247_v23, %v1586_v25  ;;  %v1198_v45 = vadd.f32 %v2661_v59, %v1173_v28  ;;  %v1174_v38 = vmul.f32 %v2656_v58, %v1104_v3  ;;  %v1468_v39 = vpop.f32.mrb[74].mxu1  ;;  %v2240_v41 = vpop.f32.mrb[75].mxu0 }
 0x179   : > { %v1562_v51 = vadd.f32 %v2661_v59, %v1537_v30  ;;  %v1538_v42 = vmul.f32 %v2656_v58, %v1468_v39  ;;  %v2294_v44 = vpop.f32.mrb[75].mxu1 }
 0x17a   : > { %1737 = vst.msk [vmem:[%s2828_s27 + $0x20] sm:$0xf] %vm1728_vm4, %v2034_v35  ;;  %v2035_v46 = vpack.c.bf16 %v1611_v36, %v1611_v36  ;;  %v1223_v47 = vmax.f32 %v1198_v45, 0.0  ;;  %v1199_v48 = vadd.f32 %v2661_v59, %v1174_v38 }
 0x17b   : > { %v1587_v49 = vmax.f32 %v1562_v51, 0.0  ;;  %v1563_v50 = vadd.f32 %v2661_v59, %v1538_v42 }
 0x17c   : > { %1738 = vst.msk [vmem:[%s2828_s27 + $0x24] sm:$0xf] %vm1728_vm4, %v2035_v46  ;;  %v1248_v37 = vmax.f32 %v2731_v7, %v1223_v47  ;;  %v1224_v52 = vmax.f32 %v1199_v48, 0.0 }
 0x17d   : > { %v1109_v53 = vpop.f32.mrb[76].mxu0  ;;  %v1588_v57 = vmax.f32 %v1563_v50, 0.0 }
 0x17e   : > { %v1612_v54 = vmax.f32 %v1248_v37, %v1587_v49  ;;  %v1249_v43 = vmax.f32 %v2734_v13, %v1224_v52  ;;  %v1175_v60 = vmul.f32 %v2656_v58, %v1109_v53  ;;  %v1473_v63 = vpop.f32.mrb[76].mxu1  ;;  %v2243_v0 = vpop.f32.mrb[77].mxu0 }
 0x17f   : > { %v1539_v20 = vmul.f32 %v2656_v58, %v1473_v63  ;;  %v2297_v2 = vpop.f32.mrb[77].mxu1  ;;  %v1112_v6 = vpop.f32.mrb[78].mxu0 }
 0x180   : > { %v2036_v15 = vpack.c.bf16 %v1612_v54, %v1612_v54  ;;  %v1613_v27 = vmax.f32 %v1249_v43, %v1588_v57  ;;  %v1200_v7 = vadd.f32 %v2661_v59, %v1175_v60  ;;  %v1176_v8 = vmul.f32 %v2656_v58, %v1112_v6  ;;  %v1476_v9 = vpop.f32.mrb[78].mxu1  ;;  %v2244_v10 = vpop.f32.mrb[79].mxu0 }
 0x181   : > { %v1564_v13 = vadd.f32 %v2661_v59, %v1539_v20  ;;  %v1540_v21 = vmul.f32 %v2656_v58, %v1476_v9  ;;  %v2298_v11 = vpop.f32.mrb[79].mxu1 }
 0x182   : > { %1739 = vst.msk [vmem:[%s2828_s27 + $0x28] sm:$0xf] %vm1728_vm4, %v2036_v15  ;;  %v2037_v12 = vpack.c.bf16 %v1613_v27, %v1613_v27  ;;  %v1225_v14 = vmax.f32 %v1200_v7, 0.0  ;;  %v1201_v16 = vadd.f32 %v2661_v59, %v1176_v8  ;;  %v2933_v8 = vld [vmem:[%s3008_s2] ss:$0 sm:$0xff] }
 0x183   : > { %v1589_v17 = vmax.f32 %v1564_v13, 0.0  ;;  %v1565_v18 = vadd.f32 %v2661_v59, %v1540_v21 }
 0x184   : > { %1740 = vst.msk [vmem:[%s2828_s27 + $0x2c] sm:$0xf] %vm1728_vm4, %v2037_v12  ;;  %v1250_v22 = vmax.f32 %v2743_v33, %v1225_v14  ;;  %v1226_v23 = vmax.f32 %v1201_v16, 0.0 }
 0x185   : > { %v1117_v25 = vpop.f32.mrb[80].mxu0  ;;  %v1590_v29 = vmax.f32 %v1565_v18, 0.0 }
 0x186   : > { %v1614_v28 = vmax.f32 %v1250_v22, %v1589_v17  ;;  %v1251_v61 = vmax.f32 %v2746_v40, %v1226_v23  ;;  %v1177_v30 = vmul.f32 %v2656_v58, %v1117_v25  ;;  %v1481_v31 = vpop.f32.mrb[80].mxu1  ;;  %v2247_v3 = vpop.f32.mrb[81].mxu0 }
 0x187   : > { %v1541_v35 = vmul.f32 %v2656_v58, %v1481_v31  ;;  %v2301_v36 = vpop.f32.mrb[81].mxu1  ;;  %v1120_v45 = vpop.f32.mrb[82].mxu0 }
 0x188   : > { %v2038_v38 = vpack.c.bf16 %v1614_v28, %v1614_v28  ;;  %v1615_v39 = vmax.f32 %v1251_v61, %v1590_v29  ;;  %v1202_v33 = vadd.f32 %v2661_v59, %v1177_v30  ;;  %v1178_v41 = vmul.f32 %v2656_v58, %v1120_v45  ;;  %v1484_v51 = vpop.f32.mrb[82].mxu1  ;;  %v2248_v42 = vpop.f32.mrb[83].mxu0 }
 0x189   : > { %v1566_v40 = vadd.f32 %v2661_v59, %v1541_v35  ;;  %v1542_v44 = vmul.f32 %v2656_v58, %v1484_v51  ;;  %v2302_v46 = vpop.f32.mrb[83].mxu1 }
 0x18a   : > { %1741 = vst.msk [vmem:[%s2828_s27 + $0x30] sm:$0xf] %vm1728_vm4, %v2038_v38  ;;  %v2039_v47 = vpack.c.bf16 %v1615_v39, %v1615_v39  ;;  %v1227_v48 = vmax.f32 %v1202_v33, 0.0  ;;  %v1203_v49 = vadd.f32 %v2661_v59, %v1178_v41 }
 0x18b   : > { %v1591_v50 = vmax.f32 %v1566_v40, 0.0  ;;  %v1567_v37 = vadd.f32 %v2661_v59, %v1542_v44 }
 0x18c   : > { %1742 = vst.msk [vmem:[%s2828_s27 + $0x34] sm:$0xf] %vm1728_vm4, %v2039_v47  ;;  %v1252_v52 = vmax.f32 %v2755_v62, %v1227_v48  ;;  %v1228_v53 = vmax.f32 %v1203_v49, 0.0 }
 0x18d   : > { %v1125_v54 = vpop.f32.mrb[84].mxu0  ;;  %v1592_v60 = vmax.f32 %v1567_v37, 0.0 }
 0x18e   : > { %v1616_v43 = vmax.f32 %v1252_v52, %v1591_v50  ;;  %v1253_v57 = vmax.f32 %v2758_v5, %v1228_v53  ;;  %v1179_v63 = vmul.f32 %v2656_v58, %v1125_v54  ;;  %v1489_v0 = vpop.f32.mrb[84].mxu1  ;;  %v2251_v20 = vpop.f32.mrb[85].mxu0 }
 0x18f   : > { %v1543_v2 = vmul.f32 %v2656_v58, %v1489_v0  ;;  %v2305_v6 = vpop.f32.mrb[85].mxu1  ;;  %v1128_v15 = vpop.f32.mrb[86].mxu0  ;;  %v2939_v58 = vld [vmem:[%s3008_s2 + $0x1] ss:$0 sm:$0xff] }
 0x190   : > { %v2040_v27 = vpack.c.bf16 %v1616_v43, %v1616_v43  ;;  %v1617_v7 = vmax.f32 %v1253_v57, %v1592_v60  ;;  %v1204_v62 = vadd.f32 %v2661_v59, %v1179_v63  ;;  %v1180_v5 = vmul.f32 %v2933_v8, %v1128_v15  ;;  %v1492_v9 = vpop.f32.mrb[86].mxu1  ;;  %v2252_v10 = vpop.f32.mrb[87].mxu0 }
 0x191   : > { %v1568_v13 = vadd.f32 %v2939_v58, %v1543_v2  ;;  %v1544_v21 = vmul.f32 %v2933_v8, %v1492_v9  ;;  %v2306_v11 = vpop.f32.mrb[87].mxu1 }
 0x192   : > { %1743 = vst.msk [vmem:[%s2828_s27 + $0x38] sm:$0xf] %vm1728_vm4, %v2040_v27  ;;  %v2041_v59 = vpack.c.bf16 %v1617_v7, %v1617_v7  ;;  %v1229_v12 = vmax.f32 %v1204_v62, 0.0  ;;  %v1205_v14 = vadd.f32 %v2939_v58, %v1180_v5 }
 0x193   : > { %v1593_v16 = vmax.f32 %v1568_v13, 0.0  ;;  %v1569_v17 = vadd.f32 %v2939_v58, %v1544_v21 }
 0x194   : > { %1744 = vst.msk [vmem:[%s2828_s27 + $0x3c] sm:$0xf] %vm1728_vm4, %v2041_v59  ;;  %v1254_v18 = vmax.f32 %v2767_v26, %v1229_v12  ;;  %v1230_v22 = vmax.f32 %v1205_v14, 0.0 }
 0x195   : > { %v1133_v23 = vpop.f32.mrb[88].mxu0  ;;  %v1594_v61 = vmax.f32 %v1569_v17, 0.0 }
 0x196   : > { %v1618_v25 = vmax.f32 %v1254_v18, %v1593_v16  ;;  %v1255_v28 = vmax.f32 %v2770_v34, %v1230_v22  ;;  %v1181_v29 = vmul.f32 %v2933_v8, %v1133_v23  ;;  %v1497_v30 = vpop.f32.mrb[88].mxu1  ;;  %v2255_v31 = vpop.f32.mrb[89].mxu0 }
 0x197   : > { %v1545_v3 = vmul.f32 %v2933_v8, %v1497_v30  ;;  %v2309_v35 = vpop.f32.mrb[89].mxu1  ;;  %v1136_v36 = vpop.f32.mrb[90].mxu0 }
 0x198   : > { %v2042_v45 = vpack.c.bf16 %v1618_v25, %v1618_v25  ;;  %v1619_v38 = vmax.f32 %v1255_v28, %v1594_v61  ;;  %v1206_v26 = vadd.f32 %v2939_v58, %v1181_v29  ;;  %v1182_v39 = vmul.f32 %v2933_v8, %v1136_v36  ;;  %v1500_v33 = vpop.f32.mrb[90].mxu1  ;;  %v2256_v41 = vpop.f32.mrb[91].mxu0 }
 0x199   : > { %v1570_v34 = vadd.f32 %v2939_v58, %v1545_v3  ;;  %v1546_v51 = vmul.f32 %v2933_v8, %v1500_v33  ;;  %v2310_v42 = vpop.f32.mrb[91].mxu1 }
 0x19a   : > { %1745 = vst.msk [vmem:[%s2828_s27 + $0x40] sm:$0xf] %vm1728_vm4, %v2042_v45  ;;  %v2043_v40 = vpack.c.bf16 %v1619_v38, %v1619_v38  ;;  %v1231_v44 = vmax.f32 %v1206_v26, 0.0  ;;  %v1207_v46 = vadd.f32 %v2939_v58, %v1182_v39 }
 0x19b   : > { %v1595_v47 = vmax.f32 %v1570_v34, 0.0  ;;  %v1571_v48 = vadd.f32 %v2939_v58, %v1546_v51 }
 0x19c   : > { %1746 = vst.msk [vmem:[%s2828_s27 + $0x44] sm:$0xf] %vm1728_vm4, %v2043_v40  ;;  %v1256_v49 = vmax.f32 %v2779_v55, %v1231_v44  ;;  %v1232_v50 = vmax.f32 %v1207_v46, 0.0 }
 0x19d   : > { %v1141_v37 = vpop.f32.mrb[92].mxu0  ;;  %v1596_v54 = vmax.f32 %v1571_v48, 0.0 }
 0x19e   : > { %v1620_v52 = vmax.f32 %v1256_v49, %v1595_v47  ;;  %v1257_v53 = vmax.f32 %v2782_v1, %v1232_v50  ;;  %v1183_v43 = vmul.f32 %v2933_v8, %v1141_v37  ;;  %v1505_v57 = vpop.f32.mrb[92].mxu1  ;;  %v2259_v60 = vpop.f32.mrb[93].mxu0 }
 0x19f   : > { %v1547_v63 = vmul.f32 %v2933_v8, %v1505_v57  ;;  %v2313_v0 = vpop.f32.mrb[93].mxu1  ;;  %v1144_v20 = vpop.f32.mrb[94].mxu0 }
 0x1a0   : > { %v2044_v2 = vpack.c.bf16 %v1620_v52, %v1620_v52  ;;  %v1621_v6 = vmax.f32 %v1257_v53, %v1596_v54  ;;  %v1208_v55 = vadd.f32 %v2939_v58, %v1183_v43  ;;  %v1184_v15 = vmul.f32 %v2933_v8, %v1144_v20  ;;  %v1508_v27 = vpop.f32.mrb[94].mxu1  ;;  %v2260_v7 = vpop.f32.mrb[95].mxu0 }
 0x1a1   : > { %v1572_v1 = vadd.f32 %v2939_v58, %v1547_v63  ;;  %v1548_v62 = vmul.f32 %v2933_v8, %v1508_v27  ;;  %v2314_v5 = vpop.f32.mrb[95].mxu1 }
 0x1a2   : > { %1747 = vst.msk [vmem:[%s2828_s27 + $0x48] sm:$0xf] %vm1728_vm4, %v2044_v2  ;;  %v2045_v9 = vpack.c.bf16 %v1621_v6, %v1621_v6  ;;  %v1233_v10 = vmax.f32 %v1208_v55, 0.0  ;;  %v1209_v13 = vadd.f32 %v2939_v58, %v1184_v15 }
 0x1a3   : > { %v1597_v21 = vmax.f32 %v1572_v1, 0.0  ;;  %v1573_v11 = vadd.f32 %v2939_v58, %v1548_v62 }
 0x1a4   : > { %1748 = vst.msk [vmem:[%s2828_s27 + $0x4c] sm:$0xf] %vm1728_vm4, %v2045_v9  ;;  %v1258_v59 = vmax.f32 %v2791_v24, %v1233_v10  ;;  %v1234_v12 = vmax.f32 %v1209_v13, 0.0 }
 0x1a5   : > { %v1149_v14 = vpop.f32.mrb[96].mxu0  ;;  %v1598_v18 = vmax.f32 %v1573_v11, 0.0 }
 0x1a6   : > { %v1622_v16 = vmax.f32 %v1258_v59, %v1597_v21  ;;  %v1259_v17 = vmax.f32 %v2794_v32, %v1234_v12  ;;  %v1185_v22 = vmul.f32 %v2933_v8, %v1149_v14  ;;  %v1513_v23 = vpop.f32.mrb[96].mxu1  ;;  %v2263_v25 = vpop.f32.mrb[97].mxu0 }
 0x1a7   : > { %v1549_v28 = vmul.f32 %v2933_v8, %v1513_v23  ;;  %v2317_v61 = vpop.f32.mrb[97].mxu1  ;;  %v1152_v29 = vpop.f32.mrb[98].mxu0 }
 0x1a8   : > { %v2046_v30 = vpack.c.bf16 %v1622_v16, %v1622_v16  ;;  %v1623_v31 = vmax.f32 %v1259_v17, %v1598_v18  ;;  %v1210_v24 = vadd.f32 %v2939_v58, %v1185_v22  ;;  %v1186_v3 = vmul.f32 %v2933_v8, %v1152_v29  ;;  %v1516_v35 = vpop.f32.mrb[98].mxu1  ;;  %v2264_v36 = vpop.f32.mrb[99].mxu0 }
 0x1a9   : > { %v1574_v32 = vadd.f32 %v2939_v58, %v1549_v28  ;;  %v1550_v45 = vmul.f32 %v2933_v8, %v1516_v35  ;;  %v2318_v38 = vpop.f32.mrb[99].mxu1 }
 0x1aa   : > { %1749 = vst.msk [vmem:[%s2828_s27 + $0x50] sm:$0xf] %vm1728_vm4, %v2046_v30  ;;  %v2047_v26 = vpack.c.bf16 %v1623_v31, %v1623_v31  ;;  %v1235_v39 = vmax.f32 %v1210_v24, 0.0  ;;  %v1211_v33 = vadd.f32 %v2939_v58, %v1186_v3 }
 0x1ab   : > { %v1599_v41 = vmax.f32 %v1574_v32, 0.0  ;;  %v1575_v34 = vadd.f32 %v2939_v58, %v1550_v45 }
 0x1ac   : > { %1750 = vst.msk [vmem:[%s2828_s27 + $0x54] sm:$0xf] %vm1728_vm4, %v2047_v26  ;;  %v1260_v51 = vmax.f32 %v2803_v56, %v1235_v39  ;;  %v1236_v42 = vmax.f32 %v1211_v33, 0.0 }
 0x1ad   : > { %v1157_v40 = vpop.f32.mrb[100].mxu0  ;;  %v1600_v47 = vmax.f32 %v1575_v34, 0.0 }
 0x1ae   : > { %v1624_v44 = vmax.f32 %v1260_v51, %v1599_v41  ;;  %v1261_v46 = vmax.f32 %v2806_v4, %v1236_v42  ;;  %v1187_v48 = vmul.f32 %v2933_v8, %v1157_v40  ;;  %v1521_v49 = vpop.f32.mrb[100].mxu1  ;;  %v2267_v50 = vpop.f32.mrb[101].mxu0 }
 0x1af   : > { %v1551_v37 = vmul.f32 %v2933_v8, %v1521_v49  ;;  %v2321_v52 = vpop.f32.mrb[101].mxu1  ;;  %v1160_v53 = vpop.f32.mrb[102].mxu0 }
 0x1b0   : > { %v2048_v54 = vpack.c.bf16 %v1624_v44, %v1624_v44  ;;  %v1625_v43 = vmax.f32 %v1261_v46, %v1600_v47  ;;  %v1212_v56 = vadd.f32 %v2939_v58, %v1187_v48  ;;  %v1524_v57 = vpop.f32.mrb[102].mxu1  ;;  %v2268_v60 = vpop.f32.mrb[103].mxu0 }
 0x1b1   : > { %v1576_v63 = vadd.f32 %v2939_v58, %v1551_v37  ;;  %v2322_v4 = vpop.f32.mrb[103].mxu1 }
 0x1b2   : > { %1751 = vst.msk [vmem:[%s2828_s27 + $0x58] sm:$0xf] %vm1728_vm4, %v2048_v54  ;;  %v2049_v0 = vpack.c.bf16 %v1625_v43, %v1625_v43  ;;  %v1237_v20 = vmax.f32 %v1212_v56, 0.0 }
 0x1b3   : > { %v1601_v2 = vmax.f32 %v1576_v63, 0.0 }
 0x1b4   : > { %1752 = vst.msk [vmem:[%s2828_s27 + $0x5c] sm:$0xf] %vm1728_vm4, %v2049_v0  ;;  %v1262_v8 = vmax.f32 %v2811_v19, %v1237_v20 }
 0x1b6   : > { %v1626_v6 = vmax.f32 %v1262_v8, %v1601_v2 }
 0x1b8   : > { %v2050_v55 = vpack.c.bf16 %v1626_v6, %v1626_v6 }
 0x1ba   : > { %1754 = vst.msk [vmem:[%s2828_s27 + $0x60] sm:$0x3] %vm1753_vm5, %v2050_v55 }
 0x1bb PF: > { %s13_s12 = sadd.s32 1, %s2397_s12  }
 0x1bc   : > { %p10_p4 = scmp.ge.s32.totalorder %s13_s12, 4  }
 0x1be   :  { %12 = sbr.rel (!%p10_p4) target bundleno = 1 (0x1), region = 65 }

// kernel: net_forward.7
= control target key start
LH: loop header
LB: loop body
LE: loop exit
PB: predicated region body
PF: predicated region fallthrough
CT: control target
= control target key end

     0   :  { %v163_v28 = vlaneseq  ;;  %v1180_v36 = vmov 1966171168   ;;  %s1464_s0 = inlined_call_operand.vmem [shape: bf16[2,1024], index: 0, kind: input, shape index: {}]   ;;  %s1465_s1 = inlined_call_operand.vmem [shape: bf16[1024,128], index: 1, kind: input, shape index: {}]   ;;  %s1466_s2 = inlined_call_operand.vmem [shape: f32[1,128], index: 2, kind: input, shape index: {}]   ;;  %s1467_s3 = inlined_call_operand.vmem [shape: bf16[128,128], index: 3, kind: input, shape index: {}]   ;;  %s1468_s4 = inlined_call_operand.vmem [shape: f32[1,128], index: 4, kind: input, shape index: {}]   ;;  %s1469_s5 = inlined_call_operand.hbm [shape: f32[2,128], index: 5, kind: output, shape index: {}]  }
   0x1   :  { %v1083_v0 = vld [vmem:[%s1465_s1 + $0x40] sm:$0xff]   ;;  %v1087_v4 = vld [vmem:[%s1465_s1 + $0x48] sm:$0xff]   ;;  %v1091_v8 = vld [vmem:[%s1465_s1 + $0x50] sm:$0xff]   ;;  %v161_v37 = vunpack.c.l.s4 %v1180_v36 }
   0x2   :  { %v1084_v1 = vld [vmem:[%s1465_s1 + $0xc0] sm:$0xff]   ;;  %962 = vmatprep.subr.bf16.mxu0 %v1083_v0  ;;  %v1088_v5 = vld [vmem:[%s1465_s1 + $0xc8] sm:$0xff]   ;;  %v1092_v9 = vld [vmem:[%s1465_s1 + $0xd0] sm:$0xff]   ;;  %v164_v33 = vshrl.u32 %v163_v28, 7 }
   0x3   :  { %v1085_v2 = vld [vmem:[%s1465_s1] sm:$0xff]   ;;  %984 = vmatprep.subr.bf16.mxu1 %v1084_v1  ;;  %v1089_v6 = vld [vmem:[%s1465_s1 + $0x8] sm:$0xff]   ;;  %v1093_v10 = vld [vmem:[%s1465_s1 + $0x10] sm:$0xff]   ;;  %v162_v40 = vunpack.c.0.s8 %v161_v37 }
   0x4   :  { %v1086_v3 = vld [vmem:[%s1465_s1 + $0x80] sm:$0xff]   ;;  %963 = vmatpush3.bf16.msra.mxu0 %v1085_v2  ;;  %v1090_v7 = vld [vmem:[%s1465_s1 + $0x88] sm:$0xff]   ;;  %v1094_v11 = vld [vmem:[%s1465_s1 + $0x90] sm:$0xff]  }
   0x5   :  { %985 = vmatpush3.bf16.msra.mxu1 %v1086_v3  ;;  %964 = vmatprep.subr.bf16.mxu0 %v1087_v4  ;;  %v1095_v12 = vld [vmem:[%s1465_s1 + $0x58] sm:$0xff]   ;;  %v1099_v16 = vld [vmem:[%s1465_s1 + $0x60] sm:$0xff]   ;;  %v1103_v20 = vld [vmem:[%s1465_s1 + $0x68] sm:$0xff]   ;;  %v1319_v41 = vsub.s32 %v162_v40, %v164_v33 }
   0x6   :  { %986 = vmatprep.subr.bf16.mxu1 %v1088_v5  ;;  %v1096_v13 = vld [vmem:[%s1465_s1 + $0xd8] sm:$0xff]   ;;  %v1100_v17 = vld [vmem:[%s1465_s1 + $0xe0] sm:$0xff]   ;;  %v1104_v21 = vld [vmem:[%s1465_s1 + $0xe8] sm:$0xff]  }
   0x7   :  { %v1097_v14 = vld [vmem:[%s1465_s1 + $0x18] sm:$0xff]   ;;  %v1101_v18 = vld [vmem:[%s1465_s1 + $0x20] sm:$0xff]   ;;  %v1105_v22 = vld [vmem:[%s1465_s1 + $0x28] sm:$0xff]  }
   0x8   :  { %965 = vmatpush3.bf16.msra.mxu0 %v1089_v6  ;;  %v1098_v15 = vld [vmem:[%s1465_s1 + $0x98] sm:$0xff]   ;;  %v1102_v19 = vld [vmem:[%s1465_s1 + $0xa0] sm:$0xff]   ;;  %v1106_v23 = vld [vmem:[%s1465_s1 + $0xa8] sm:$0xff]  }
   0x9   :  { %987 = vmatpush3.bf16.msra.mxu1 %v1090_v7  ;;  %966 = vmatprep.subr.bf16.mxu0 %v1091_v8  ;;  %v1107_v24 = vld [vmem:[%s1465_s1 + $0x70] sm:$0xff]   ;;  %v1111_v29 = vld [vmem:[%s1465_s1 + $0x78] sm:$0xff]   ;;  %v22_v34 = vld [vmem:[%s1464_s0] sm:$0xff] }
   0xa   :  { %988 = vmatprep.subr.bf16.mxu1 %v1092_v9  ;;  %v1108_v25 = vld [vmem:[%s1465_s1 + $0xf0] sm:$0xff]   ;;  %v1112_v30 = vld [vmem:[%s1465_s1 + $0xf8] sm:$0xff]   ;;  %v1116_v35 = vld [vmem:[%s1465_s1 + $0x140] sm:$0xff]   ;;  %v159_v39 = vcombine.high %v22_v34, %v22_v34  ;;  %v166_v42 = vrot.slane %v22_v34, %v1319_v41 }
   0xb   :  { %v1109_v26 = vld [vmem:[%s1465_s1 + $0x30] sm:$0xff]   ;;  %v1113_v31 = vld [vmem:[%s1465_s1 + $0x38] sm:$0xff]   ;;  %v1117_v38 = vld [vmem:[%s1465_s1 + $0x1c0] sm:$0xff]  }
   0xc   :  { %967 = vmatpush3.bf16.msra.mxu0 %v1093_v10  ;;  %v1110_v27 = vld [vmem:[%s1465_s1 + $0xb0] sm:$0xff]   ;;  %v1114_v32 = vld [vmem:[%s1465_s1 + $0xb8] sm:$0xff]   ;;  %v1323_v43 = vrot.slane %v159_v39, %v1319_v41  ;;  %v174_v44 = vcombine.high %v166_v42, %v166_v42  ;;  %v182_v45 = vrot.slane %v166_v42, %v1319_v41  ;;  %v1118_v47 = vld [vmem:[%s1465_s1 + $0x100] sm:$0xff]  }
   0xd   :  { %989 = vmatpush3.bf16.msra.mxu1 %v1094_v11  ;;  %968 = vmatprep.subr.bf16.mxu0 %v1095_v12  ;;  %v1119_v49 = vld [vmem:[%s1465_s1 + $0x180] sm:$0xff]   ;;  %v1120_v52 = vld [vmem:[%s1465_s1 + $0x148] sm:$0xff]   ;;  %v1124_v58 = vld [vmem:[%s1465_s1 + $0x150] sm:$0xff]  }
   0xe   :  { %990 = vmatprep.subr.bf16.mxu1 %v1096_v13  ;;  %v175_v46 = vcombine.high %v1323_v43, %v1323_v43  ;;  %v196_v48 = vrot.slane %v174_v44, %v1319_v41  ;;  %v204_v51 = vcombine.high %v182_v45, %v182_v45  ;;  %v1121_v54 = vld [vmem:[%s1465_s1 + $0x1c8] sm:$0xff]   ;;  %v1125_v59 = vld [vmem:[%s1465_s1 + $0x1d0] sm:$0xff]   ;;  %v1128_v62 = vld [vmem:[%s1465_s1 + $0x158] sm:$0xff]  }
   0xf   :  { %v1122_v55 = vld [vmem:[%s1465_s1 + $0x108] sm:$0xff]   ;;  %v1126_v60 = vld [vmem:[%s1465_s1 + $0x110] sm:$0xff]   ;;  %v1129_v63 = vld [vmem:[%s1465_s1 + $0x1d8] sm:$0xff]  }
  0x10   :  { %969 = vmatpush3.bf16.msra.mxu0 %v1097_v14  ;;  %v203_v50 = vrot.slane %v175_v46, %v1319_v41  ;;  %632 = vmatprep.mubr.bf16.mxu0 %v196_v48  ;;  %v206_v53 = vcombine.high %v196_v48, %v196_v48  ;;  %v1123_v57 = vld [vmem:[%s1465_s1 + $0x188] sm:$0xff]   ;;  %v1127_v61 = vld [vmem:[%s1465_s1 + $0x190] sm:$0xff]   ;;  %v1130_v0 = vld [vmem:[%s1465_s1 + $0x118] sm:$0xff]  }
  0x11   :  { %991 = vmatpush3.bf16.msra.mxu1 %v1098_v15  ;;  %970 = vmatprep.subr.bf16.mxu0 %v1099_v16  ;;  %v1131_v1 = vld [vmem:[%s1465_s1 + $0x198] sm:$0xff]   ;;  %v1132_v2 = vld [vmem:[%s1465_s1 + $0x160] sm:$0xff]   ;;  %v1136_v6 = vld [vmem:[%s1465_s1 + $0x168] sm:$0xff]  }
  0x12   :  { %992 = vmatprep.subr.bf16.mxu1 %v1100_v17  ;;  %v207_v56 = vcombine.high %v203_v50, %v203_v50  ;;  %672 = vmatprep.mubr.bf16.mxu1 %v206_v53  ;;  %v1133_v3 = vld [vmem:[%s1465_s1 + $0x1e0] sm:$0xff]   ;;  %v1137_v7 = vld [vmem:[%s1465_s1 + $0x1e8] sm:$0xff]   ;;  %v1140_v10 = vld [vmem:[%s1465_s1 + $0x170] sm:$0xff]  }
  0x13   :  { %v1134_v4 = vld [vmem:[%s1465_s1 + $0x120] sm:$0xff]   ;;  %v1138_v8 = vld [vmem:[%s1465_s1 + $0x128] sm:$0xff]   ;;  %v1141_v11 = vld [vmem:[%s1465_s1 + $0x1f0] sm:$0xff]  }
  0x14   :  { %971 = vmatpush3.bf16.msra.mxu0 %v1101_v18  ;;  %v1135_v5 = vld [vmem:[%s1465_s1 + $0x1a0] sm:$0xff]   ;;  %v1139_v9 = vld [vmem:[%s1465_s1 + $0x1a8] sm:$0xff]   ;;  %v1142_v12 = vld [vmem:[%s1465_s1 + $0x130] sm:$0xff]  }
  0x15   :  { %993 = vmatpush3.bf16.msra.mxu1 %v1102_v19  ;;  %972 = vmatprep.subr.bf16.mxu0 %v1103_v20  ;;  %v1144_v13 = vld [vmem:[%s1465_s1 + $0x178] sm:$0xff]   ;;  %v1143_v14 = vld [vmem:[%s1465_s1 + $0x1b0] sm:$0xff]  }
  0x16   :  { %994 = vmatprep.subr.bf16.mxu1 %v1104_v21 }
  0x18   :  { %973 = vmatpush3.bf16.msra.mxu0 %v1105_v22 }
  0x19   :  { %995 = vmatpush3.bf16.msra.mxu1 %v1106_v23  ;;  %974 = vmatprep.subr.bf16.mxu0 %v1107_v24 }
  0x1a   :  { %996 = vmatprep.subr.bf16.mxu1 %v1108_v25 }
  0x1c   :  { %975 = vmatpush3.bf16.msra.mxu0 %v1109_v26 }
  0x1d   :  { %997 = vmatpush3.bf16.msra.mxu1 %v1110_v27  ;;  %976 = vmatprep.subr.bf16.mxu0 %v1111_v29 }
  0x1e   :  { %998 = vmatprep.subr.bf16.mxu1 %v1112_v30 }
  0x20   :  { %977 = vmatpush3.bf16.msra.mxu0 %v1113_v31 }
  0x21   :  { %999 = vmatpush3.bf16.msra.mxu1 %v1114_v32  ;;  %1006 = vmatprep.subr.bf16.mxu0 %v1116_v35 }
  0x22   :  { %1028 = vmatprep.subr.bf16.mxu1 %v1117_v38 }
  0x23   :  { %633 = vmatmul.mubr.bf16.vlgmr.msra.gmra.mrb[0].mxu0 %v182_v45 }
  0x24   :  { %1007 = vmatpush3.bf16.msra.mxu0 %v1118_v47  ;;  %673 = vmatmul.mubr.bf16.vlgmr.msra.gmra.mrb[0].mxu1 %v204_v51 }
  0x25   :  { %1008 = vmatprep.subr.bf16.mxu0 %v1120_v52  ;;  %1029 = vmatpush3.bf16.msra.mxu1 %v1119_v49 }
  0x26   :  { %712 = vmatprep.mubr.bf16.mxu0 %v203_v50  ;;  %1030 = vmatprep.subr.bf16.mxu1 %v1121_v54 }
  0x27   :  { %752 = vmatprep.mubr.bf16.mxu1 %v207_v56 }
  0x28   :  { %1009 = vmatpush3.bf16.msra.mxu0 %v1122_v55 }
  0x29   :  { %1010 = vmatprep.subr.bf16.mxu0 %v1124_v58  ;;  %1031 = vmatpush3.bf16.msra.mxu1 %v1123_v57 }
  0x2a   :  { %1032 = vmatprep.subr.bf16.mxu1 %v1125_v59 }
  0x2c   :  { %1011 = vmatpush3.bf16.msra.mxu0 %v1126_v60 }
  0x2d   :  { %1012 = vmatprep.subr.bf16.mxu0 %v1128_v62  ;;  %1033 = vmatpush3.bf16.msra.mxu1 %v1127_v61 }
  0x2e   :  { %1034 = vmatprep.subr.bf16.mxu1 %v1129_v63 }
  0x30   :  { %1013 = vmatpush3.bf16.msra.mxu0 %v1130_v0 }
  0x31   :  { %1014 = vmatprep.subr.bf16.mxu0 %v1132_v2  ;;  %1035 = vmatpush3.bf16.msra.mxu1 %v1131_v1 }
  0x32   :  { %1036 = vmatprep.subr.bf16.mxu1 %v1133_v3 }
  0x34   :  { %1015 = vmatpush3.bf16.msra.mxu0 %v1134_v4 }
  0x35   :  { %1016 = vmatprep.subr.bf16.mxu0 %v1136_v6  ;;  %1037 = vmatpush3.bf16.msra.mxu1 %v1135_v5 }
  0x36   :  { %1038 = vmatprep.subr.bf16.mxu1 %v1137_v7 }
  0x38   :  { %1017 = vmatpush3.bf16.msra.mxu0 %v1138_v8 }
  0x39   :  { %1018 = vmatprep.subr.bf16.mxu0 %v1140_v10  ;;  %1039 = vmatpush3.bf16.msra.mxu1 %v1139_v9 }
  0x3a   :  { %10 = vsyncpa [#allocation3], 0  ;;  %1040 = vmatprep.subr.bf16.mxu1 %v1141_v11  ;;  %v1145_v15 = vld [vmem:[%s1465_s1 + $0x1f8] sm:$0xff]   ;;  %v189_v17 = vrot.slane %v1323_v43, %v1319_v41  ;;  %v1148_v20 = vld [vmem:[%s1467_s3] sm:$0xff]   ;;  %v1181_v21 = vmov 0.0   ;;  %vm1182_vm0 = vmmov 0  }
  0x3b   :  { %v1146_v16 = vld [vmem:[%s1465_s1 + $0x138] sm:$0xff]   ;;  %v1149_v22 = vld [vmem:[%s1467_s3 + $0x8] sm:$0xff]   ;;  %v1150_v23 = vld [vmem:[%s1467_s3 + $0x10] sm:$0xff]   ;;  %s1183_s12 = smov [#allocation2]  }
  0x3c   :  { %1019 = vmatpush3.bf16.msra.mxu0 %v1142_v12  ;;  %v1147_v18 = vld [vmem:[%s1465_s1 + $0x1b8] sm:$0xff]   ;;  %v205_v19 = vcombine.high %v189_v17, %v189_v17  ;;  %v1152_v25 = vld [vmem:[%s1467_s3 + $0x20] sm:$0xff]   ;;  %v1153_v26 = vld [vmem:[%s1467_s3 + $0x28] sm:$0xff]   ;;  %s880_s0 = sshll.u32 %s1183_s12, 4  ;;  %s881_s0 = int_to_ptr.vmem [resolvable:$true] %s880_s0 }
  0x3d   :  { %1020 = vmatprep.subr.bf16.mxu0 %v1144_v13  ;;  %1041 = vmatpush3.bf16.msra.mxu1 %v1143_v14  ;;  %v1151_v24 = vld [vmem:[%s1467_s3 + $0x18] sm:$0xff]   ;;  %v1154_v27 = vld [vmem:[%s1467_s3 + $0x30] sm:$0xff]   ;;  %v888_v30 = vld [vmem:[%s1466_s2] ss:$0 sm:$0xff]  ;;  %s1156_s13 = scalar_lea.vmem %s881_s0, 32  ;;  %p1161_p1 = scmp.lt.s32.totalorder %s881_s0, %s881_s0 }
  0x3e   :  { %1042 = vmatprep.subr.bf16.mxu1 %v1145_v15  ;;  %v1155_v28 = vld [vmem:[%s1467_s3 + $0x38] sm:$0xff]   ;;  %v953_v56 = vld [vmem:[%s1468_s4] ss:$0 sm:$0xff]  ;;  %p1157_p0 = scmp.ne.s32.totalorder %s881_s0, %s1156_s13  ;;  %p1162_p2 = scmp.lt.s32.totalorder %s1156_s13, %s1156_s13 }
  0x40   :  { %1021 = vmatpush3.bf16.msra.mxu0 %v1146_v16  ;;  %p1163_p3 = por %p1162_p2, %p1161_p1 }
  0x41   :  { %1043 = vmatpush3.bf16.msra.mxu1 %v1147_v18  ;;  %1059 = vmatprep.subr.bf16.mxu0 %v1181_v21 }
  0x42   :  { %p1164_p4 = pnand %p1163_p3, %p1157_p0 }
  0x43   :  { %713 = vmatmul.mubr.bf16.vlgmr.msra.gmra.mrb[4].mxu0 %v189_v17 }
  0x44   :  { %753 = vmatmul.mubr.bf16.vlgmr.msra.gmra.mrb[4].mxu1 %v205_v19  ;;  %1060 = vmatpush3.bf16.msra.mxu0 %v1148_v20 }
  0x45   :  { %1061 = vmatprep.subr.bf16.mxu0 %v1181_v21  ;;  %1075 = vmatprep.mubr.msk.bf16.mxu0 %vm1182_vm0, %v1181_v21 }
  0x48   :  { %1062 = vmatpush3.bf16.msra.mxu0 %v1149_v22 }
  0x49   :  { %1063 = vmatprep.subr.bf16.mxu0 %v1181_v21 }
  0x4c   :  { %1064 = vmatpush3.bf16.msra.mxu0 %v1150_v23 }
  0x4d   :  { %1065 = vmatprep.subr.bf16.mxu0 %v1181_v21 }
  0x50   :  { %1066 = vmatpush3.bf16.msra.mxu0 %v1151_v24 }
  0x51   :  { %1067 = vmatprep.subr.bf16.mxu0 %v1181_v21 }
  0x54   :  { %1068 = vmatpush3.bf16.msra.mxu0 %v1152_v25 }
  0x55   :  { %1069 = vmatprep.subr.bf16.mxu0 %v1181_v21 }
  0x58   :  { %1070 = vmatpush3.bf16.msra.mxu0 %v1153_v26 }
  0x59   :  { %1071 = vmatprep.subr.bf16.mxu0 %v1181_v21 }
  0x5c   :  { %1072 = vmatpush3.bf16.msra.mxu0 %v1154_v27 }
  0x5d   :  { %1073 = vmatprep.subr.bf16.mxu0 %v1181_v21 }
  0x60   :  { %1074 = vmatpush3.bf16.msra.mxu0 %v1155_v28 }
  0xf6   :  { %v978_v29 = vpop.f32.mrb[0].mxu0 }
  0xf7   :  { %v979_v31 = vpop.f32.mrb[1].mxu0  ;;  %v1000_v32 = vpop.f32.mrb[0].mxu1 }
  0xf8   :  { %v980_v33 = vadd.f32 %v979_v31, %v978_v29  ;;  %v981_v34 = vpop.f32.mrb[2].mxu0  ;;  %v1001_v35 = vpop.f32.mrb[1].mxu1 }
  0xf9   :  { %v982_v36 = vpop.f32.mrb[3].mxu0  ;;  %v1002_v38 = vadd.f32 %v1001_v35, %v1000_v32  ;;  %v1003_v39 = vpop.f32.mrb[2].mxu1 }
  0xfa   :  { %v635_v37 = vadd.f32 %v980_v33, %v888_v30  ;;  %v1004_v40 = vpop.f32.mrb[3].mxu1 }
  0xfc   :  { %v675_v41 = vadd.f32 %v1002_v38, %v635_v37 }
 0x116   :  { %v1022_v42 = vpop.f32.mrb[4].mxu0 }
 0x117   :  { %v1023_v43 = vpop.f32.mrb[5].mxu0  ;;  %v1044_v44 = vpop.f32.mrb[4].mxu1 }
 0x118   :  { %v1024_v45 = vadd.f32 %v1023_v43, %v1022_v42  ;;  %v1025_v46 = vpop.f32.mrb[6].mxu0  ;;  %v1045_v47 = vpop.f32.mrb[5].mxu1 }
 0x119   :  { %v1026_v48 = vpop.f32.mrb[7].mxu0  ;;  %v1046_v50 = vadd.f32 %v1045_v47, %v1044_v44  ;;  %v1047_v51 = vpop.f32.mrb[6].mxu1 }
 0x11a   :  { %v715_v49 = vadd.f32 %v1024_v45, %v675_v41  ;;  %v1048_v52 = vpop.f32.mrb[7].mxu1 }
 0x11c   :  { %v755_v53 = vadd.f32 %v1046_v50, %v715_v49 }
 0x11e   :  { %v760_v54 = vmax.f32 %v755_v53, 0.0 }
 0x120   :  { %v761_v55 = vpack.c.bf16 %v760_v54, %v760_v54 }
 0x122   :  { %1076 = vmatmul.mubr.bf16.vlgmr.msra.gmra.mrb[8].mxu0 %v761_v55 }
 0x1f5   :  { %v867_v57 = vpop.f32.mrb[8].mxu0 }
 0x1f6   :  { %v868_v58 = vadd.f32 %v953_v56, %v867_v57  ;;  %v1077_v59 = vpop.f32.mrb[9].mxu0 }
 0x1f7   :  { %v870_v60 = vpop.f32.mrb[10].mxu0 }
 0x1f8   :  { %873 = vst [vmem:[#allocation2] sm:$0x3] %v868_v58  ;;  %v1078_v61 = vpop.f32.mrb[11].mxu0 }
 0x1f9   :  { %1167 = shalt.err (!%p1164_p4)
}
 0x1fa   :  { %s1168_s4 = scalar_lea.hbm %s1469_s5, 32 }
 0x1fb   :  { %p1169_p5 = scmp.ne.s32.totalorder %s1469_s5, %s1168_s4  ;;  %p1172_p6 = scmp.lt.u32.totalorder %s1168_s4, %s1469_s5 }
 0x1fd   :  { %p1174_p7 = pnand %p1172_p6, %p1169_p5 }
 0x1ff   :  { %1177 = shalt.err (!%p1174_p7)
}
 0x200   :  { %883 = dma.vmem_to_hbm [thread:$0]  %s881_s0, 32, %s1469_s5, [#allocation3]  }
 0x201   :  { %1178 = dma.done.wait [#allocation3], 32  }
 0x202   :  { %1179 = vsyncadd [#allocation3], 4294967264 }
 0x203   :  { %887 = vsyncpa [#allocation3], 1 }

// kernel: net_forward.6
= control target key start
LH: loop header
LB: loop body
LE: loop exit
PB: predicated region body
PF: predicated region fallthrough
CT: control target
= control target key end

     0   :  { %s3452_s12 = smov 0   ;;  %s4177_s0 = inlined_call_operand.vmem [shape: bf16[2,1,4,25,64], index: 0, kind: input, shape index: {}]   ;;  %s4178_s1 = inlined_call_operand.vmem [shape: bf16[9,64,64], index: 1, kind: input, shape index: {}]   ;;  %s4179_s2 = inlined_call_operand.vmem [shape: f32[2,64], index: 2, kind: input, shape index: {}]   ;;  %s4180_s3 = inlined_call_operand.vmem [shape: bf16[2,1,16,64], index: 3, kind: output, shape index: {}]  }
   0x1 LB: > { %s2409_s13 = sadd.s32 4294967295, %s3428_s12   ;;  %p2413_p0 = scmp.ge.s32.totalorder %s3428_s12, 1  ;;  %s3428_s12 = sphi %s3452_s12, %s13_s12  }
   0x2   : > { %p137_p1 = scmp.lt.s32.totalorder %s3428_s12, 3 }
   0x4   : > { %p138_p2 = pnand %p2413_p0, %p137_p1 }
   0x5   : > { %v3463_v0 = vld [vmem:[%s4178_s1 + $0x20] sm:$0xff] (!%p138_p2)   ;;  %v3430_v1 = vmov (!%p138_p2), 0.0   ;;  %v3472_v2 = vld [vmem:[%s4178_s1 + $0x28] sm:$0xff] (!%p138_p2)   ;;  %p161_p3 = scmp.lt.s32.totalorder (!%p138_p2), %s2409_s13, 1  ;;  %vm3431_vm0 = vmmov (!%p138_p2), 0   ;;  %v3487_v3 = vld [vmem:[%s4178_s1 + $0x30] sm:$0xff] (!%p138_p2)  }
   0x6   : > { %141 = sbr.rel (%p138_p2) target bundleno = 523 (0x20b), region = 32  ;;  %2792 = vmatprep.subr.bf16.mxu0 (!%p138_p2), %v3430_v1  ;;  %2900 = vmatprep.subr.bf16.mxu1 (!%p138_p2), %v3430_v1  ;;  %v3506_v6 = vld [vmem:[%s4178_s1 + $0x38] sm:$0xff] (!%p138_p2)   ;;  %v3515_v9 = vld [vmem:[%s4178_s1] sm:$0xff] (!%p138_p2)   ;;  %vm225_vm1 = vcmask (!%p138_p2), 523264   ;;  %vm363_vm2 = vsmask.f32 (!%p138_p2), 7424 }
   0x7   : > { %2793 = vmatpush3.bf16.msra.mxu0 (!%p138_p2), %v3463_v0  ;;  %2901 = vmatpush3.bf16.msra.mxu1 (!%p138_p2), %v3463_v0  ;;  %v3528_v18 = vld [vmem:[%s4178_s1 + $0x8] sm:$0xff] (!%p138_p2)   ;;  %v3542_v19 = vld [vmem:[%s4178_s1 + $0x10] sm:$0xff] (!%p138_p2)   ;;  %v3551_v20 = vld [vmem:[%s4178_s1 + $0x18] sm:$0xff] (!%p138_p2)   ;;  %vm739_vm3 = vsmask.f32 (!%p138_p2), 5376  ;;  %vm947_vm4 = vcmask (!%p138_p2), 1044480  }
   0x8   : > { %2794 = vmatprep.subr.bf16.mxu0 (!%p138_p2), %v3430_v1  ;;  %2902 = vmatprep.subr.bf16.mxu1 (!%p138_p2), %v3430_v1  ;;  %v3565_v24 = vld [vmem:[%s4178_s1 + $0x40] sm:$0xff] (!%p138_p2)   ;;  %v3576_v26 = vld [vmem:[%s4178_s1 + $0x48] sm:$0xff] (!%p138_p2)   ;;  %v3591_v29 = vld [vmem:[%s4178_s1 + $0x50] sm:$0xff] (!%p138_p2)   ;;  %vm2351_vm5 = vcmask (!%p138_p2), 519168  }
   0x9   : > { %2800 = vmatprep.mubr.msk.bf16.mxu0 (!%p138_p2), %vm3431_vm0, %v3430_v1  ;;  %2908 = vmatprep.mubr.msk.bf16.mxu1 (!%p138_p2), %vm3431_vm0, %v3430_v1  ;;  %v3600_v33 = vld [vmem:[%s4178_s1 + $0x58] sm:$0xff] (!%p138_p2)   ;;  %v3609_v36 = vld [vmem:[%s4178_s1 + $0x60] sm:$0xff] (!%p138_p2)   ;;  %v3620_v38 = vld [vmem:[%s4178_s1 + $0x68] sm:$0xff] (!%p138_p2)  }
   0xa   : > { %v3634_v39 = vld [vmem:[%s4178_s1 + $0x70] sm:$0xff] (!%p138_p2)   ;;  %v3643_v40 = vld [vmem:[%s4178_s1 + $0x78] sm:$0xff] (!%p138_p2)   ;;  %v3659_v44 = vld [vmem:[%s4178_s1 + $0x80] sm:$0xff] (!%p138_p2)  }
   0xb   : > { %2795 = vmatpush3.bf16.msra.mxu0 (!%p138_p2), %v3472_v2  ;;  %2903 = vmatpush3.bf16.msra.mxu1 (!%p138_p2), %v3472_v2  ;;  %v3674_v47 = vld [vmem:[%s4178_s1 + $0x88] sm:$0xff] (!%p138_p2)   ;;  %v3690_v50 = vld [vmem:[%s4178_s1 + $0x90] sm:$0xff] (!%p138_p2)   ;;  %v3699_v54 = vld [vmem:[%s4178_s1 + $0x98] sm:$0xff] (!%p138_p2)  }
   0xc   : > { %2796 = vmatprep.subr.bf16.mxu0 (!%p138_p2), %v3430_v1  ;;  %2904 = vmatprep.subr.bf16.mxu1 (!%p138_p2), %v3430_v1  ;;  %v3712_v59 = vld [vmem:[%s4178_s1 + $0xa0] sm:$0xff] (!%p138_p2)   ;;  %v3727_v62 = vld [vmem:[%s4178_s1 + $0xa8] sm:$0xff] (!%p138_p2)  }
   0xd   : > { %s4182_s13 = smov (!%p161_p3, %s2409_s13), 1 }
   0xe   : > { %s2608_s20 = sshll.u32 %s4182_s13, 6 }
   0xf   : > { %s3495_s23 = scalar_lea.vmem %s4177_s0, %s2608_s20  ;;  %2797 = vmatpush3.bf16.msra.mxu0 %v3487_v3  ;;  %2905 = vmatpush3.bf16.msra.mxu1 %v3487_v3  ;;  %s2609_s20 = sshll.u32 %s4182_s13, 3 }
  0x10   : > { %v343_v4 = vld [vmem:[%s3495_s23] sm:$0xf]  ;;  %v3499_v5 = vld [vmem:[%s3495_s23 + $0x4] sm:$0xf]  ;;  %2798 = vmatprep.subr.bf16.mxu0 %v3430_v1  ;;  %2906 = vmatprep.subr.bf16.mxu1 %v3430_v1  ;;  %v3366_v13 = vld [vmem:[%s3495_s23 + $0x10] sm:$0xff]   ;;  %s170_s24 = scalar_lea.vmem %s4180_s3, %s2609_s20 }
  0x11   : > { %v2448_v7 = vcombine.low %v343_v4, %v3499_v5  ;;  %v3369_v8 = vld [vmem:[%s3495_s23 + $0x8] ss:$0 sps:$4 sm:$0x11]   ;;  %v3373_v21 = vld [vmem:[%s3495_s23] sm:$0xff]   ;;  %v3558_v22 = vld [vmem:[%s3495_s23 + $0x14] sm:$0xf] }
  0x12   : > { %v372_v12 = vshll.u32 %v3369_v8, 16  ;;  %v2556_v23 = vld [vmem:[%s3495_s23 + $0x10] sm:$0xf]  ;;  %v3380_v27 = vld [vmem:[%s3495_s23 + $0x18] ss:$0 sps:$4 sm:$0x11]  }
  0x13   : > { %v365_v10 = vshrl.u32 %v2448_v7, 16  ;;  %v367_v11 = vshll.u32 %v2448_v7, 16  ;;  %2799 = vmatpush3.bf16.msra.mxu0 %v3506_v6  ;;  %2907 = vmatpush3.bf16.msra.mxu1 %v3506_v6  ;;  %v2558_v25 = vcombine.low %v2556_v23, %v3558_v22  ;;  %v1133_v32 = vshll.u32 %v3380_v27, 16  ;;  %v3649_v41 = vld [vmem:[%s3495_s23 + $0x20] sm:$0xff]   ;;  %v3663_v45 = vld [vmem:[%s3495_s23 + $0x30] sm:$0xff]  }
  0x14   : > { %v374_v15 = vrot.slane %v372_v12, 1  ;;  %2804 = vmatprep.subr.bf16.mxu0 %v3430_v1  ;;  %2912 = vmatprep.subr.bf16.mxu1 %v3430_v1  ;;  %v2487_v42 = vld [vmem:[%s3495_s23 + $0x20] sm:$0xf]  ;;  %v3653_v43 = vld [vmem:[%s3495_s23 + $0x24] sm:$0xf]  ;;  %v3743_v7 = vld [vmem:[%s4178_s1 + $0xb0] sm:$0xff]  }
  0x15   : > { %v369_v14 = vrot.slane %v367_v11, 1  ;;  %v1128_v28 = vshll.u32 %v2558_v25, 16  ;;  %v1126_v30 = vshrl.u32 %v2558_v25, 16  ;;  %v1135_v35 = vrot.slane %v1133_v32, 1  ;;  %v2563_v57 = vld [vmem:[%s3495_s23 + $0x30] sm:$0xf] }
  0x16   : > { %2801 = vmatmul.mubr.msk.bf16.vlgmr.msra.gmra.mrb[0].mxu0 %vm225_vm1, %v3366_v13  ;;  %v2498_v46 = vcombine.low %v2487_v42, %v3653_v43  ;;  %v3392_v48 = vld [vmem:[%s3495_s23 + $0x28] ss:$0 sps:$4 sm:$0x11]   ;;  %v3706_v58 = vld [vmem:[%s3495_s23 + $0x34] sm:$0xf]  ;;  %v3752_v12 = vld [vmem:[%s4178_s1 + $0xb8] sm:$0xff]  }
  0x17   : > { %v370_v16 = vor.u32 %v369_v14, %v365_v10  ;;  %2805 = vmatpush3.bf16.msra.mxu0 %v3515_v9  ;;  %2812 = vmatprep.mubr.msk.bf16.mxu0 %vm3431_vm0, %v3430_v1  ;;  %v1130_v31 = vrot.slane %v1128_v28, 1  ;;  %v648_v53 = vshll.u32 %v3392_v48, 16  ;;  %v2566_v61 = vcombine.low %v2563_v57, %v3706_v58  ;;  %v3398_v63 = vld [vmem:[%s3495_s23 + $0x38] ss:$0 sps:$4 sm:$0x11]  }
  0x18   : > { %2806 = vmatprep.subr.bf16.mxu0 %v3430_v1  ;;  %v643_v49 = vshll.u32 %v2498_v46, 16  ;;  %v641_v51 = vshrl.u32 %v2498_v46, 16  ;;  %v1288_v11 = vshll.u32 %v3398_v63, 16  ;;  %v3767_v23 = vld [vmem:[%s3495_s23 + $0x8] ss:$0 sps:$4 sm:$0x77]  }
  0x19   : > { %v375_v17 = vsel %vm363_vm2, %v370_v16, %v374_v15  ;;  %v1131_v34 = vor.u32 %v1130_v31, %v1126_v30  ;;  %v650_v56 = vrot.slane %v648_v53, 1  ;;  %v1283_v4 = vshll.u32 %v2566_v61, 16  ;;  %v2520_v16 = vld [vmem:[%s3495_s23 + $0x10] sm:$0xc]  ;;  %v3785_v30 = vld [vmem:[%s4178_s1 + $0xc8] sm:$0xff]  }
  0x1a   : > { %2909 = vmatmul.mubr.msk.bf16.vlgmr.msra.gmra.mrb[0].mxu1 %vm225_vm1, %v375_v17  ;;  %v645_v52 = vrot.slane %v643_v49, 1  ;;  %v1281_v8 = vshrl.u32 %v2566_v61, 16  ;;  %v1290_v15 = vrot.slane %v1288_v11, 1  ;;  %v2531_v27 = vcombine.low %v2520_v16, %v3558_v22  ;;  %v3776_v28 = vld [vmem:[%s3495_s23 + $0x18] ss:$0 sps:$4 sm:$0x77]  }
  0x1b   : > { %2913 = vmatpush3.bf16.msra.mxu1 %v3515_v9  ;;  %2920 = vmatprep.mubr.msk.bf16.mxu1 %vm3431_vm0, %v3430_v1  ;;  %v1136_v37 = vsel %vm363_vm2, %v1131_v34, %v1135_v35  ;;  %v1285_v10 = vrot.slane %v1283_v4, 1  ;;  %v749_v34 = vshrl.u32 %v3767_v23, 16  ;;  %v752_v35 = vshll.u32 %v3767_v23, 16  ;;  %v3804_v49 = vld [vmem:[%s4178_s1 + $0xd0] sm:$0xff]   ;;  %v3813_v4 = vld [vmem:[%s4178_s1 + $0xd8] sm:$0xff]  }
  0x1c   : > { %2914 = vmatprep.subr.bf16.mxu1 %v3430_v1  ;;  %2807 = vmatpush3.bf16.msra.mxu0 %v3528_v18  ;;  %v646_v55 = vor.u32 %v645_v52, %v641_v51  ;;  %v851_v42 = vshll.u32 %v2531_v27, 16  ;;  %v856_v46 = vshrl.u32 %v3776_v28, 16  ;;  %v859_v48 = vshll.u32 %v3776_v28, 16 }
  0x1d   : > { %2808 = vmatprep.subr.bf16.mxu0 %v3430_v1  ;;  %v1286_v14 = vor.u32 %v1285_v10, %v1281_v8  ;;  %v751_v53 = vrot.slane %v749_v34, 2  ;;  %v3865_v34 = vld [vmem:[%s4178_s1 + $0xf8] sm:$0xff]  }
  0x1e   : > { %v3717_v60 = vsel %vm363_vm2, %v646_v55, %v650_v56  ;;  %v754_v55 = vrot.slane %v752_v35, 3  ;;  %v853_v57 = vrot.slane %v851_v42, 3  ;;  %v858_v61 = vrot.slane %v856_v46, 2  ;;  %v2571_v46 = vld [vmem:[%s3495_s23 + $0x10] sm:$0x8] }
  0x1f   : > { %2915 = vmatpush3.bf16.msra.mxu1 %v3528_v18  ;;  %v3772_v25 = vsel %vm363_vm2, %v1286_v14, %v1290_v15  ;;  %v861_v63 = vrot.slane %v859_v48, 3  ;;  %v3825_v15 = vld [vmem:[%s4178_s1 + $0xe0] sm:$0xff]   ;;  %v3905_v48 = vld [vmem:[%s4178_s1 + $0x110] sm:$0xff]  }
  0x20   : > { %2916 = vmatprep.subr.bf16.mxu1 %v3430_v1  ;;  %2809 = vmatpush3.bf16.msra.mxu0 %v3542_v19  ;;  %v755_v10 = vor.u32 %v754_v55, %v751_v53  ;;  %v1429_v55 = vrot.slane %v3776_v28, 3 }
  0x21   : > { %2810 = vmatprep.subr.bf16.mxu0 %v3430_v1 }
  0x23   : > { %2917 = vmatpush3.bf16.msra.mxu1 %v3542_v19 }
  0x24   : > { %2918 = vmatprep.subr.bf16.mxu1 %v3430_v1  ;;  %2811 = vmatpush3.bf16.msra.mxu0 %v3551_v20 }
  0x25   : > { %2816 = vmatprep.subr.bf16.mxu0 %v3430_v1 }
  0x27   : > { %2919 = vmatpush3.bf16.msra.mxu1 %v3551_v20  ;;  %2813 = vmatmul.mubr.msk.bf16.vlgmr.msra.gmra.mrb[0].mxu0 %vm225_vm1, %v3373_v21 }
  0x28   : > { %2924 = vmatprep.subr.bf16.mxu1 %v3430_v1  ;;  %2817 = vmatpush3.bf16.msra.mxu0 %v3565_v24 }
  0x29   : > { %2824 = vmatprep.mubr.msk.bf16.mxu0 %vm3431_vm0, %v3430_v1  ;;  %2818 = vmatprep.subr.bf16.mxu0 %v3430_v1 }
  0x2a   : > { %2921 = vmatmul.mubr.msk.bf16.vlgmr.msra.gmra.mrb[0].mxu1 %vm225_vm1, %v3366_v13  ;;  %v722_v13 = vld [vmem:[%s3495_s23] sm:$0xc] }
  0x2b   : > { %2925 = vmatpush3.bf16.msra.mxu1 %v3565_v24  ;;  %2932 = vmatprep.mubr.msk.bf16.mxu1 %vm3431_vm0, %v3430_v1  ;;  %v2513_v21 = vcombine.low %v722_v13, %v3499_v5  ;;  %v862_v13 = vor.u32 %v861_v63, %v858_v61 }
  0x2c   : > { %2926 = vmatprep.subr.bf16.mxu1 %v3430_v1  ;;  %2819 = vmatpush3.bf16.msra.mxu0 %v3576_v26 }
  0x2d   : > { %2820 = vmatprep.subr.bf16.mxu0 %v3430_v1  ;;  %v741_v31 = vshrl.u32 %v2513_v21, 16  ;;  %v744_v32 = vshll.u32 %v2513_v21, 16  ;;  %v3839_v21 = vld [vmem:[%s4178_s1 + $0xe8] sm:$0xff]  }
  0x2f   : > { %2927 = vmatpush3.bf16.msra.mxu1 %v3576_v26  ;;  %v743_v51 = vrot.slane %v741_v31, 2  ;;  %v746_v52 = vrot.slane %v744_v32, 3  ;;  %v3855_v31 = vld [vmem:[%s4178_s1 + $0xf0] sm:$0xff]  }
  0x30   : > { %2928 = vmatprep.subr.bf16.mxu1 %v3430_v1  ;;  %2821 = vmatpush3.bf16.msra.mxu0 %v3591_v29 }
  0x31   : > { %2822 = vmatprep.subr.bf16.mxu0 %v3430_v1  ;;  %v747_v8 = vor.u32 %v746_v52, %v743_v51  ;;  %v2572_v51 = vcombine.low %v2571_v46, %v3558_v22  ;;  %v3915_v52 = vld [vmem:[%s4178_s1 + $0x118] sm:$0xff]  }
  0x33   : > { %2929 = vmatpush3.bf16.msra.mxu1 %v3591_v29  ;;  %v3820_v14 = vsel %vm739_vm3, %v747_v8, %v755_v10  ;;  %v1428_v53 = vrot.slane %v2572_v51, 3  ;;  %v2553_v8 = vld [vmem:[%s4179_s2 + $0x1] ss:$0 sm:$0xff] }
  0x34   : > { %2930 = vmatprep.subr.bf16.mxu1 %v3430_v1  ;;  %2823 = vmatpush3.bf16.msra.mxu0 %v3600_v33 }
  0x35   : > { %2828 = vmatprep.subr.bf16.mxu0 %v3430_v1  ;;  %v3925_v22 = vsel %vm947_vm4, %v1428_v53, %v1429_v55 }
  0x37   : > { %2931 = vmatpush3.bf16.msra.mxu1 %v3600_v33  ;;  %2825 = vmatmul.mubr.msk.bf16.vlgmr.msra.gmra.mrb[0].mxu0 %vm225_vm1, %v375_v17  ;;  %v3763_v17 = vld [vmem:[%s4178_s1 + $0xc0] sm:$0xff]  }
  0x38   : > { %2936 = vmatprep.subr.bf16.mxu1 %v3430_v1  ;;  %2829 = vmatpush3.bf16.msra.mxu0 %v3609_v36 }
  0x39   : > { %2836 = vmatprep.mubr.msk.bf16.mxu0 %vm3431_vm0, %v3430_v1  ;;  %2830 = vmatprep.subr.bf16.mxu0 %v3430_v1 }
  0x3a   : > { %2933 = vmatmul.mubr.msk.bf16.vlgmr.msra.gmra.mrb[0].mxu1 %vm225_vm1, %v1136_v37  ;;  %v848_v37 = vshrl.u32 %v2531_v27, 16  ;;  %v934_v27 = vld [vmem:[%s3495_s23] sm:$0x8] }
  0x3b   : > { %2937 = vmatpush3.bf16.msra.mxu1 %v3609_v36  ;;  %2944 = vmatprep.mubr.msk.bf16.mxu1 %vm3431_vm0, %v3430_v1  ;;  %v2546_v32 = vcombine.low %v934_v27, %v3499_v5  ;;  %v3875_v5 = vld [vmem:[%s4178_s1 + $0x100] sm:$0xff]  }
  0x3c   : > { %2938 = vmatprep.subr.bf16.mxu1 %v3430_v1  ;;  %2831 = vmatpush3.bf16.msra.mxu0 %v3620_v38  ;;  %v850_v56 = vrot.slane %v848_v37, 2  ;;  %v949_v37 = vrot.slane %v3767_v23, 3  ;;  %v3889_v23 = vld [vmem:[%s4178_s1 + $0x108] sm:$0xff]  }
  0x3d   : > { %2832 = vmatprep.subr.bf16.mxu0 %v3430_v1  ;;  %v948_v35 = vrot.slane %v2546_v32, 3 }
  0x3e   : > { %v854_v11 = vor.u32 %v853_v57, %v850_v56  ;;  %v2601_v56 = vld [vmem:[%s3495_s23 + $0x30] sm:$0x8] }
  0x3f   : > { %2939 = vmatpush3.bf16.msra.mxu1 %v3620_v38  ;;  %v3880_v42 = vsel %vm947_vm4, %v948_v35, %v949_v37  ;;  %v2602_v57 = vcombine.low %v2601_v56, %v3706_v58 }
  0x40   : > { %2940 = vmatprep.subr.bf16.mxu1 %v3430_v1  ;;  %2833 = vmatpush3.bf16.msra.mxu0 %v3634_v39  ;;  %v3830_v16 = vsel %vm739_vm3, %v854_v11, %v862_v13 }
  0x41   : > { %2834 = vmatprep.subr.bf16.mxu0 %v3430_v1  ;;  %v2286_v61 = vrot.slane %v2602_v57, 3 }
  0x43   : > { %2941 = vmatpush3.bf16.msra.mxu1 %v3634_v39 }
  0x44   : > { %2942 = vmatprep.subr.bf16.mxu1 %v3430_v1  ;;  %2835 = vmatpush3.bf16.msra.mxu0 %v3643_v40 }
  0x45   : > { %2840 = vmatprep.subr.bf16.mxu0 %v3430_v1 }
  0x47   : > { %2943 = vmatpush3.bf16.msra.mxu1 %v3643_v40  ;;  %2837 = vmatmul.mubr.msk.bf16.vlgmr.msra.gmra.mrb[0].mxu0 %vm225_vm1, %v3649_v41 }
  0x48   : > { %2948 = vmatprep.subr.bf16.mxu1 %v3430_v1  ;;  %2841 = vmatpush3.bf16.msra.mxu0 %v3659_v44 }
  0x49   : > { %2848 = vmatprep.mubr.msk.bf16.mxu0 %vm3431_vm0, %v3430_v1  ;;  %2842 = vmatprep.subr.bf16.mxu0 %v3430_v1 }
  0x4a   : > { %2945 = vmatmul.mubr.msk.bf16.vlgmr.msra.gmra.mrb[0].mxu1 %vm225_vm1, %v3663_v45 }
  0x4b   : > { %2949 = vmatpush3.bf16.msra.mxu1 %v3659_v44  ;;  %2956 = vmatprep.mubr.msk.bf16.mxu1 %vm3431_vm0, %v3430_v1 }
  0x4c   : > { %2950 = vmatprep.subr.bf16.mxu1 %v3430_v1  ;;  %2843 = vmatpush3.bf16.msra.mxu0 %v3674_v47 }
  0x4d   : > { %2844 = vmatprep.subr.bf16.mxu0 %v3430_v1 }
  0x4f   : > { %2951 = vmatpush3.bf16.msra.mxu1 %v3674_v47 }
  0x50   : > { %2952 = vmatprep.subr.bf16.mxu1 %v3430_v1  ;;  %2845 = vmatpush3.bf16.msra.mxu0 %v3690_v50 }
  0x51   : > { %2846 = vmatprep.subr.bf16.mxu0 %v3430_v1 }
  0x53   : > { %2953 = vmatpush3.bf16.msra.mxu1 %v3690_v50 }
  0x54   : > { %2954 = vmatprep.subr.bf16.mxu1 %v3430_v1  ;;  %2847 = vmatpush3.bf16.msra.mxu0 %v3699_v54 }
  0x55   : > { %2852 = vmatprep.subr.bf16.mxu0 %v3430_v1 }
  0x57   : > { %2955 = vmatpush3.bf16.msra.mxu1 %v3699_v54  ;;  %2849 = vmatmul.mubr.msk.bf16.vlgmr.msra.gmra.mrb[0].mxu0 %vm225_vm1, %v3663_v45 }
  0x58   : > { %2960 = vmatprep.subr.bf16.mxu1 %v3430_v1  ;;  %2853 = vmatpush3.bf16.msra.mxu0 %v3712_v59 }
  0x59   : > { %2860 = vmatprep.mubr.msk.bf16.mxu0 %vm3431_vm0, %v3430_v1  ;;  %2854 = vmatprep.subr.bf16.mxu0 %v3430_v1 }
  0x5a   : > { %2957 = vmatmul.mubr.msk.bf16.vlgmr.msra.gmra.mrb[0].mxu1 %vm225_vm1, %v3717_v60 }
  0x5b   : > { %2961 = vmatpush3.bf16.msra.mxu1 %v3712_v59  ;;  %2968 = vmatprep.mubr.msk.bf16.mxu1 %vm3431_vm0, %v3430_v1 }
  0x5c   : > { %2962 = vmatprep.subr.bf16.mxu1 %v3430_v1  ;;  %2855 = vmatpush3.bf16.msra.mxu0 %v3727_v62 }
  0x5d   : > { %2856 = vmatprep.subr.bf16.mxu0 %v3430_v1 }
  0x5f   : > { %2963 = vmatpush3.bf16.msra.mxu1 %v3727_v62 }
  0x60   : > { %2964 = vmatprep.subr.bf16.mxu1 %v3430_v1  ;;  %2857 = vmatpush3.bf16.msra.mxu0 %v3743_v7 }
  0x61   : > { %2858 = vmatprep.subr.bf16.mxu0 %v3430_v1 }
  0x63   : > { %2965 = vmatpush3.bf16.msra.mxu1 %v3743_v7 }
  0x64   : > { %2966 = vmatprep.subr.bf16.mxu1 %v3430_v1  ;;  %2859 = vmatpush3.bf16.msra.mxu0 %v3752_v12 }
  0x65   : > { %2864 = vmatprep.subr.bf16.mxu0 %v3430_v1 }
  0x67   : > { %2967 = vmatpush3.bf16.msra.mxu1 %v3752_v12  ;;  %2861 = vmatmul.mubr.msk.bf16.vlgmr.msra.gmra.mrb[0].mxu0 %vm225_vm1, %v3717_v60 }
  0x68   : > { %2972 = vmatprep.subr.bf16.mxu1 %v3430_v1  ;;  %2865 = vmatpush3.bf16.msra.mxu0 %v3763_v17 }
  0x69   : > { %2872 = vmatprep.mubr.msk.bf16.mxu0 %vm3431_vm0, %v3430_v1  ;;  %2866 = vmatprep.subr.bf16.mxu0 %v3430_v1 }
  0x6a   : > { %2969 = vmatmul.mubr.msk.bf16.vlgmr.msra.gmra.mrb[0].mxu1 %vm225_vm1, %v3772_v25 }
  0x6b   : > { %2973 = vmatpush3.bf16.msra.mxu1 %v3763_v17  ;;  %2980 = vmatprep.mubr.msk.bf16.mxu1 %vm3431_vm0, %v3430_v1 }
  0x6c   : > { %2974 = vmatprep.subr.bf16.mxu1 %v3430_v1  ;;  %2867 = vmatpush3.bf16.msra.mxu0 %v3785_v30 }
  0x6d   : > { %2868 = vmatprep.subr.bf16.mxu0 %v3430_v1 }
  0x6f   : > { %2975 = vmatpush3.bf16.msra.mxu1 %v3785_v30 }
  0x70   : > { %2976 = vmatprep.subr.bf16.mxu1 %v3430_v1  ;;  %2869 = vmatpush3.bf16.msra.mxu0 %v3804_v49 }
  0x71   : > { %2870 = vmatprep.subr.bf16.mxu0 %v3430_v1 }
  0x73   : > { %2977 = vmatpush3.bf16.msra.mxu1 %v3804_v49 }
  0x74   : > { %2978 = vmatprep.subr.bf16.mxu1 %v3430_v1  ;;  %2871 = vmatpush3.bf16.msra.mxu0 %v3813_v4 }
  0x75   : > { %2876 = vmatprep.subr.bf16.mxu0 %v3430_v1 }
  0x77   : > { %2979 = vmatpush3.bf16.msra.mxu1 %v3813_v4  ;;  %2873 = vmatmul.mubr.msk.bf16.vlgmr.msra.gmra.mrb[0].mxu0 %vm225_vm1, %v3820_v14 }
  0x78   : > { %2984 = vmatprep.subr.bf16.mxu1 %v3430_v1  ;;  %2877 = vmatpush3.bf16.msra.mxu0 %v3825_v15 }
  0x79   : > { %2884 = vmatprep.mubr.msk.bf16.mxu0 %vm3431_vm0, %v3430_v1  ;;  %2878 = vmatprep.subr.bf16.mxu0 %v3430_v1 }
  0x7a   : > { %2981 = vmatmul.mubr.msk.bf16.vlgmr.msra.gmra.mrb[0].mxu1 %vm225_vm1, %v3830_v16 }
  0x7b   : > { %2985 = vmatpush3.bf16.msra.mxu1 %v3825_v15  ;;  %2992 = vmatprep.mubr.msk.bf16.mxu1 %vm3431_vm0, %v3430_v1 }
  0x7c   : > { %2986 = vmatprep.subr.bf16.mxu1 %v3430_v1  ;;  %2879 = vmatpush3.bf16.msra.mxu0 %v3839_v21 }
  0x7d   : > { %2880 = vmatprep.subr.bf16.mxu0 %v3430_v1 }
  0x7f   : > { %2987 = vmatpush3.bf16.msra.mxu1 %v3839_v21 }
  0x80   : > { %2988 = vmatprep.subr.bf16.mxu1 %v3430_v1  ;;  %2881 = vmatpush3.bf16.msra.mxu0 %v3855_v31 }
  0x81   : > { %2882 = vmatprep.subr.bf16.mxu0 %v3430_v1 }
  0x83   : > { %2989 = vmatpush3.bf16.msra.mxu1 %v3855_v31 }
  0x84   : > { %2990 = vmatprep.subr.bf16.mxu1 %v3430_v1  ;;  %2883 = vmatpush3.bf16.msra.mxu0 %v3865_v34 }
  0x85   : > { %2888 = vmatprep.subr.bf16.mxu0 %v3430_v1 }
  0x87   : > { %2991 = vmatpush3.bf16.msra.mxu1 %v3865_v34  ;;  %2885 = vmatmul.mubr.msk.bf16.vlgmr.msra.gmra.mrb[0].mxu0 %vm225_vm1, %v3830_v16 }
  0x88   : > { %2996 = vmatprep.subr.bf16.mxu1 %v3430_v1  ;;  %2889 = vmatpush3.bf16.msra.mxu0 %v3875_v5 }
  0x89   : > { %2896 = vmatprep.mubr.msk.bf16.mxu0 %vm3431_vm0, %v3430_v1  ;;  %2890 = vmatprep.subr.bf16.mxu0 %v3430_v1 }
  0x8a   : > { %2993 = vmatmul.mubr.msk.bf16.vlgmr.msra.gmra.mrb[0].mxu1 %vm225_vm1, %v3880_v42 }
  0x8b   : > { %2997 = vmatpush3.bf16.msra.mxu1 %v3875_v5  ;;  %3004 = vmatprep.mubr.msk.bf16.mxu1 %vm3431_vm0, %v3430_v1 }
  0x8c   : > { %2998 = vmatprep.subr.bf16.mxu1 %v3430_v1  ;;  %2891 = vmatpush3.bf16.msra.mxu0 %v3889_v23 }
  0x8d   : > { %2892 = vmatprep.subr.bf16.mxu0 %v3430_v1 }
  0x8f   : > { %2999 = vmatpush3.bf16.msra.mxu1 %v3889_v23 }
  0x90   : > { %3000 = vmatprep.subr.bf16.mxu1 %v3430_v1  ;;  %2893 = vmatpush3.bf16.msra.mxu0 %v3905_v48 }
  0x91   : > { %2894 = vmatprep.subr.bf16.mxu0 %v3430_v1 }
  0x93   : > { %3001 = vmatpush3.bf16.msra.mxu1 %v3905_v48 }
  0x94   : > { %3002 = vmatprep.subr.bf16.mxu1 %v3430_v1  ;;  %2895 = vmatpush3.bf16.msra.mxu0 %v3915_v52 }
  0x95   : > { %3008 = vmatprep.subr.bf16.mxu0 %v3430_v1 }
  0x97   : > { %3003 = vmatpush3.bf16.msra.mxu1 %v3915_v52  ;;  %2897 = vmatmul.mubr.msk.bf16.vlgmr.msra.gmra.mrb[0].mxu0 %vm225_vm1, %v3880_v42 }
  0x98   : > { %3116 = vmatprep.subr.bf16.mxu1 %v3430_v1  ;;  %3009 = vmatpush3.bf16.msra.mxu0 %v3463_v0 }
  0x99   : > { %3016 = vmatprep.mubr.msk.bf16.mxu0 %vm3431_vm0, %v3430_v1  ;;  %3010 = vmatprep.subr.bf16.mxu0 %v3430_v1 }
  0x9a   : > { %3005 = vmatmul.mubr.msk.bf16.vlgmr.msra.gmra.mrb[0].mxu1 %vm225_vm1, %v3925_v22 }
  0x9b   : > { %3117 = vmatpush3.bf16.msra.mxu1 %v3463_v0  ;;  %3124 = vmatprep.mubr.msk.bf16.mxu1 %vm3431_vm0, %v3430_v1  ;;  %v2580_v0 = vld [vmem:[%s3495_s23 + $0x20] sm:$0xc] }
  0x9c   : > { %3118 = vmatprep.subr.bf16.mxu1 %v3430_v1  ;;  %3011 = vmatpush3.bf16.msra.mxu0 %v3472_v2 }
  0x9d   : > { %3012 = vmatprep.subr.bf16.mxu0 %v3430_v1 }
  0x9f   : > { %3119 = vmatpush3.bf16.msra.mxu1 %v3472_v2  ;;  %v2585_v2 = vld [vmem:[%s3495_s23 + $0x30] sm:$0xc] }
  0xa0   : > { %3120 = vmatprep.subr.bf16.mxu1 %v3430_v1  ;;  %3013 = vmatpush3.bf16.msra.mxu0 %v3487_v3 }
  0xa1   : > { %3014 = vmatprep.subr.bf16.mxu0 %v3430_v1 }
  0xa3   : > { %3121 = vmatpush3.bf16.msra.mxu1 %v3487_v3  ;;  %v2582_v3 = vcombine.low %v2580_v0, %v3653_v43 }
  0xa4   : > { %3122 = vmatprep.subr.bf16.mxu1 %v3430_v1  ;;  %3015 = vmatpush3.bf16.msra.mxu0 %v3506_v6 }
  0xa5   : > { %3020 = vmatprep.subr.bf16.mxu0 %v3430_v1 }
  0xa7   : > { %3123 = vmatpush3.bf16.msra.mxu1 %v3506_v6  ;;  %3017 = vmatmul.mubr.msk.bf16.vlgmr.msra.gmra.mrb[4].mxu0 %vm225_vm1, %v3663_v45  ;;  %v4073_v6 = vld [vmem:[%s3495_s23 + $0x28] ss:$0 sps:$4 sm:$0x77]  }
  0xa8   : > { %3128 = vmatprep.subr.bf16.mxu1 %v3430_v1  ;;  %3021 = vmatpush3.bf16.msra.mxu0 %v3515_v9 }
  0xa9   : > { %3028 = vmatprep.mubr.msk.bf16.mxu0 %vm3431_vm0, %v3430_v1  ;;  %3022 = vmatprep.subr.bf16.mxu0 %v3430_v1 }
  0xaa   : > { %3125 = vmatmul.mubr.msk.bf16.vlgmr.msra.gmra.mrb[4].mxu1 %vm225_vm1, %v3717_v60 }
  0xab   : > { %3129 = vmatpush3.bf16.msra.mxu1 %v3515_v9  ;;  %3136 = vmatprep.mubr.msk.bf16.mxu1 %vm3431_vm0, %v3430_v1  ;;  %v2587_v9 = vcombine.low %v2585_v2, %v3706_v58  ;;  %v2552_v58 = vld [vmem:[%s4179_s2] ss:$0 sm:$0xff] }
  0xac   : > { %3130 = vmatprep.subr.bf16.mxu1 %v3430_v1  ;;  %3023 = vmatpush3.bf16.msra.mxu0 %v3528_v18 }
  0xad   : > { %3024 = vmatprep.subr.bf16.mxu0 %v3430_v1 }
  0xaf   : > { %3131 = vmatpush3.bf16.msra.mxu1 %v3528_v18  ;;  %v4079_v18 = vld [vmem:[%s3495_s23 + $0x38] ss:$0 sps:$4 sm:$0x77]  }
  0xb0   : > { %3132 = vmatprep.subr.bf16.mxu1 %v3430_v1  ;;  %3025 = vmatpush3.bf16.msra.mxu0 %v3542_v19  ;;  %v2287_v63 = vrot.slane %v4079_v18, 3 }
  0xb1   : > { %3026 = vmatprep.subr.bf16.mxu0 %v3430_v1 }
  0xb3   : > { %3133 = vmatpush3.bf16.msra.mxu1 %v3542_v19  ;;  %v1748_v19 = vshrl.u32 %v2582_v3, 16 }
  0xb4   : > { %3134 = vmatprep.subr.bf16.mxu1 %v3430_v1  ;;  %3027 = vmatpush3.bf16.msra.mxu0 %v3551_v20 }
  0xb5   : > { %3032 = vmatprep.subr.bf16.mxu0 %v3430_v1 }
  0xb7   : > { %3135 = vmatpush3.bf16.msra.mxu1 %v3551_v20  ;;  %3029 = vmatmul.mubr.msk.bf16.vlgmr.msra.gmra.mrb[4].mxu0 %vm225_vm1, %v3649_v41  ;;  %v1751_v20 = vshll.u32 %v2582_v3, 16 }
  0xb8   : > { %3140 = vmatprep.subr.bf16.mxu1 %v3430_v1  ;;  %3033 = vmatpush3.bf16.msra.mxu0 %v3565_v24 }
  0xb9   : > { %3040 = vmatprep.mubr.msk.bf16.mxu0 %vm3431_vm0, %v3430_v1  ;;  %3034 = vmatprep.subr.bf16.mxu0 %v3430_v1 }
  0xba   : > { %3137 = vmatmul.mubr.msk.bf16.vlgmr.msra.gmra.mrb[4].mxu1 %vm225_vm1, %v3663_v45 }
  0xbb   : > { %3141 = vmatpush3.bf16.msra.mxu1 %v3565_v24  ;;  %3148 = vmatprep.mubr.msk.bf16.mxu1 %vm3431_vm0, %v3430_v1  ;;  %v1756_v24 = vshrl.u32 %v4073_v6, 16 }
  0xbc   : > { %3142 = vmatprep.subr.bf16.mxu1 %v3430_v1  ;;  %3035 = vmatpush3.bf16.msra.mxu0 %v3576_v26 }
  0xbd   : > { %3036 = vmatprep.subr.bf16.mxu0 %v3430_v1  ;;  %v1758_v41 = vrot.slane %v1756_v24, 2 }
  0xbf   : > { %3143 = vmatpush3.bf16.msra.mxu1 %v3576_v26  ;;  %v1759_v26 = vshll.u32 %v4073_v6, 16 }
  0xc0   : > { %3144 = vmatprep.subr.bf16.mxu1 %v3430_v1  ;;  %3037 = vmatpush3.bf16.msra.mxu0 %v3591_v29 }
  0xc1   : > { %3038 = vmatprep.subr.bf16.mxu0 %v3430_v1 }
  0xc3   : > { %3145 = vmatpush3.bf16.msra.mxu1 %v3591_v29  ;;  %v1819_v29 = vshrl.u32 %v2587_v9, 16 }
  0xc4   : > { %3146 = vmatprep.subr.bf16.mxu1 %v3430_v1  ;;  %3039 = vmatpush3.bf16.msra.mxu0 %v3600_v33 }
  0xc5   : > { %3044 = vmatprep.subr.bf16.mxu0 %v3430_v1  ;;  %v1821_v45 = vrot.slane %v1819_v29, 2 }
  0xc7   : > { %3147 = vmatpush3.bf16.msra.mxu1 %v3600_v33  ;;  %3041 = vmatmul.mubr.msk.bf16.vlgmr.msra.gmra.mrb[4].mxu0 %vm225_vm1, %v3717_v60  ;;  %v1822_v33 = vshll.u32 %v2587_v9, 16 }
  0xc8   : > { %3152 = vmatprep.subr.bf16.mxu1 %v3430_v1  ;;  %3045 = vmatpush3.bf16.msra.mxu0 %v3609_v36 }
  0xc9   : > { %3052 = vmatprep.mubr.msk.bf16.mxu0 %vm3431_vm0, %v3430_v1  ;;  %3046 = vmatprep.subr.bf16.mxu0 %v3430_v1 }
  0xca   : > { %3149 = vmatmul.mubr.msk.bf16.vlgmr.msra.gmra.mrb[4].mxu1 %vm225_vm1, %v3772_v25  ;;  %v2590_v25 = vld [vmem:[%s3495_s23 + $0x20] sm:$0x8] }
  0xcb   : > { %3153 = vmatpush3.bf16.msra.mxu1 %v3609_v36  ;;  %3160 = vmatprep.mubr.msk.bf16.mxu1 %vm3431_vm0, %v3430_v1  ;;  %v1827_v36 = vshrl.u32 %v4079_v18, 16  ;;  %v2591_v28 = vcombine.low %v2590_v25, %v3653_v43 }
  0xcc   : > { %3154 = vmatprep.subr.bf16.mxu1 %v3430_v1  ;;  %3047 = vmatpush3.bf16.msra.mxu0 %v3620_v38 }
  0xcd   : > { %3048 = vmatprep.subr.bf16.mxu0 %v3430_v1 }
  0xcf   : > { %3155 = vmatpush3.bf16.msra.mxu1 %v3620_v38  ;;  %v1830_v38 = vshll.u32 %v4079_v18, 16 }
  0xd0   : > { %3156 = vmatprep.subr.bf16.mxu1 %v3430_v1  ;;  %3049 = vmatpush3.bf16.msra.mxu0 %v3634_v39 }
  0xd1   : > { %3050 = vmatprep.subr.bf16.mxu0 %v3430_v1 }
  0xd3   : > { %3157 = vmatpush3.bf16.msra.mxu1 %v3634_v39  ;;  %v1750_v39 = vrot.slane %v1748_v19, 2 }
  0xd4   : > { %3158 = vmatprep.subr.bf16.mxu1 %v3430_v1  ;;  %3051 = vmatpush3.bf16.msra.mxu0 %v3643_v40 }
  0xd5   : > { %3056 = vmatprep.subr.bf16.mxu0 %v3430_v1 }
  0xd7   : > { %3159 = vmatpush3.bf16.msra.mxu1 %v3643_v40  ;;  %3053 = vmatmul.mubr.msk.bf16.vlgmr.msra.gmra.mrb[4].mxu0 %vm225_vm1, %v3820_v14  ;;  %v1753_v40 = vrot.slane %v1751_v20, 3 }
  0xd8   : > { %3164 = vmatprep.subr.bf16.mxu1 %v3430_v1  ;;  %3057 = vmatpush3.bf16.msra.mxu0 %v3659_v44 }
  0xd9   : > { %3064 = vmatprep.mubr.msk.bf16.mxu0 %vm3431_vm0, %v3430_v1  ;;  %3058 = vmatprep.subr.bf16.mxu0 %v3430_v1 }
  0xda   : > { %3161 = vmatmul.mubr.msk.bf16.vlgmr.msra.gmra.mrb[4].mxu1 %vm225_vm1, %v3830_v16 }
  0xdb   : > { %3165 = vmatpush3.bf16.msra.mxu1 %v3659_v44  ;;  %3172 = vmatprep.mubr.msk.bf16.mxu1 %vm3431_vm0, %v3430_v1  ;;  %v1761_v44 = vrot.slane %v1759_v26, 3 }
  0xdc   : > { %3166 = vmatprep.subr.bf16.mxu1 %v3430_v1  ;;  %3059 = vmatpush3.bf16.msra.mxu0 %v3674_v47 }
  0xdd   : > { %3060 = vmatprep.subr.bf16.mxu0 %v3430_v1  ;;  %v1762_v60 = vor.u32 %v1761_v44, %v1758_v41 }
  0xdf   : > { %3167 = vmatpush3.bf16.msra.mxu1 %v3674_v47  ;;  %v1824_v47 = vrot.slane %v1822_v33, 3 }
  0xe0   : > { %3168 = vmatprep.subr.bf16.mxu1 %v3430_v1  ;;  %3061 = vmatpush3.bf16.msra.mxu0 %v3690_v50 }
  0xe1   : > { %3062 = vmatprep.subr.bf16.mxu0 %v3430_v1 }
  0xe3   : > { %3169 = vmatpush3.bf16.msra.mxu1 %v3690_v50  ;;  %v1829_v50 = vrot.slane %v1827_v36, 2 }
  0xe4   : > { %3170 = vmatprep.subr.bf16.mxu1 %v3430_v1  ;;  %3063 = vmatpush3.bf16.msra.mxu0 %v3699_v54 }
  0xe5   : > { %3068 = vmatprep.subr.bf16.mxu0 %v3430_v1 }
  0xe7   : > { %3171 = vmatpush3.bf16.msra.mxu1 %v3699_v54  ;;  %3065 = vmatmul.mubr.msk.bf16.vlgmr.msra.gmra.mrb[4].mxu0 %vm225_vm1, %v3830_v16  ;;  %v1832_v54 = vrot.slane %v1830_v38, 3 }
  0xe8   : > { %3176 = vmatprep.subr.bf16.mxu1 %v3430_v1  ;;  %3069 = vmatpush3.bf16.msra.mxu0 %v3712_v59 }
  0xe9   : > { %3076 = vmatprep.mubr.msk.bf16.mxu0 %vm3431_vm0, %v3430_v1  ;;  %3070 = vmatprep.subr.bf16.mxu0 %v3430_v1 }
  0xea   : > { %3173 = vmatmul.mubr.msk.bf16.vlgmr.msra.gmra.mrb[4].mxu1 %vm225_vm1, %v3880_v42 }
  0xeb   : > { %3177 = vmatpush3.bf16.msra.mxu1 %v3712_v59  ;;  %3184 = vmatprep.mubr.msk.bf16.mxu1 %vm3431_vm0, %v3430_v1  ;;  %v1754_v59 = vor.u32 %v1753_v40, %v1750_v39 }
  0xec   : > { %3178 = vmatprep.subr.bf16.mxu1 %v3430_v1  ;;  %3071 = vmatpush3.bf16.msra.mxu0 %v3727_v62 }
  0xed   : > { %3072 = vmatprep.subr.bf16.mxu0 %v3430_v1 }
  0xef   : > { %3179 = vmatpush3.bf16.msra.mxu1 %v3727_v62  ;;  %v1825_v62 = vor.u32 %v1824_v47, %v1821_v45 }
  0xf0   : > { %3180 = vmatprep.subr.bf16.mxu1 %v3430_v1  ;;  %3073 = vmatpush3.bf16.msra.mxu0 %v3743_v7 }
  0xf1   : > { %3074 = vmatprep.subr.bf16.mxu0 %v3430_v1 }
  0xf3   : > { %3181 = vmatpush3.bf16.msra.mxu1 %v3743_v7  ;;  %v1833_v7 = vor.u32 %v1832_v54, %v1829_v50 }
  0xf4   : > { %3182 = vmatprep.subr.bf16.mxu1 %v3430_v1  ;;  %3075 = vmatpush3.bf16.msra.mxu0 %v3752_v12 }
  0xf5   : > { %3080 = vmatprep.subr.bf16.mxu0 %v3430_v1 }
  0xf7   : > { %3183 = vmatpush3.bf16.msra.mxu1 %v3752_v12  ;;  %3077 = vmatmul.mubr.msk.bf16.vlgmr.msra.gmra.mrb[4].mxu0 %vm225_vm1, %v3880_v42  ;;  %v1763_v12 = vsel %vm739_vm3, %v1754_v59, %v1762_v60 }
  0xf8   : > { %3188 = vmatprep.subr.bf16.mxu1 %v3430_v1  ;;  %3081 = vmatpush3.bf16.msra.mxu0 %v3763_v17 }
  0xf9   : > { %3088 = vmatprep.mubr.msk.bf16.mxu0 %vm3431_vm0, %v3430_v1  ;;  %3082 = vmatprep.subr.bf16.mxu0 %v3430_v1 }
  0xfa   : > { %3185 = vmatmul.mubr.msk.bf16.vlgmr.msra.gmra.mrb[4].mxu1 %vm225_vm1, %v3925_v22 }
  0xfb   : > { %3189 = vmatpush3.bf16.msra.mxu1 %v3763_v17  ;;  %3196 = vmatprep.mubr.msk.bf16.mxu1 %vm3431_vm0, %v3430_v1  ;;  %v1834_v17 = vsel %vm739_vm3, %v1825_v62, %v1833_v7 }
  0xfc   : > { %3190 = vmatprep.subr.bf16.mxu1 %v3430_v1  ;;  %3083 = vmatpush3.bf16.msra.mxu0 %v3785_v30 }
  0xfd   : > { %3084 = vmatprep.subr.bf16.mxu0 %v3430_v1 }
  0xff   : > { %3191 = vmatpush3.bf16.msra.mxu1 %v3785_v30  ;;  %v1885_v30 = vrot.slane %v2591_v28, 3 }
 0x100   : > { %3192 = vmatprep.subr.bf16.mxu1 %v3430_v1  ;;  %3085 = vmatpush3.bf16.msra.mxu0 %v3804_v49 }
 0x101   : > { %3086 = vmatprep.subr.bf16.mxu0 %v3430_v1 }
 0x103   : > { %3193 = vmatpush3.bf16.msra.mxu1 %v3804_v49  ;;  %v1886_v49 = vrot.slane %v4073_v6, 3 }
 0x104   : > { %3194 = vmatprep.subr.bf16.mxu1 %v3430_v1  ;;  %3087 = vmatpush3.bf16.msra.mxu0 %v3813_v4 }
 0x105   : > { %3092 = vmatprep.subr.bf16.mxu0 %v3430_v1  ;;  %v1887_v43 = vsel %vm947_vm4, %v1885_v30, %v1886_v49 }
 0x107   : > { %3195 = vmatpush3.bf16.msra.mxu1 %v3813_v4  ;;  %3089 = vmatmul.mubr.msk.bf16.vlgmr.msra.gmra.mrb[4].mxu0 %vm225_vm1, %v1763_v12  ;;  %v2288_v4 = vsel %vm947_vm4, %v2286_v61, %v2287_v63 }
 0x108   : > { %3200 = vmatprep.subr.bf16.mxu1 %v3430_v1  ;;  %3093 = vmatpush3.bf16.msra.mxu0 %v3825_v15 }
 0x109   : > { %3100 = vmatprep.mubr.msk.bf16.mxu0 %vm3431_vm0, %v3430_v1  ;;  %3094 = vmatprep.subr.bf16.mxu0 %v3430_v1 }
 0x10a   : > { %3197 = vmatmul.mubr.msk.bf16.vlgmr.msra.gmra.mrb[4].mxu1 %vm225_vm1, %v1834_v17 }
 0x10b   : > { %3201 = vmatpush3.bf16.msra.mxu1 %v3825_v15  ;;  %3208 = vmatprep.mubr.msk.bf16.mxu1 %vm3431_vm0, %v3430_v1 }
 0x10c   : > { %3202 = vmatprep.subr.bf16.mxu1 %v3430_v1  ;;  %3095 = vmatpush3.bf16.msra.mxu0 %v3839_v21 }
 0x10d   : > { %3096 = vmatprep.subr.bf16.mxu0 %v3430_v1 }
 0x10f   : > { %3203 = vmatpush3.bf16.msra.mxu1 %v3839_v21 }
 0x110   : > { %3204 = vmatprep.subr.bf16.mxu1 %v3430_v1  ;;  %3097 = vmatpush3.bf16.msra.mxu0 %v3855_v31 }
 0x111   : > { %3098 = vmatprep.subr.bf16.mxu0 %v3430_v1 }
 0x113   : > { %3205 = vmatpush3.bf16.msra.mxu1 %v3855_v31 }
 0x114   : > { %3206 = vmatprep.subr.bf16.mxu1 %v3430_v1  ;;  %3099 = vmatpush3.bf16.msra.mxu0 %v3865_v34 }
 0x115   : > { %3104 = vmatprep.subr.bf16.mxu0 %v3430_v1 }
 0x117   : > { %3207 = vmatpush3.bf16.msra.mxu1 %v3865_v34  ;;  %3101 = vmatmul.mubr.msk.bf16.vlgmr.msra.gmra.mrb[4].mxu0 %vm225_vm1, %v1834_v17 }
 0x118   : > { %3212 = vmatprep.subr.bf16.mxu1 %v3430_v1  ;;  %3105 = vmatpush3.bf16.msra.mxu0 %v3875_v5 }
 0x119   : > { %3112 = vmatprep.mubr.msk.bf16.mxu0 %vm3431_vm0, %v3430_v1  ;;  %3106 = vmatprep.subr.bf16.mxu0 %v3430_v1 }
 0x11a   : > { %3209 = vmatmul.mubr.msk.bf16.vlgmr.msra.gmra.mrb[4].mxu1 %vm225_vm1, %v1887_v43 }
 0x11b   : > { %3213 = vmatpush3.bf16.msra.mxu1 %v3875_v5  ;;  %3220 = vmatprep.mubr.msk.bf16.mxu1 %vm3431_vm0, %v3430_v1 }
 0x11c   : > { %3214 = vmatprep.subr.bf16.mxu1 %v3430_v1  ;;  %3107 = vmatpush3.bf16.msra.mxu0 %v3889_v23 }
 0x11d   : > { %3108 = vmatprep.subr.bf16.mxu0 %v3430_v1 }
 0x11f   : > { %3215 = vmatpush3.bf16.msra.mxu1 %v3889_v23 }
 0x120   : > { %3216 = vmatprep.subr.bf16.mxu1 %v3430_v1  ;;  %3109 = vmatpush3.bf16.msra.mxu0 %v3905_v48 }
 0x121   : > { %3110 = vmatprep.subr.bf16.mxu0 %v3430_v1 }
 0x123   : > { %3217 = vmatpush3.bf16.msra.mxu1 %v3905_v48 }
 0x124   : > { %3218 = vmatprep.subr.bf16.mxu1 %v3430_v1  ;;  %3111 = vmatpush3.bf16.msra.mxu0 %v3915_v52 }
 0x127   : > { %3219 = vmatpush3.bf16.msra.mxu1 %v3915_v52  ;;  %3113 = vmatmul.mubr.msk.bf16.vlgmr.msra.gmra.mrb[4].mxu0 %vm225_vm1, %v1887_v43 }
 0x12a   : > { %3221 = vmatmul.mubr.msk.bf16.vlgmr.msra.gmra.mrb[4].mxu1 %vm225_vm1, %v2288_v4 }
 0x16a   : > { %v1012_v10 = vpop.f32.mrb[0].mxu0 }
 0x16b   : > { %v1025_v1 = vmul.f32 %v2552_v58, %v1012_v10  ;;  %v2898_v11 = vpop.f32.mrb[1].mxu0 }
 0x16c   : > { %v1015_v14 = vpop.f32.mrb[2].mxu0 }
 0x16d   : > { %v1468_v13 = vpop.f32.mrb[0].mxu1  ;;  %v1031_v15 = vadd.f32 %v2553_v8, %v1025_v1  ;;  %v1026_v27 = vmul.f32 %v2552_v58, %v1015_v14  ;;  %v2899_v31 = vpop.f32.mrb[3].mxu0 }
 0x16e   : > { %v1477_v16 = vmul.f32 %v2552_v58, %v1468_v13  ;;  %v3006_v21 = vpop.f32.mrb[1].mxu1 }
 0x16f   : > { %v1471_v32 = vpop.f32.mrb[2].mxu1  ;;  %v1033_v34 = vmax.f32 %v1031_v15, 0.0  ;;  %v1032_v37 = vadd.f32 %v2553_v8, %v1026_v27 }
 0x170   : > { %v1479_v35 = vadd.f32 %v2553_v8, %v1477_v16  ;;  %v1478_v5 = vmul.f32 %v2552_v58, %v1471_v32  ;;  %v3007_v42 = vpop.f32.mrb[3].mxu1 }
 0x171   : > { %v1034_v46 = vmax.f32 %v1032_v37, 0.0 }
 0x172   : > { %v1481_v23 = vmax.f32 %v1479_v35, 0.0  ;;  %v1480_v48 = vadd.f32 %v2553_v8, %v1478_v5 }
 0x174   : > { %v1483_v51 = vmax.f32 %v1033_v34, %v1481_v23  ;;  %v1482_v52 = vmax.f32 %v1480_v48, 0.0 }
 0x176   : > { %v1484_v53 = vmax.f32 %v1034_v46, %v1482_v52 }
 0x1fa   : > { %v1925_v55 = vpop.f32.mrb[4].mxu0 }
 0x1fb   : > { %v1934_v22 = vmul.f32 %v2552_v58, %v1925_v55  ;;  %v3114_v0 = vpop.f32.mrb[5].mxu0 }
 0x1fc   : > { %v1928_v3 = vpop.f32.mrb[6].mxu0 }
 0x1fd   : > { %v2326_v2 = vpop.f32.mrb[4].mxu1  ;;  %v1936_v6 = vadd.f32 %v2553_v8, %v1934_v22  ;;  %v1935_v19 = vmul.f32 %v2552_v58, %v1928_v3  ;;  %v3115_v20 = vpop.f32.mrb[7].mxu0 }
 0x1fe   : > { %v2335_v9 = vmul.f32 %v2552_v58, %v2326_v2  ;;  %v3222_v18 = vpop.f32.mrb[5].mxu1 }
 0x1ff   : > { %v2329_v24 = vpop.f32.mrb[6].mxu1  ;;  %v1938_v26 = vmax.f32 %v1936_v6, 0.0  ;;  %v1937_v33 = vadd.f32 %v2553_v8, %v1935_v19 }
 0x200   : > { %v2337_v29 = vadd.f32 %v2553_v8, %v2335_v9  ;;  %v2336_v36 = vmul.f32 %v2552_v58, %v2329_v24  ;;  %v3223_v38 = vpop.f32.mrb[7].mxu1 }
 0x201   : > { %v1940_v39 = vmax.f32 %v1483_v51, %v1938_v26  ;;  %v1939_v41 = vmax.f32 %v1937_v33, 0.0 }
 0x202   : > { %v2339_v40 = vmax.f32 %v2337_v29, 0.0  ;;  %v2338_v44 = vadd.f32 %v2553_v8, %v2336_v36 }
 0x203   : > { %v1941_v47 = vmax.f32 %v1484_v53, %v1939_v41 }
 0x204   : > { %v2341_v45 = vmax.f32 %v1940_v39, %v2339_v40  ;;  %v2340_v50 = vmax.f32 %v2338_v44, 0.0 }
 0x206   : > { %v2610_v54 = vpack.c.bf16 %v2341_v45, %v2341_v45  ;;  %v2342_v59 = vmax.f32 %v1941_v47, %v2340_v50 }
 0x208   : > { %2352 = vst.msk [vmem:[%s170_s24] sm:$0xf] %vm2351_vm5, %v2610_v54  ;;  %v2611_v60 = vpack.c.bf16 %v2342_v59, %v2342_v59 }
 0x20a   : > { %2353 = vst.msk [vmem:[%s170_s24 + $0x4] sm:$0xf] %vm2351_vm5, %v2611_v60 }
 0x20b PF: > { %s13_s12 = sadd.s32 1, %s3428_s12  }
 0x20c   : > { %p10_p4 = scmp.ge.s32.totalorder %s13_s12, 4  }
 0x20e   :  { %12 = sbr.rel (!%p10_p4) target bundleno = 1 (0x1), region = 73 }

// kernel: net_forward.5
= control target key start
LH: loop header
LB: loop body
LE: loop exit
PB: predicated region body
PF: predicated region fallthrough
CT: control target
= control target key end

     0   :  { %s5207_s12 = smov 0   ;;  %s6013_s0 = inlined_call_operand.vmem [shape: bf16[2,1,4,72,32], index: 0, kind: input, shape index: {}]   ;;  %s6014_s1 = inlined_call_operand.vmem [shape: bf16[9,32,64], index: 1, kind: input, shape index: {}]   ;;  %s6015_s2 = inlined_call_operand.vmem [shape: f32[2,64], index: 2, kind: input, shape index: {}]   ;;  %s6016_s3 = inlined_call_operand.vmem [shape: bf16[2,1,56,64], index: 3, kind: output, shape index: {}]  }
   0x1 LB: > { %s3828_s13 = sadd.s32 4294967295, %s5185_s12   ;;  %p3832_p0 = scmp.ge.s32.totalorder %s5185_s12, 1  ;;  %s5185_s12 = sphi %s5207_s12, %s13_s12  }
   0x2   : > { %p137_p1 = scmp.lt.s32.totalorder %s5185_s12, 3 }
   0x4   : > { %p138_p2 = pnand %p3832_p0, %p137_p1 }
   0x6   : > { %141 = sbr.rel (%p138_p2) target bundleno = 538 (0x21a), region = 32 }
   0xd   : > { %v5218_v0 = vld [vmem:[%s6014_s1 + $0x10] sm:$0xff]   ;;  %p161_p3 = scmp.lt.s32.totalorder %s3828_s13, 1  ;;  %v5223_v1 = vld [vmem:[%s6014_s1 + $0x18] sm:$0xff]   ;;  %v5237_v2 = vld [vmem:[%s6014_s1] sm:$0xff]   ;;  %vm228_vm0 = vcmask 261120   ;;  %vm3765_vm2 = vcmask 519168  }
   0xe   : > { %4399 = vmatprep.subr.bf16.mxu0 %v5218_v0  ;;  %4507 = vmatprep.subr.bf16.mxu1 %v5218_v0  ;;  %v5247_v3 = vld [vmem:[%s6014_s1 + $0x8] sm:$0xff]   ;;  %vm444_vm1 = vsmask.f32 7424  ;;  %v5271_v12 = vld [vmem:[%s6014_s1 + $0x20] sm:$0xff]   ;;  %v5336_v58 = vld [vmem:[%s6014_s1 + $0x30] sm:$0xff]  }
   0xf   : > { %s6045_s13 = smov (!%p161_p3, %s3828_s13), 1  ;;  %4400 = vmatpush3.bf16.msra.mxu0 %v5218_v0  ;;  %4508 = vmatpush3.bf16.msra.mxu1 %v5218_v0  ;;  %v5324_v56 = vld [vmem:[%s6014_s1 + $0x28] sm:$0xff]  }
  0x10   : > { %4401 = vmatprep.subr.bf16.mxu0 %v5223_v1  ;;  %s5087_s18 = smul.u32 144, %s6045_s13  ;;  %4509 = vmatprep.subr.bf16.mxu1 %v5223_v1 }
  0x11   : > { %s5088_s6 = smul.u32 28, %s6045_s13 }
  0x12   : > { %s5242_s23 = scalar_lea.vmem %s6013_s0, %s5087_s18 }
  0x13   : > { %4402 = vmatpush3.bf16.msra.mxu0 %v5223_v1  ;;  %v5251_v4 = vld [vmem:[%s5242_s23 + $0x24] sm:$0xff]   ;;  %4510 = vmatpush3.bf16.msra.mxu1 %v5223_v1  ;;  %v5255_v5 = vld [vmem:[%s5242_s23 + $0x2c] sm:$0xff]   ;;  %v411_v6 = vld [vmem:[%s5242_s23] sm:$0xf]  ;;  %s5988_s8 = scalar_lea.vmem %s6016_s3, %s5088_s6 }
  0x14   : > { %4411 = vmatprep.subr.bf16.mxu0 %v5237_v2  ;;  %4519 = vmatprep.subr.bf16.mxu1 %v5237_v2  ;;  %v412_v7 = vld [vmem:[%s5242_s23 + $0x4] sm:$0xf]  ;;  %v413_v8 = vld [vmem:[%s5242_s23 + $0x8] sm:$0xf]  ;;  %v414_v9 = vld [vmem:[%s5242_s23 + $0xc] sm:$0xf] }
  0x15   : > { %4403 = vmatprep.mubr.msk.bf16.mxu0 %vm228_vm0, %v5251_v4  ;;  %v415_v10 = vld [vmem:[%s5242_s23 + $0x10] sm:$0xf]  ;;  %v3870_v11 = vcombine.low %v411_v6, %v412_v7  ;;  %v5273_v13 = vcombine.low %v412_v7, %v413_v8  ;;  %v3871_v14 = vcombine.low %v413_v8, %v414_v9  ;;  %v5279_v16 = vld [vmem:[%s5242_s23 + $0x34] sm:$0xff]   ;;  %v5283_v21 = vld [vmem:[%s5242_s23 + $0x3c] ss:$0 sps:$4 sm:$0xff]  }
  0x16   : > { %4404 = vmatmul.mubr.msk.bf16.vlgmr.msra.gmra.mrb[0].mxu0 %vm228_vm0, %v5255_v5  ;;  %v5276_v15 = vcombine.low %v414_v9, %v415_v10  ;;  %v416_v17 = vld [vmem:[%s5242_s23 + $0x14] sm:$0xf]  ;;  %v417_v24 = vld [vmem:[%s5242_s23 + $0x18] sm:$0xf]  ;;  %v418_v25 = vld [vmem:[%s5242_s23 + $0x1c] sm:$0x1] }
  0x17   : > { %4412 = vmatpush3.bf16.msra.mxu0 %v5237_v2  ;;  %v446_v18 = vshrl.u32 %v3870_v11, 16  ;;  %v448_v19 = vshll.u32 %v3870_v11, 16  ;;  %v3872_v20 = vcombine.low %v415_v10, %v416_v17  ;;  %v453_v22 = vshll.u32 %v3871_v14, 16  ;;  %4407 = vmatprep.mubr.msk.bf16.mxu0 %vm228_vm0, %v5279_v16  ;;  %v5110_v31 = vld [vmem:[%s5242_s23] sm:$0xff]   ;;  %v3960_v42 = vld [vmem:[%s5242_s23 + $0x30] sm:$0xf] }
  0x18   : > { %4413 = vmatprep.subr.bf16.mxu0 %v5247_v3  ;;  %v457_v23 = vshrl.u32 %v3871_v14, 16  ;;  %v3873_v28 = vcombine.low %v417_v24, %v418_v25  ;;  %v5292_v32 = vcombine.low %v416_v17, %v417_v24  ;;  %v3961_v43 = vld [vmem:[%s5242_s23 + $0x34] sm:$0xf]  ;;  %v3958_v45 = vld [vmem:[%s5242_s23 + $0x28] sm:$0xf]  ;;  %v5374_v24 = vld [vmem:[%s6014_s1 + $0x40] sm:$0xff]  }
  0x19   : > { %v450_v26 = vrot.slane %v448_v19, 1  ;;  %v461_v27 = vshll.u32 %v3872_v20, 16  ;;  %v465_v29 = vshrl.u32 %v3872_v20, 16  ;;  %v455_v30 = vrot.slane %v453_v22, 1  ;;  %v3959_v46 = vld [vmem:[%s5242_s23 + $0x2c] sm:$0xf] }
  0x1a   : > { %v469_v35 = vshll.u32 %v3873_v28, 16  ;;  %v473_v41 = vshrl.u32 %v3873_v28, 16  ;;  %v5307_v47 = vcombine.low %v3960_v42, %v3961_v43  ;;  %v3962_v48 = vld [vmem:[%s5242_s23 + $0x38] sm:$0xf]  ;;  %v3963_v49 = vld [vmem:[%s5242_s23 + $0x3c] sm:$0xf]  ;;  %v5313_v50 = vcombine.low %v3958_v45, %v3959_v46 }
  0x1b   : > { %4414 = vmatpush3.bf16.msra.mxu0 %v5247_v3  ;;  %v451_v33 = vor.u32 %v450_v26, %v446_v18  ;;  %v463_v34 = vrot.slane %v461_v27, 1  ;;  %v459_v36 = vor.u32 %v457_v23, %v455_v30  ;;  %v5111_v51 = vld [vmem:[%s5242_s23 + $0x8] sm:$0xff]   ;;  %v5317_v52 = vcombine.low %v3962_v48, %v3963_v49  ;;  %v5113_v53 = vld [vmem:[%s5242_s23 + $0x10] sm:$0xff]   ;;  %v4003_v54 = vld [vmem:[%s5242_s23 + $0x24] sm:$0xf] }
  0x1c   : > { %4423 = vmatprep.subr.bf16.mxu0 %v5271_v12  ;;  %v471_v39 = vrot.slane %v469_v35, 1  ;;  %v4005_v57 = vcombine.low %v4003_v54, %v3958_v45  ;;  %v5114_v59 = vld [vmem:[%s5242_s23 + $0x18] ss:$0 sps:$4 sm:$0xff]   ;;  %v4006_v60 = vcombine.low %v3959_v46, %v3960_v42  ;;  %v4007_v7 = vcombine.low %v3961_v43, %v3962_v48  ;;  %v4004_v8 = vld [vmem:[%s5242_s23 + $0x40] sm:$0x1]  ;;  %v5422_v42 = vld [vmem:[%s5242_s23 + $0x6c] sm:$0xff]  }
  0x1d   : > { %v456_v37 = vsel %vm444_vm1, %v451_v33, %v455_v30  ;;  %v467_v38 = vor.u32 %v465_v29, %v463_v34  ;;  %v464_v40 = vsel %vm444_vm1, %v459_v36, %v463_v34  ;;  %v5347_v9 = vld [vmem:[%s5242_s23 + $0x54] sm:$0xf]  ;;  %v5350_v10 = vld [vmem:[%s5242_s23 + $0x58] sm:$0xf]  ;;  %v4008_v17 = vcombine.low %v3963_v49, %v4004_v8  ;;  %v5383_v26 = vld [vmem:[%s5242_s23 + $0x7c] sm:$0xf] }
  0x1e   : > { %4408 = vmatmul.mubr.msk.bf16.gmra.mrb[4].mxu0 %vm228_vm0, %v5283_v21  ;;  %4511 = vmatprep.mubr.msk.bf16.mxu1 %vm228_vm0, %v456_v37  ;;  %v475_v55 = vor.u32 %v473_v41, %v471_v39  ;;  %v1543_v61 = vshll.u32 %v4005_v57, 16  ;;  %v1541_v62 = vshrl.u32 %v4005_v57, 16  ;;  %v1548_v6 = vshll.u32 %v4006_v60, 16  ;;  %6027 = vst [vmem:[#allocation2_spill] sm:$0xff] %v5347_v9  ;;  %6028 = vst [vmem:[#allocation3_spill] sm:$0xff] %v5350_v10  ;;  %v5445_v48 = vld [vmem:[%s5242_s23 + $0x74] sm:$0xff]  }
  0x1f   : > { %4415 = vmatprep.mubr.msk.bf16.mxu0 %vm228_vm0, %v5110_v31  ;;  %4512 = vmatmul.mubr.msk.bf16.vlgmr.msra.gmra.mrb[0].mxu1 %vm228_vm0, %v464_v40  ;;  %v472_v44 = vsel %vm444_vm1, %v467_v38, %v471_v39  ;;  %v1556_v18 = vshll.u32 %v4007_v7, 16  ;;  %v1552_v19 = vshrl.u32 %v4006_v60, 16  ;;  %v1560_v20 = vshrl.u32 %v4007_v7, 16  ;;  %v5380_v25 = vld [vmem:[%s5242_s23 + $0x78] sm:$0xf] }
  0x20   : > { %4520 = vmatpush3.bf16.msra.mxu1 %v5237_v2  ;;  %4515 = vmatprep.mubr.msk.bf16.mxu1 %vm228_vm0, %v472_v44  ;;  %v1545_v63 = vrot.slane %v1543_v61, 1  ;;  %v1550_v14 = vrot.slane %v1548_v6, 1  ;;  %v1564_v22 = vshll.u32 %v4008_v17, 16  ;;  %v5388_v28 = vcombine.low %v5380_v25, %v5383_v26  ;;  %v3922_v35 = vld [vmem:[%s5242_s23 + $0x48] sm:$0xf]  ;;  %v5412_v38 = vld [vmem:[%s5242_s23 + $0x58] sm:$0xff]  }
  0x21   : > { %4521 = vmatprep.subr.bf16.mxu1 %v5247_v3  ;;  %v1558_v23 = vrot.slane %v1556_v18, 1  ;;  %v1568_v34 = vshrl.u32 %v4008_v17, 16  ;;  %v5405_v36 = vld [vmem:[%s5242_s23 + $0x4c] sm:$0xf]  ;;  %v5425_v43 = vld [vmem:[%s5242_s23 + $0x50] sm:$0xf] }
  0x22   : > { %v1546_v11 = vor.u32 %v1545_v63, %v1541_v62  ;;  %v1554_v27 = vor.u32 %v1552_v19, %v1550_v14  ;;  %6029 = vst [vmem:[#allocation4_spill] sm:$0xff] %v5388_v28  ;;  %v1566_v30 = vrot.slane %v1564_v22, 1  ;;  %v3934_v41 = vcombine.low %v3922_v35, %v5405_v36  ;;  %v5448_v49 = vld [vmem:[%s5242_s23 + $0x60] ss:$0 sps:$4 sm:$0xff]   ;;  %v5455_v54 = vld [vmem:[%s5242_s23 + $0x5c] sm:$0xf] }
  0x23   : > { %v1562_v29 = vor.u32 %v1560_v20, %v1558_v23  ;;  %v3935_v45 = vcombine.low %v5425_v43, %v5347_v9  ;;  %v3929_v60 = vld [vmem:[%s5242_s23 + $0x64] sm:$0x1]  ;;  %v3936_v61 = vcombine.low %v5350_v10, %v5455_v54  ;;  %v4021_v7 = vld [vmem:[%s5242_s23 + $0x6c] sm:$0xf]  ;;  %v5477_v8 = vld [vmem:[%s5242_s23 + $0x70] sm:$0xf] }
  0x24   : > { %4522 = vmatpush3.bf16.msra.mxu1 %v5247_v3  ;;  %v1559_v31 = vsel %vm444_vm1, %v1554_v27, %v1558_v23  ;;  %v1570_v39 = vor.u32 %v1568_v34, %v1566_v30  ;;  %v859_v46 = vshll.u32 %v3934_v41, 16  ;;  %6030 = vst [vmem:[#allocation5_spill] sm:$0xff] %v5477_v8  ;;  %v5485_v17 = vld [vmem:[%s6014_s1 + $0x58] sm:$0xff]   ;;  %v4029_v22 = vcombine.low %v4021_v7, %v5477_v8  ;;  %v5499_v23 = vld [vmem:[%s5242_s23 + $0x74] sm:$0xf] }
  0x25   : > { %4531 = vmatprep.subr.bf16.mxu1 %v5271_v12  ;;  %v1567_v33 = vsel %vm444_vm1, %v1562_v29, %v1566_v30  ;;  %v864_v57 = vshll.u32 %v3935_v45, 16  ;;  %v868_v18 = vshrl.u32 %v3935_v45, 16  ;;  %v5507_v29 = vld [vmem:[%s6014_s1 + $0x60] sm:$0xff]   ;;  %v4030_v34 = vcombine.low %v5499_v23, %v5380_v25  ;;  %v5163_v10 = vld [vmem:[%s5242_s23 + $0x38] sm:$0xff]  }
  0x26   : > { %4416 = vmatmul.mubr.msk.bf16.vlgmr.msra.gmra.mrb[0].mxu0 %vm228_vm0, %v5111_v51  ;;  %v857_v51 = vshrl.u32 %v3934_v41, 16  ;;  %v1827_v35 = vshll.u32 %v4029_v22, 16  ;;  %v5519_v41 = vld [vmem:[%s5242_s23 + $0x80] sm:$0xf]  ;;  %v5529_v25 = vld [vmem:[%s5242_s23 + $0x84] sm:$0xf] }
  0x27   : > { %4424 = vmatpush3.bf16.msra.mxu0 %v5271_v12  ;;  %4419 = vmatprep.mubr.msk.bf16.mxu0 %vm228_vm0, %v5113_v53  ;;  %v5452_v53 = vld [vmem:[%s5242_s23 + $0x7c] sm:$0xff]   ;;  %v866_v63 = vrot.slane %v864_v57, 1  ;;  %6031 = vst [vmem:[#allocation6_spill] sm:$0xff] %v5519_v41  ;;  %6032 = vst [vmem:[#allocation7_spill] sm:$0xff] %v5529_v25  ;;  %v4028_v57 = vld [vmem:[%s5242_s23 + $0x88] sm:$0x1] }
  0x28   : > { %4516 = vmatmul.mubr.msk.bf16.gmra.mrb[4].mxu1 %vm228_vm0, %v475_v55  ;;  %4425 = vmatprep.subr.bf16.mxu0 %v5324_v56  ;;  %v4032_v7 = vcombine.low %v5529_v25, %v4028_v57  ;;  %v5591_v57 = vld [vmem:[%s6014_s1 + $0x78] sm:$0xff]  }
  0x29   : > { %4523 = vmatprep.mubr.msk.bf16.mxu1 %vm228_vm0, %v5251_v4  ;;  %v870_v30 = vor.u32 %v868_v18, %v866_v63  ;;  %6033 = vst [vmem:[#allocation8_spill] sm:$0xff] %v5591_v57 }
  0x2b   : > { %4426 = vmatpush3.bf16.msra.mxu0 %v5324_v56 }
  0x2c   : > { %4435 = vmatprep.subr.bf16.mxu0 %v5336_v58 }
  0x2e   : > { %4420 = vmatmul.mubr.msk.bf16.gmra.mrb[4].mxu0 %vm228_vm0, %v5114_v59  ;;  %v5459_v59 = vld [vmem:[%s5242_s23 + $0x60] sm:$0xf] }
  0x2f   : > { %4427 = vmatprep.mubr.msk.bf16.mxu0 %vm228_vm0, %v456_v37  ;;  %v5409_v37 = vld [vmem:[%s5242_s23 + $0x50] sm:$0xff]   ;;  %v3937_v6 = vcombine.low %v5459_v59, %v3929_v60 }
  0x30   : > { %4524 = vmatmul.mubr.msk.bf16.vlgmr.msra.gmra.mrb[0].mxu1 %vm228_vm0, %v5255_v5  ;;  %v5363_v5 = vld [vmem:[%s6014_s1 + $0x38] sm:$0xff]  }
  0x31   : > { %4532 = vmatpush3.bf16.msra.mxu1 %v5271_v12  ;;  %4527 = vmatprep.mubr.msk.bf16.mxu1 %vm228_vm0, %v5279_v16  ;;  %v1551_v16 = vsel %vm444_vm1, %v1546_v11, %v1550_v14  ;;  %v5480_v11 = vld [vmem:[%s5242_s23 + $0x84] ss:$0 sps:$4 sm:$0xff]   ;;  %v872_v14 = vshll.u32 %v3936_v61, 16  ;;  %v880_v20 = vshll.u32 %v3937_v6, 16  ;;  %v884_v60 = vshrl.u32 %v3937_v6, 16  ;;  %v5546_v6 = vld [vmem:[%s6014_s1 + $0x68] sm:$0xff]  }
  0x32   : > { %4533 = vmatprep.subr.bf16.mxu1 %v5324_v56 }
  0x33   : > { %v874_v27 = vrot.slane %v872_v14, 1 }
  0x35   : > { %4534 = vmatpush3.bf16.msra.mxu1 %v5324_v56 }
  0x36   : > { %4428 = vmatmul.mubr.msk.bf16.vlgmr.msra.gmra.mrb[0].mxu0 %vm228_vm0, %v464_v40  ;;  %4543 = vmatprep.subr.bf16.mxu1 %v5336_v58  ;;  %v5417_v40 = vld [vmem:[%s6014_s1 + $0x48] sm:$0xff]  }
  0x37   : > { %4436 = vmatpush3.bf16.msra.mxu0 %v5336_v58  ;;  %4431 = vmatprep.mubr.msk.bf16.mxu0 %vm228_vm0, %v472_v44  ;;  %v5438_v44 = vld [vmem:[%s6014_s1 + $0x50] sm:$0xff]  }
  0x38   : > { %4528 = vmatmul.mubr.msk.bf16.gmra.mrb[4].mxu1 %vm228_vm0, %v5283_v21  ;;  %4437 = vmatprep.subr.bf16.mxu0 %v5363_v5  ;;  %v5392_v21 = vld [vmem:[%s5242_s23 + $0x48] sm:$0xff]  }
  0x39   : > { %4535 = vmatprep.mubr.msk.bf16.mxu1 %vm228_vm0, %v1551_v16  ;;  %v876_v16 = vshrl.u32 %v3936_v61, 16  ;;  %v4031_v61 = vcombine.low %v5383_v26, %v5519_v41  ;;  %v1836_v26 = vshrl.u32 %v4030_v34, 16  ;;  %v5162_v41 = vld [vmem:[%s5242_s23 + $0x30] sm:$0xff]  }
  0x3a   : > { %v2120_v9 = vshrl.u32 %v5162_v41, 16 }
  0x3b   : > { %4438 = vmatpush3.bf16.msra.mxu0 %v5363_v5  ;;  %v1840_v18 = vshll.u32 %v4031_v61, 16 }
  0x3c   : > { %4447 = vmatprep.subr.bf16.mxu0 %v5374_v24 }
  0x3e   : > { %4432 = vmatmul.mubr.msk.bf16.gmra.mrb[4].mxu0 %vm228_vm0, %v475_v55  ;;  %v861_v55 = vrot.slane %v859_v46, 1  ;;  %v1825_v46 = vshrl.u32 %v4029_v22, 16  ;;  %v1848_v22 = vshll.u32 %v4032_v7, 16 }
  0x3f   : > { %4439 = vmatprep.mubr.msk.bf16.mxu0 %vm228_vm0, %v5392_v21 }
  0x40   : > { %4536 = vmatmul.mubr.msk.bf16.vlgmr.msra.gmra.mrb[0].mxu1 %vm228_vm0, %v1559_v31  ;;  %v862_v62 = vor.u32 %v861_v55, %v857_v51  ;;  %v878_v31 = vor.u32 %v876_v16, %v874_v27  ;;  %v1829_v51 = vrot.slane %v1827_v35, 1  ;;  %v1832_v55 = vshll.u32 %v4030_v34, 16 }
  0x41   : > { %4544 = vmatpush3.bf16.msra.mxu1 %v5336_v58  ;;  %4539 = vmatprep.mubr.msk.bf16.mxu1 %vm228_vm0, %v1567_v33  ;;  %v882_v33 = vrot.slane %v880_v20, 1  ;;  %v1844_v20 = vshrl.u32 %v4031_v61, 16  ;;  %v1850_v34 = vrot.slane %v1848_v22, 1  ;;  %v5607_v61 = vld [vmem:[%s6014_s1 + $0x80] sm:$0xff]   ;;  %v5158_v22 = vld [vmem:[%s5242_s23 + $0x14] sm:$0xff]  }
  0x42   : > { %4545 = vmatprep.subr.bf16.mxu1 %v5363_v5  ;;  %v5491_v19 = vsel %vm444_vm1, %v862_v62, %v866_v63  ;;  %v1830_v62 = vor.u32 %v1829_v51, %v1825_v46  ;;  %v1834_v63 = vrot.slane %v1832_v55, 1  ;;  %v1852_v51 = vshrl.u32 %v4032_v7, 16  ;;  %6034 = vst [vmem:[#allocation9_spill] sm:$0xff] %v5607_v61 }
  0x43   : > { %v5524_v45 = vsel %vm444_vm1, %v878_v31, %v882_v33  ;;  %v5541_v14 = vor.u32 %v884_v60, %v882_v33  ;;  %v5156_v60 = vld [vmem:[%s5242_s23 + $0x4] sm:$0xff]  }
  0x44   : > { %v5552_v16 = vsel %vm444_vm1, %v1830_v62, %v1834_v63  ;;  %v1838_v31 = vor.u32 %v1836_v26, %v1834_v63  ;;  %v5586_v55 = vor.u32 %v1852_v51, %v1850_v34  ;;  %v5612_v62 = vld [vmem:[%s5242_s23 + $0x1c] ss:$0 sps:$4 sm:$0xff]   ;;  %v5157_v63 = vld [vmem:[%s5242_s23 + $0xc] sm:$0xff]   ;;  %v1250_v7 = vshll.u32 %v5156_v60, 16 }
  0x45   : > { %4546 = vmatpush3.bf16.msra.mxu1 %v5363_v5  ;;  %v1263_v51 = vshll.u32 %v5158_v22, 16 }
  0x46   : > { %4440 = vmatmul.mubr.msk.bf16.vlgmr.msra.gmra.mrb[0].mxu0 %vm228_vm0, %v5409_v37  ;;  %4555 = vmatprep.subr.bf16.mxu1 %v5374_v24  ;;  %v1252_v26 = vrot.slane %v1250_v7, 1  ;;  %v1259_v7 = vshrl.u32 %v5157_v63, 16 }
  0x47   : > { %4448 = vmatpush3.bf16.msra.mxu0 %v5374_v24  ;;  %4443 = vmatprep.mubr.msk.bf16.mxu0 %vm228_vm0, %v5412_v38 }
  0x48   : > { %4540 = vmatmul.mubr.msk.bf16.gmra.mrb[4].mxu1 %vm228_vm0, %v1570_v39  ;;  %4449 = vmatprep.subr.bf16.mxu0 %v5417_v40  ;;  %v5516_v39 = vsel %vm444_vm1, %v870_v30, %v874_v27  ;;  %v1842_v27 = vrot.slane %v1840_v18, 1  ;;  %v5564_v30 = vld [vmem:[%s6014_s1 + $0x70] sm:$0xff]   ;;  %v1248_v18 = vshrl.u32 %v5156_v60, 16  ;;  %v5635_v60 = vld [vmem:[%s6014_s1 + $0x88] sm:$0xff]  }
  0x49   : > { %4547 = vmatprep.mubr.msk.bf16.mxu1 %vm228_vm0, %v5422_v42 }
  0x4a   : > { %v1846_v33 = vor.u32 %v1844_v20, %v1842_v27  ;;  %v5571_v35 = vsel %vm444_vm1, %v1838_v31, %v1842_v27  ;;  %v1255_v20 = vshll.u32 %v5157_v63, 16  ;;  %v1253_v27 = vor.u32 %v1252_v26, %v1248_v18 }
  0x4b   : > { %4450 = vmatpush3.bf16.msra.mxu0 %v5417_v40  ;;  %v1267_v18 = vshrl.u32 %v5158_v22, 16  ;;  %v1265_v63 = vrot.slane %v1263_v51, 1 }
  0x4c   : > { %4459 = vmatprep.subr.bf16.mxu0 %v5438_v44  ;;  %v5576_v46 = vsel %vm444_vm1, %v1846_v33, %v1850_v34  ;;  %v1257_v31 = vrot.slane %v1255_v20, 1  ;;  %v5160_v33 = vld [vmem:[%s5242_s23 + $0x1c] sm:$0x1f]   ;;  %v5161_v20 = vld [vmem:[%s5242_s23 + $0x28] sm:$0xff]  }
  0x4d   : > { %v5630_v34 = vld [vmem:[%s5242_s23 + $0x40] ss:$0 sps:$4 sm:$0xff]   ;;  %v1271_v26 = vshll.u32 %v5160_v33, 16  ;;  %v2111_v25 = vshll.u32 %v5161_v20, 16  ;;  %v2109_v51 = vshrl.u32 %v5161_v20, 16 }
  0x4e   : > { %4444 = vmatmul.mubr.msk.bf16.gmra.mrb[4].mxu0 %vm228_vm0, %v5448_v49  ;;  %v5641_v4 = vsel %vm444_vm1, %v1253_v27, %v1257_v31  ;;  %v1261_v28 = vor.u32 %v1259_v7, %v1257_v31  ;;  %v1269_v27 = vor.u32 %v1267_v18, %v1265_v63  ;;  %v2116_v18 = vshll.u32 %v5162_v41, 16  ;;  %v5164_v20 = vld [vmem:[%s5242_s23 + $0x40] sm:$0x1f]  }
  0x4f   : > { %4451 = vmatprep.mubr.msk.bf16.mxu0 %vm228_vm0, %v5422_v42  ;;  %v1273_v22 = vrot.slane %v1271_v26, 1  ;;  %v2113_v7 = vrot.slane %v2111_v25, 1  ;;  %v1275_v26 = vshrl.u32 %v5160_v33, 16  ;;  %v2132_v8 = vshll.u32 %v5164_v20, 16 }
  0x50   : > { %4548 = vmatmul.mubr.msk.bf16.vlgmr.msra.gmra.mrb[0].mxu1 %vm228_vm0, %v5445_v48 }
  0x51   : > { %4556 = vmatpush3.bf16.msra.mxu1 %v5374_v24  ;;  %4551 = vmatprep.mubr.msk.bf16.mxu1 %vm228_vm0, %v5452_v53  ;;  %v5662_v31 = vsel %vm444_vm1, %v1269_v27, %v1273_v22  ;;  %v5674_v25 = vor.u32 %v1275_v26, %v1273_v22  ;;  %v2124_v27 = vshll.u32 %v5163_v10, 16 }
  0x52   : > { %4557 = vmatprep.subr.bf16.mxu1 %v5417_v40 }
  0x53   : > { %v2126_v22 = vrot.slane %v2124_v27, 1 }
  0x55   : > { %4558 = vmatpush3.bf16.msra.mxu1 %v5417_v40 }
  0x56   : > { %4452 = vmatmul.mubr.msk.bf16.vlgmr.msra.gmra.mrb[0].mxu0 %vm228_vm0, %v5445_v48  ;;  %4567 = vmatprep.subr.bf16.mxu1 %v5438_v44 }
  0x57   : > { %4460 = vmatpush3.bf16.msra.mxu0 %v5438_v44  ;;  %4455 = vmatprep.mubr.msk.bf16.mxu0 %vm228_vm0, %v5452_v53 }
  0x58   : > { %4552 = vmatmul.mubr.msk.bf16.gmra.mrb[4].mxu1 %vm228_vm0, %v5480_v11  ;;  %4461 = vmatprep.subr.bf16.mxu0 %v5485_v17 }
  0x59   : > { %4559 = vmatprep.mubr.msk.bf16.mxu1 %vm228_vm0, %v5491_v19 }
  0x5b   : > { %4462 = vmatpush3.bf16.msra.mxu0 %v5485_v17 }
  0x5c   : > { %4471 = vmatprep.subr.bf16.mxu0 %v5507_v29 }
  0x5e   : > { %4456 = vmatmul.mubr.msk.bf16.gmra.mrb[4].mxu0 %vm228_vm0, %v5480_v11 }
  0x5f   : > { %4463 = vmatprep.mubr.msk.bf16.mxu0 %vm228_vm0, %v5491_v19 }
  0x60   : > { %4560 = vmatmul.mubr.msk.bf16.vlgmr.msra.gmra.mrb[0].mxu1 %vm228_vm0, %v5516_v39 }
  0x61   : > { %4568 = vmatpush3.bf16.msra.mxu1 %v5438_v44  ;;  %4563 = vmatprep.mubr.msk.bf16.mxu1 %vm228_vm0, %v5524_v45 }
  0x62   : > { %4569 = vmatprep.subr.bf16.mxu1 %v5485_v17 }
  0x65   : > { %4570 = vmatpush3.bf16.msra.mxu1 %v5485_v17 }
  0x66   : > { %4464 = vmatmul.mubr.msk.bf16.vlgmr.msra.gmra.mrb[0].mxu0 %vm228_vm0, %v5516_v39  ;;  %4579 = vmatprep.subr.bf16.mxu1 %v5507_v29 }
  0x67   : > { %4472 = vmatpush3.bf16.msra.mxu0 %v5507_v29  ;;  %4467 = vmatprep.mubr.msk.bf16.mxu0 %vm228_vm0, %v5524_v45 }
  0x68   : > { %4564 = vmatmul.mubr.msk.bf16.gmra.mrb[4].mxu1 %vm228_vm0, %v5541_v14  ;;  %4473 = vmatprep.subr.bf16.mxu0 %v5546_v6 }
  0x69   : > { %4571 = vmatprep.mubr.msk.bf16.mxu1 %vm228_vm0, %v5552_v16 }
  0x6b   : > { %4474 = vmatpush3.bf16.msra.mxu0 %v5546_v6 }
  0x6c   : > { %4483 = vmatprep.subr.bf16.mxu0 %v5564_v30 }
  0x6e   : > { %4468 = vmatmul.mubr.msk.bf16.gmra.mrb[4].mxu0 %vm228_vm0, %v5541_v14 }
  0x6f   : > { %4475 = vmatprep.mubr.msk.bf16.mxu0 %vm228_vm0, %v5273_v13 }
  0x70   : > { %4572 = vmatmul.mubr.msk.bf16.vlgmr.msra.gmra.mrb[0].mxu1 %vm228_vm0, %v5571_v35 }
  0x71   : > { %4580 = vmatpush3.bf16.msra.mxu1 %v5507_v29  ;;  %4575 = vmatprep.mubr.msk.bf16.mxu1 %vm228_vm0, %v5576_v46 }
  0x72   : > { %4581 = vmatprep.subr.bf16.mxu1 %v5546_v6 }
  0x75   : > { %4582 = vmatpush3.bf16.msra.mxu1 %v5546_v6 }
  0x76   : > { %4476 = vmatmul.mubr.msk.bf16.vlgmr.msra.gmra.mrb[0].mxu0 %vm228_vm0, %v5276_v15  ;;  %4591 = vmatprep.subr.bf16.mxu1 %v5564_v30 }
  0x77   : > { %4484 = vmatpush3.bf16.msra.mxu0 %v5564_v30  ;;  %4479 = vmatprep.mubr.msk.bf16.mxu0 %vm228_vm0, %v5292_v32 }
  0x78   : > { %4576 = vmatmul.mubr.msk.bf16.gmra.mrb[4].mxu1 %vm228_vm0, %v5586_v55  ;;  %4485 = vmatprep.subr.bf16.mxu0 %v5591_v57 }
  0x79   : > { %4583 = vmatprep.mubr.msk.bf16.mxu1 %vm228_vm0, %v5313_v50 }
  0x7b   : > { %4486 = vmatpush3.bf16.msra.mxu0 %v5591_v57 }
  0x7c   : > { %4495 = vmatprep.subr.bf16.mxu0 %v5607_v61 }
  0x7e   : > { %4480 = vmatmul.mubr.msk.bf16.gmra.mrb[4].mxu0 %vm228_vm0, %v5612_v62 }
  0x7f   : > { %4487 = vmatprep.mubr.msk.bf16.mxu0 %vm228_vm0, %v5313_v50 }
  0x80   : > { %4584 = vmatmul.mubr.msk.bf16.vlgmr.msra.gmra.mrb[0].mxu1 %vm228_vm0, %v5307_v47 }
  0x81   : > { %4592 = vmatpush3.bf16.msra.mxu1 %v5564_v30  ;;  %4587 = vmatprep.mubr.msk.bf16.mxu1 %vm228_vm0, %v5317_v52 }
  0x82   : > { %4593 = vmatprep.subr.bf16.mxu1 %v5591_v57 }
  0x85   : > { %4594 = vmatpush3.bf16.msra.mxu1 %v5591_v57  ;;  %v5657_v57 = vsel %vm444_vm1, %v1261_v28, %v1265_v63  ;;  %v2114_v28 = vor.u32 %v2113_v7, %v2109_v51  ;;  %v2118_v63 = vrot.slane %v2116_v18, 1  ;;  %v2134_v7 = vrot.slane %v2132_v8, 1 }
  0x86   : > { %4488 = vmatmul.mubr.msk.bf16.vlgmr.msra.gmra.mrb[0].mxu0 %vm228_vm0, %v5307_v47  ;;  %4603 = vmatprep.subr.bf16.mxu1 %v5607_v61 }
  0x87   : > { %4496 = vmatpush3.bf16.msra.mxu0 %v5607_v61  ;;  %4491 = vmatprep.mubr.msk.bf16.mxu0 %vm228_vm0, %v5317_v52  ;;  %v5680_v33 = vsel %vm444_vm1, %v2114_v28, %v2118_v63  ;;  %v2122_v41 = vor.u32 %v2120_v9, %v2118_v63  ;;  %v2136_v9 = vshrl.u32 %v5164_v20, 16 }
  0x88   : > { %4588 = vmatmul.mubr.msk.bf16.gmra.mrb[4].mxu1 %vm228_vm0, %v5630_v34  ;;  %4497 = vmatprep.subr.bf16.mxu0 %v5635_v60 }
  0x89   : > { %4595 = vmatprep.mubr.msk.bf16.mxu1 %vm228_vm0, %v5641_v4  ;;  %v5709_v8 = vor.u32 %v2136_v9, %v2134_v7 }
  0x8b   : > { %4498 = vmatpush3.bf16.msra.mxu0 %v5635_v60 }
  0x8c   : > { %4615 = vmatprep.subr.bf16.mxu0 %v5218_v0 }
  0x8e   : > { %4492 = vmatmul.mubr.msk.bf16.gmra.mrb[4].mxu0 %vm228_vm0, %v5630_v34 }
  0x8f   : > { %4499 = vmatprep.mubr.msk.bf16.mxu0 %vm228_vm0, %v5641_v4 }
  0x90   : > { %4596 = vmatmul.mubr.msk.bf16.vlgmr.msra.gmra.mrb[0].mxu1 %vm228_vm0, %v5657_v57 }
  0x91   : > { %4604 = vmatpush3.bf16.msra.mxu1 %v5607_v61  ;;  %4599 = vmatprep.mubr.msk.bf16.mxu1 %vm228_vm0, %v5662_v31  ;;  %v2128_v61 = vshrl.u32 %v5163_v10, 16  ;;  %v5694_v10 = vsel %vm444_vm1, %v2122_v41, %v2126_v22 }
  0x92   : > { %4605 = vmatprep.subr.bf16.mxu1 %v5635_v60 }
  0x93   : > { %v2130_v51 = vor.u32 %v2128_v61, %v2126_v22 }
  0x95   : > { %4606 = vmatpush3.bf16.msra.mxu1 %v5635_v60  ;;  %v5699_v18 = vsel %vm444_vm1, %v2130_v51, %v2134_v7 }
  0x96   : > { %4500 = vmatmul.mubr.msk.bf16.vlgmr.msra.gmra.mrb[0].mxu0 %vm228_vm0, %v5657_v57  ;;  %4723 = vmatprep.subr.bf16.mxu1 %v5218_v0 }
  0x97   : > { %4616 = vmatpush3.bf16.msra.mxu0 %v5218_v0  ;;  %4503 = vmatprep.mubr.msk.bf16.mxu0 %vm228_vm0, %v5662_v31 }
  0x98   : > { %4600 = vmatmul.mubr.msk.bf16.gmra.mrb[4].mxu1 %vm228_vm0, %v5674_v25  ;;  %4617 = vmatprep.subr.bf16.mxu0 %v5223_v1 }
  0x99   : > { %4607 = vmatprep.mubr.msk.bf16.mxu1 %vm228_vm0, %v5680_v33 }
  0x9b   : > { %4618 = vmatpush3.bf16.msra.mxu0 %v5223_v1 }
  0x9c   : > { %4627 = vmatprep.subr.bf16.mxu0 %v5237_v2 }
  0x9e   : > { %4504 = vmatmul.mubr.msk.bf16.gmra.mrb[4].mxu0 %vm228_vm0, %v5674_v25 }
  0x9f   : > { %4619 = vmatprep.mubr.msk.bf16.mxu0 %vm228_vm0, %v5422_v42 }
  0xa0   : > { %4608 = vmatmul.mubr.msk.bf16.vlgmr.msra.gmra.mrb[0].mxu1 %vm228_vm0, %v5694_v10 }
  0xa1   : > { %4724 = vmatpush3.bf16.msra.mxu1 %v5218_v0  ;;  %4611 = vmatprep.mubr.msk.bf16.mxu1 %vm228_vm0, %v5699_v18  ;;  %v4086_v0 = vcombine.low %v5405_v36, %v5425_v43 }
  0xa2   : > { %4725 = vmatprep.subr.bf16.mxu1 %v5223_v1 }
  0xa5   : > { %4726 = vmatpush3.bf16.msra.mxu1 %v5223_v1  ;;  %v4088_v1 = vcombine.low %v5455_v54, %v5459_v59 }
  0xa6   : > { %4620 = vmatmul.mubr.msk.bf16.vlgmr.msra.gmra.mrb[8].mxu0 %vm228_vm0, %v5445_v48  ;;  %4735 = vmatprep.subr.bf16.mxu1 %v5237_v2 }
  0xa7   : > { %4628 = vmatpush3.bf16.msra.mxu0 %v5237_v2  ;;  %4623 = vmatprep.mubr.msk.bf16.mxu0 %vm228_vm0, %v5452_v53 }
  0xa8   : > { %4612 = vmatmul.mubr.msk.bf16.gmra.mrb[4].mxu1 %vm228_vm0, %v5709_v8  ;;  %4629 = vmatprep.subr.bf16.mxu0 %v5247_v3 }
  0xa9   : > { %4727 = vmatprep.mubr.msk.bf16.mxu1 %vm228_vm0, %v5491_v19 }
  0xab   : > { %4630 = vmatpush3.bf16.msra.mxu0 %v5247_v3 }
  0xac   : > { %4639 = vmatprep.subr.bf16.mxu0 %v5271_v12 }
  0xae   : > { %4624 = vmatmul.mubr.msk.bf16.gmra.mrb[12].mxu0 %vm228_vm0, %v5480_v11 }
  0xaf   : > { %4631 = vmatprep.mubr.msk.bf16.mxu0 %vm228_vm0, %v5392_v21 }
  0xb0   : > { %4728 = vmatmul.mubr.msk.bf16.vlgmr.msra.gmra.mrb[8].mxu1 %vm228_vm0, %v5516_v39 }
  0xb1   : > { %4736 = vmatpush3.bf16.msra.mxu1 %v5237_v2  ;;  %4731 = vmatprep.mubr.msk.bf16.mxu1 %vm228_vm0, %v5524_v45  ;;  %v6035_v2 = vld [vmem:[#allocation5_spill] sm:$0xff] }
  0xb2   : > { %4737 = vmatprep.subr.bf16.mxu1 %v5247_v3 }
  0xb5   : > { %4738 = vmatpush3.bf16.msra.mxu1 %v5247_v3  ;;  %v4095_v3 = vcombine.low %v6035_v2, %v5499_v23 }
  0xb6   : > { %4632 = vmatmul.mubr.msk.bf16.vlgmr.msra.gmra.mrb[8].mxu0 %vm228_vm0, %v5409_v37  ;;  %4747 = vmatprep.subr.bf16.mxu1 %v5271_v12 }
  0xb7   : > { %4640 = vmatpush3.bf16.msra.mxu0 %v5271_v12  ;;  %4635 = vmatprep.mubr.msk.bf16.mxu0 %vm228_vm0, %v5412_v38  ;;  %v6043_v38 = vld [vmem:[#allocation4_spill] sm:$0xff] }
  0xb8   : > { %4732 = vmatmul.mubr.msk.bf16.gmra.mrb[12].mxu1 %vm228_vm0, %v5541_v14  ;;  %4641 = vmatprep.subr.bf16.mxu0 %v5324_v56 }
  0xb9   : > { %4739 = vmatprep.mubr.msk.bf16.mxu1 %vm228_vm0, %v5422_v42 }
  0xbb   : > { %4642 = vmatpush3.bf16.msra.mxu0 %v5324_v56 }
  0xbc   : > { %4651 = vmatprep.subr.bf16.mxu0 %v5336_v58 }
  0xbe   : > { %4636 = vmatmul.mubr.msk.bf16.gmra.mrb[12].mxu0 %vm228_vm0, %v5448_v49 }
  0xbf   : > { %4643 = vmatprep.mubr.msk.bf16.mxu0 %vm228_vm0, %v5491_v19 }
  0xc0   : > { %4740 = vmatmul.mubr.msk.bf16.vlgmr.msra.gmra.mrb[8].mxu1 %vm228_vm0, %v5445_v48  ;;  %v5170_v48 = vld [vmem:[%s5242_s23 + $0x88] ss:$0 sps:$4 sm:$0xff]  }
  0xc1   : > { %4748 = vmatpush3.bf16.msra.mxu1 %v5271_v12  ;;  %4743 = vmatprep.mubr.msk.bf16.mxu1 %vm228_vm0, %v5452_v53  ;;  %v6036_v12 = vld [vmem:[#allocation2_spill] sm:$0xff] }
  0xc2   : > { %4749 = vmatprep.subr.bf16.mxu1 %v5324_v56 }
  0xc5   : > { %4750 = vmatpush3.bf16.msra.mxu1 %v5324_v56 }
  0xc6   : > { %4644 = vmatmul.mubr.msk.bf16.vlgmr.msra.gmra.mrb[8].mxu0 %vm228_vm0, %v5516_v39  ;;  %4759 = vmatprep.subr.bf16.mxu1 %v5336_v58 }
  0xc7   : > { %4652 = vmatpush3.bf16.msra.mxu0 %v5336_v58  ;;  %4647 = vmatprep.mubr.msk.bf16.mxu0 %vm228_vm0, %v5524_v45  ;;  %v5176_v45 = vld [vmem:[%s5242_s23 + $0x78] sm:$0xff]  }
  0xc8   : > { %4744 = vmatmul.mubr.msk.bf16.gmra.mrb[12].mxu1 %vm228_vm0, %v5480_v11  ;;  %4653 = vmatprep.subr.bf16.mxu0 %v5363_v5  ;;  %v3606_v28 = vshrl.u32 %v5176_v45, 16 }
  0xc9   : > { %4751 = vmatprep.mubr.msk.bf16.mxu1 %vm228_vm0, %v5552_v16 }
  0xcb   : > { %4654 = vmatpush3.bf16.msra.mxu0 %v5363_v5 }
  0xcc   : > { %4663 = vmatprep.subr.bf16.mxu0 %v5374_v24 }
  0xce   : > { %4648 = vmatmul.mubr.msk.bf16.gmra.mrb[12].mxu0 %vm228_vm0, %v5541_v14 }
  0xcf   : > { %4655 = vmatprep.mubr.msk.bf16.mxu0 %vm228_vm0, %v5273_v13  ;;  %v6037_v13 = vld [vmem:[#allocation3_spill] sm:$0xff] }
  0xd0   : > { %4752 = vmatmul.mubr.msk.bf16.vlgmr.msra.gmra.mrb[8].mxu1 %vm228_vm0, %v5571_v35 }
  0xd1   : > { %4760 = vmatpush3.bf16.msra.mxu1 %v5336_v58  ;;  %4755 = vmatprep.mubr.msk.bf16.mxu1 %vm228_vm0, %v5576_v46  ;;  %v6040_v58 = vld [vmem:[#allocation9_spill] sm:$0xff]  ;;  %v3602_v46 = vshll.u32 %v5176_v45, 16 }
  0xd2   : > { %4761 = vmatprep.subr.bf16.mxu1 %v5363_v5 }
  0xd5   : > { %4762 = vmatpush3.bf16.msra.mxu1 %v5363_v5  ;;  %v6042_v5 = vld [vmem:[#allocation6_spill] sm:$0xff] }
  0xd6   : > { %4656 = vmatmul.mubr.msk.bf16.vlgmr.msra.gmra.mrb[8].mxu0 %vm228_vm0, %v5276_v15  ;;  %4771 = vmatprep.subr.bf16.mxu1 %v5374_v24  ;;  %v6038_v15 = vcombine.low %v6036_v12, %v6037_v13 }
  0xd7   : > { %4664 = vmatpush3.bf16.msra.mxu0 %v5374_v24  ;;  %4659 = vmatprep.mubr.msk.bf16.mxu0 %vm228_vm0, %v5292_v32  ;;  %v5171_v32 = vld [vmem:[%s5242_s23 + $0x4c] sm:$0xff]  }
  0xd8   : > { %4756 = vmatmul.mubr.msk.bf16.gmra.mrb[12].mxu1 %vm228_vm0, %v5586_v55  ;;  %4665 = vmatprep.subr.bf16.mxu0 %v5417_v40  ;;  %v2873_v56 = vshll.u32 %v5171_v32, 16  ;;  %v2871_v21 = vshrl.u32 %v5171_v32, 16 }
  0xd9   : > { %4763 = vmatprep.mubr.msk.bf16.mxu1 %vm228_vm0, %v5313_v50 }
  0xda   : > { %v2875_v36 = vrot.slane %v2873_v56, 1 }
  0xdb   : > { %4666 = vmatpush3.bf16.msra.mxu0 %v5417_v40 }
  0xdc   : > { %4675 = vmatprep.subr.bf16.mxu0 %v5438_v44  ;;  %v2876_v42 = vor.u32 %v2875_v36, %v2871_v21 }
  0xde   : > { %4660 = vmatmul.mubr.msk.bf16.gmra.mrb[12].mxu0 %vm228_vm0, %v5612_v62  ;;  %v3604_v62 = vrot.slane %v3602_v46, 1 }
  0xdf   : > { %4667 = vmatprep.mubr.msk.bf16.mxu0 %vm228_vm0, %v5313_v50  ;;  %v5168_v50 = vld [vmem:[%s5242_s23 + $0x64] ss:$0 sps:$4 sm:$0xff]  }
  0xe0   : > { %4764 = vmatmul.mubr.msk.bf16.vlgmr.msra.gmra.mrb[8].mxu1 %vm228_vm0, %v5307_v47 }
  0xe1   : > { %4772 = vmatpush3.bf16.msra.mxu1 %v5374_v24  ;;  %4767 = vmatprep.mubr.msk.bf16.mxu1 %vm228_vm0, %v5317_v52 }
  0xe2   : > { %4773 = vmatprep.subr.bf16.mxu1 %v5417_v40 }
  0xe5   : > { %4774 = vmatpush3.bf16.msra.mxu1 %v5417_v40  ;;  %v5173_v40 = vld [vmem:[%s5242_s23 + $0x5c] sm:$0xff]  }
  0xe6   : > { %4668 = vmatmul.mubr.msk.bf16.vlgmr.msra.gmra.mrb[8].mxu0 %vm228_vm0, %v5307_v47  ;;  %4783 = vmatprep.subr.bf16.mxu1 %v5438_v44  ;;  %v6039_v47 = vld [vmem:[#allocation8_spill] sm:$0xff]  ;;  %v2886_v49 = vshll.u32 %v5173_v40, 16  ;;  %v2890_v59 = vshrl.u32 %v5173_v40, 16 }
  0xe7   : > { %4676 = vmatpush3.bf16.msra.mxu0 %v5438_v44  ;;  %4671 = vmatprep.mubr.msk.bf16.mxu0 %vm228_vm0, %v5317_v52  ;;  %v5172_v52 = vld [vmem:[%s5242_s23 + $0x54] sm:$0xff]  }
  0xe8   : > { %4768 = vmatmul.mubr.msk.bf16.gmra.mrb[12].mxu1 %vm228_vm0, %v5630_v34  ;;  %4677 = vmatprep.subr.bf16.mxu0 %v5485_v17  ;;  %v2878_v37 = vshll.u32 %v5172_v52, 16  ;;  %v2882_v53 = vshrl.u32 %v5172_v52, 16  ;;  %v2888_v19 = vrot.slane %v2886_v49, 1 }
  0xe9   : > { %4775 = vmatprep.mubr.msk.bf16.mxu1 %vm228_vm0, %v5641_v4 }
  0xea   : > { %v2880_v43 = vrot.slane %v2878_v37, 1 }
  0xeb   : > { %4678 = vmatpush3.bf16.msra.mxu0 %v5485_v17 }
  0xec   : > { %4687 = vmatprep.subr.bf16.mxu0 %v5507_v29  ;;  %v2881_v54 = vsel %vm444_vm1, %v2876_v42, %v2880_v43  ;;  %v2884_v23 = vor.u32 %v2882_v53, %v2880_v43 }
  0xee   : > { %4672 = vmatmul.mubr.msk.bf16.gmra.mrb[12].mxu0 %vm228_vm0, %v5630_v34  ;;  %v5178_v34 = vld [vmem:[%s5242_s23 + $0x88] sm:$0x1f]  }
  0xef   : > { %4679 = vmatprep.mubr.msk.bf16.mxu0 %vm228_vm0, %v5641_v4  ;;  %v6041_v4 = vld [vmem:[#allocation7_spill] sm:$0xff]  ;;  %v3622_v7 = vshrl.u32 %v5178_v34, 16 }
  0xf0   : > { %4776 = vmatmul.mubr.msk.bf16.vlgmr.msra.gmra.mrb[8].mxu1 %vm228_vm0, %v5657_v57  ;;  %v4097_v24 = vcombine.low %v6042_v5, %v6041_v4 }
  0xf1   : > { %4784 = vmatpush3.bf16.msra.mxu1 %v5438_v44  ;;  %4779 = vmatprep.mubr.msk.bf16.mxu1 %vm228_vm0, %v5662_v31  ;;  %v5174_v44 = vld [vmem:[%s5242_s23 + $0x64] sm:$0x1f]  }
  0xf2   : > { %4785 = vmatprep.subr.bf16.mxu1 %v5485_v17  ;;  %v2894_v11 = vshll.u32 %v5174_v44, 16  ;;  %v2898_v55 = vshrl.u32 %v5174_v44, 16 }
  0xf4   : > { %v2896_v39 = vrot.slane %v2894_v11, 1 }
  0xf5   : > { %4786 = vmatpush3.bf16.msra.mxu1 %v5485_v17  ;;  %v5175_v17 = vld [vmem:[%s5242_s23 + $0x70] sm:$0xff]  }
  0xf6   : > { %4680 = vmatmul.mubr.msk.bf16.vlgmr.msra.gmra.mrb[8].mxu0 %vm228_vm0, %v5657_v57  ;;  %4795 = vmatprep.subr.bf16.mxu1 %v5507_v29  ;;  %v3597_v14 = vshll.u32 %v5175_v17, 16  ;;  %v5177_v57 = vld [vmem:[%s5242_s23 + $0x80] sm:$0xff]  }
  0xf7   : > { %4688 = vmatpush3.bf16.msra.mxu0 %v5507_v29  ;;  %4683 = vmatprep.mubr.msk.bf16.mxu0 %vm228_vm0, %v5662_v31  ;;  %v2900_v31 = vor.u32 %v2898_v55, %v2896_v39  ;;  %v3610_v26 = vshll.u32 %v5177_v57, 16  ;;  %v3614_v20 = vshrl.u32 %v5177_v57, 16 }
  0xf8   : > { %4780 = vmatmul.mubr.msk.bf16.gmra.mrb[12].mxu1 %vm228_vm0, %v5674_v25  ;;  %4689 = vmatprep.subr.bf16.mxu0 %v5546_v6  ;;  %v3599_v35 = vrot.slane %v3597_v14, 1 }
  0xf9   : > { %4787 = vmatprep.mubr.msk.bf16.mxu1 %vm228_vm0, %v5680_v33  ;;  %v3612_v27 = vrot.slane %v3610_v26, 1  ;;  %v3608_v33 = vor.u32 %v3606_v28, %v3604_v62 }
  0xfb   : > { %4690 = vmatpush3.bf16.msra.mxu0 %v5546_v6  ;;  %v3616_v22 = vor.u32 %v3614_v20, %v3612_v27  ;;  %v3613_v51 = vsel %vm444_vm1, %v3608_v33, %v3612_v27 }
  0xfc   : > { %4699 = vmatprep.subr.bf16.mxu0 %v5564_v30 }
  0xfe   : > { %4684 = vmatmul.mubr.msk.bf16.gmra.mrb[12].mxu0 %vm228_vm0, %v5674_v25  ;;  %v3618_v25 = vshll.u32 %v5178_v34, 16 }
  0xff   : > { %4691 = vmatprep.mubr.msk.bf16.mxu0 %vm228_vm0, %v4086_v0 }
 0x100   : > { %4788 = vmatmul.mubr.msk.bf16.vlgmr.msra.gmra.mrb[8].mxu1 %vm228_vm0, %v5694_v10  ;;  %v3620_v41 = vrot.slane %v3618_v25, 1 }
 0x101   : > { %4796 = vmatpush3.bf16.msra.mxu1 %v5507_v29  ;;  %4791 = vmatprep.mubr.msk.bf16.mxu1 %vm228_vm0, %v5699_v18  ;;  %v2892_v29 = vor.u32 %v2890_v59, %v2888_v19 }
 0x102   : > { %4797 = vmatprep.subr.bf16.mxu1 %v5546_v6  ;;  %v3624_v10 = vor.u32 %v3622_v7, %v3620_v41 }
 0x103   : > { %v2897_v16 = vsel %vm444_vm1, %v2892_v29, %v2896_v39 }
 0x105   : > { %4798 = vmatpush3.bf16.msra.mxu1 %v5546_v6  ;;  %v2889_v6 = vsel %vm444_vm1, %v2884_v23, %v2888_v19 }
 0x106   : > { %4692 = vmatmul.mubr.msk.bf16.vlgmr.msra.gmra.mrb[8].mxu0 %vm228_vm0, %v6038_v15  ;;  %4807 = vmatprep.subr.bf16.mxu1 %v5564_v30 }
 0x107   : > { %4700 = vmatpush3.bf16.msra.mxu0 %v5564_v30  ;;  %4695 = vmatprep.mubr.msk.bf16.mxu0 %vm228_vm0, %v4088_v1  ;;  %v5927_v1 = vld [vmem:[%s6015_s2] ss:$0 sm:$0xff] }
 0x108   : > { %4792 = vmatmul.mubr.msk.bf16.gmra.mrb[12].mxu1 %vm228_vm0, %v5709_v8  ;;  %4701 = vmatprep.subr.bf16.mxu0 %v6039_v47 }
 0x109   : > { %4799 = vmatprep.mubr.msk.bf16.mxu1 %vm228_vm0, %v4095_v3 }
 0x10b   : > { %4702 = vmatpush3.bf16.msra.mxu0 %v6039_v47 }
 0x10c   : > { %4711 = vmatprep.subr.bf16.mxu0 %v6040_v58 }
 0x10e   : > { %4696 = vmatmul.mubr.msk.bf16.gmra.mrb[12].mxu0 %vm228_vm0, %v5168_v50 }
 0x10f   : > { %4703 = vmatprep.mubr.msk.bf16.mxu0 %vm228_vm0, %v4095_v3  ;;  %v5933_v3 = vld [vmem:[%s6015_s2 + $0x1] ss:$0 sm:$0xff] }
 0x110   : > { %4800 = vmatmul.mubr.msk.bf16.vlgmr.msra.gmra.mrb[8].mxu1 %vm228_vm0, %v6043_v38 }
 0x111   : > { %4808 = vmatpush3.bf16.msra.mxu1 %v5564_v30  ;;  %4803 = vmatprep.mubr.msk.bf16.mxu1 %vm228_vm0, %v4097_v24  ;;  %v3595_v30 = vshrl.u32 %v5175_v17, 16 }
 0x112   : > { %4809 = vmatprep.subr.bf16.mxu1 %v6039_v47 }
 0x113   : > { %v3600_v61 = vor.u32 %v3599_v35, %v3595_v30 }
 0x115   : > { %4810 = vmatpush3.bf16.msra.mxu1 %v6039_v47  ;;  %v3605_v63 = vsel %vm444_vm1, %v3600_v61, %v3604_v62 }
 0x116   : > { %4704 = vmatmul.mubr.msk.bf16.vlgmr.msra.gmra.mrb[8].mxu0 %vm228_vm0, %v6043_v38  ;;  %4819 = vmatprep.subr.bf16.mxu1 %v6040_v58 }
 0x117   : > { %4712 = vmatpush3.bf16.msra.mxu0 %v6040_v58  ;;  %4707 = vmatprep.mubr.msk.bf16.mxu0 %vm228_vm0, %v4097_v24 }
 0x118   : > { %4804 = vmatmul.mubr.msk.bf16.gmra.mrb[12].mxu1 %vm228_vm0, %v5170_v48  ;;  %4713 = vmatprep.subr.bf16.mxu0 %v5635_v60 }
 0x119   : > { %4811 = vmatprep.mubr.msk.bf16.mxu1 %vm228_vm0, %v2881_v54 }
 0x11b   : > { %4714 = vmatpush3.bf16.msra.mxu0 %v5635_v60 }
 0x11e   : > { %4708 = vmatmul.mubr.msk.bf16.gmra.mrb[12].mxu0 %vm228_vm0, %v5170_v48 }
 0x11f   : > { %4715 = vmatprep.mubr.msk.bf16.mxu0 %vm228_vm0, %v2881_v54 }
 0x120   : > { %4812 = vmatmul.mubr.msk.bf16.vlgmr.msra.gmra.mrb[8].mxu1 %vm228_vm0, %v2889_v6 }
 0x121   : > { %4820 = vmatpush3.bf16.msra.mxu1 %v6040_v58  ;;  %4815 = vmatprep.mubr.msk.bf16.mxu1 %vm228_vm0, %v2897_v16 }
 0x122   : > { %4821 = vmatprep.subr.bf16.mxu1 %v5635_v60 }
 0x125   : > { %4822 = vmatpush3.bf16.msra.mxu1 %v5635_v60  ;;  %v3621_v60 = vsel %vm444_vm1, %v3616_v22, %v3620_v41 }
 0x126   : > { %4716 = vmatmul.mubr.msk.bf16.vlgmr.msra.gmra.mrb[8].mxu0 %vm228_vm0, %v2889_v6 }
 0x127   : > { %4719 = vmatprep.mubr.msk.bf16.mxu0 %vm228_vm0, %v2897_v16 }
 0x128   : > { %4816 = vmatmul.mubr.msk.bf16.gmra.mrb[12].mxu1 %vm228_vm0, %v2900_v31 }
 0x129   : > { %4823 = vmatprep.mubr.msk.bf16.mxu1 %vm228_vm0, %v3605_v63 }
 0x12e   : > { %4720 = vmatmul.mubr.msk.bf16.gmra.mrb[12].mxu0 %vm228_vm0, %v2900_v31 }
 0x130   : > { %4824 = vmatmul.mubr.msk.bf16.vlgmr.msra.gmra.mrb[8].mxu1 %vm228_vm0, %v3613_v51 }
 0x131   : > { %4827 = vmatprep.mubr.msk.bf16.mxu1 %vm228_vm0, %v3621_v60 }
 0x138   : > { %4828 = vmatmul.mubr.msk.bf16.gmra.mrb[12].mxu1 %vm228_vm0, %v3624_v10 }
 0x169   : > { %v4501_v18 = vpop.f32.mrb[0].mxu0 }
 0x16a   : > { %v1336_v9 = vpop.f32.mrb[1].mxu0  ;;  %v1379_v2 = vmul.f32 %v4501_v18, %v5927_v1 }
 0x16b   : > { %v4502_v8 = vpop.f32.mrb[2].mxu0  ;;  %v1377_v12 = vmul.f32 %v5927_v1, %v1336_v9 }
 0x16c   : > { %v1339_v0 = vpop.f32.mrb[3].mxu0  ;;  %v1380_v15 = vmul.f32 %v4502_v8, %v5927_v1  ;;  %v1390_v56 = vadd.f32 %v5933_v3, %v1379_v2 }
 0x16d   : > { %v1378_v47 = vmul.f32 %v5927_v1, %v1339_v0  ;;  %v1388_v24 = vadd.f32 %v5933_v3, %v1377_v12 }
 0x16e   : > { %v1391_v37 = vadd.f32 %v5933_v3, %v1380_v15  ;;  %v1397_v49 = vmax.f32 %v1390_v56, 0.0 }
 0x16f   : > { %v1389_v43 = vadd.f32 %v5933_v3, %v1378_v47  ;;  %v1395_v11 = vmax.f32 %v1388_v24, 0.0 }
 0x170   : > { %v1398_v29 = vmax.f32 %v1391_v37, 0.0 }
 0x171   : > { %v4505_v13 = vpop.f32.mrb[4].mxu0  ;;  %v1396_v14 = vmax.f32 %v1389_v43, 0.0 }
 0x172   : > { %v1352_v32 = vpop.f32.mrb[5].mxu0  ;;  %v1383_v54 = vmul.f32 %v4505_v13, %v5927_v1 }
 0x173   : > { %v4609_v50 = vpop.f32.mrb[0].mxu1  ;;  %v4506_v52 = vpop.f32.mrb[6].mxu0  ;;  %v1381_v19 = vmul.f32 %v5927_v1, %v1352_v32 }
 0x174   : > { %v2224_v58 = vmul.f32 %v4609_v50, %v5927_v1  ;;  %v2185_v4 = vpop.f32.mrb[1].mxu1  ;;  %v1355_v5 = vpop.f32.mrb[7].mxu0  ;;  %v1394_v46 = vadd.f32 %v5933_v3, %v1383_v54 }
 0x175   : > { %v2222_v21 = vmul.f32 %v5927_v1, %v2185_v4  ;;  %v4610_v36 = vpop.f32.mrb[2].mxu1  ;;  %v1382_v30 = vmul.f32 %v5927_v1, %v1355_v5  ;;  %v1392_v62 = vadd.f32 %v5933_v3, %v1381_v19 }
 0x176   : > { %v2231_v38 = vadd.f32 %v5933_v3, %v2224_v58  ;;  %v2225_v40 = vmul.f32 %v4610_v36, %v5927_v1  ;;  %v2188_v42 = vpop.f32.mrb[3].mxu1  ;;  %v1401_v33 = vmax.f32 %v1394_v46, 0.0 }
 0x177   : > { %v2229_v44 = vadd.f32 %v5933_v3, %v2222_v21  ;;  %v2223_v48 = vmul.f32 %v5927_v1, %v2188_v42  ;;  %v1393_v20 = vadd.f32 %v5933_v3, %v1382_v30  ;;  %v1399_v41 = vmax.f32 %v1392_v62, 0.0 }
 0x178   : > { %v2238_v53 = vmax.f32 %v2231_v38, 0.0  ;;  %v2232_v59 = vadd.f32 %v5933_v3, %v2225_v40 }
 0x179   : > { %v2236_v17 = vmax.f32 %v2229_v44, 0.0  ;;  %v2230_v23 = vadd.f32 %v5933_v3, %v2223_v48  ;;  %v1400_v10 = vmax.f32 %v1393_v20, 0.0 }
 0x17a   : > { %v2245_v39 = vmax.f32 %v1397_v49, %v2238_v53  ;;  %v2239_v45 = vmax.f32 %v2232_v59, 0.0 }
 0x17b   : > { %v2243_v6 = vmax.f32 %v1395_v11, %v2236_v17  ;;  %v2237_v16 = vmax.f32 %v2230_v23, 0.0  ;;  %v4613_v35 = vpop.f32.mrb[4].mxu1 }
 0x17c   : > { %v2246_v55 = vmax.f32 %v1398_v29, %v2239_v45  ;;  %v2228_v57 = vmul.f32 %v4613_v35, %v5927_v1  ;;  %v2201_v61 = vpop.f32.mrb[5].mxu1 }
 0x17d   : > { %v2244_v34 = vmax.f32 %v1396_v14, %v2237_v16  ;;  %v2226_v31 = vmul.f32 %v5927_v1, %v2201_v61  ;;  %v4614_v26 = vpop.f32.mrb[6].mxu1 }
 0x17e   : > { %v2235_v28 = vadd.f32 %v5933_v3, %v2228_v57  ;;  %v2204_v63 = vpop.f32.mrb[7].mxu1 }
 0x17f   : > { %v2233_v25 = vadd.f32 %v5933_v3, %v2226_v31  ;;  %v2227_v27 = vmul.f32 %v5927_v1, %v2204_v63 }
 0x180   : > { %v2242_v22 = vmax.f32 %v2235_v28, 0.0 }
 0x181   : > { %v2240_v51 = vmax.f32 %v2233_v25, 0.0  ;;  %v2234_v60 = vadd.f32 %v5933_v3, %v2227_v27 }
 0x182   : > { %v2249_v7 = vmax.f32 %v1401_v33, %v2242_v22 }
 0x183   : > { %v2247_v18 = vmax.f32 %v1399_v41, %v2240_v51  ;;  %v2241_v9 = vmax.f32 %v2234_v60, 0.0 }
 0x185   : > { %v2248_v8 = vmax.f32 %v1400_v10, %v2241_v9 }
 0x1f9   : > { %v4717_v0 = vpop.f32.mrb[8].mxu0 }
 0x1fa   : > { %v2986_v2 = vmul.f32 %v4717_v0, %v5927_v1  ;;  %v2947_v12 = vpop.f32.mrb[9].mxu0 }
 0x1fb   : > { %v2984_v13 = vmul.f32 %v5927_v1, %v2947_v12  ;;  %v4718_v15 = vpop.f32.mrb[10].mxu0 }
 0x1fc   : > { %v2993_v32 = vadd.f32 %v5933_v3, %v2986_v2  ;;  %v2987_v47 = vmul.f32 %v4718_v15, %v5927_v1  ;;  %v2950_v50 = vpop.f32.mrb[11].mxu0 }
 0x1fd   : > { %v2991_v52 = vadd.f32 %v5933_v3, %v2984_v13  ;;  %v2985_v56 = vmul.f32 %v5927_v1, %v2950_v50 }
 0x1fe   : > { %v3000_v58 = vmax.f32 %v2993_v32, 0.0  ;;  %v2994_v4 = vadd.f32 %v5933_v3, %v2987_v47 }
 0x1ff   : > { %v2998_v5 = vmax.f32 %v2991_v52, 0.0  ;;  %v2992_v24 = vadd.f32 %v5933_v3, %v2985_v56 }
 0x200   : > { %v3007_v21 = vmax.f32 %v2245_v39, %v3000_v58  ;;  %v3001_v36 = vmax.f32 %v2994_v4, 0.0 }
 0x201   : > { %v3005_v37 = vmax.f32 %v2243_v6, %v2998_v5  ;;  %v2999_v38 = vmax.f32 %v2992_v24, 0.0  ;;  %v4721_v40 = vpop.f32.mrb[12].mxu0 }
 0x202   : > { %v3008_v42 = vmax.f32 %v2246_v55, %v3001_v36  ;;  %v2990_v43 = vmul.f32 %v4721_v40, %v5927_v1  ;;  %v2963_v44 = vpop.f32.mrb[13].mxu0 }
 0x203   : > { %v3006_v48 = vmax.f32 %v2244_v34, %v2999_v38  ;;  %v4825_v49 = vpop.f32.mrb[8].mxu1  ;;  %v2988_v53 = vmul.f32 %v5927_v1, %v2963_v44  ;;  %v4722_v54 = vpop.f32.mrb[14].mxu0 }
 0x204   : > { %v3710_v59 = vmul.f32 %v4825_v49, %v5927_v1  ;;  %v2997_v11 = vadd.f32 %v5933_v3, %v2990_v43  ;;  %v3671_v17 = vpop.f32.mrb[9].mxu1  ;;  %v2966_v19 = vpop.f32.mrb[15].mxu0 }
 0x205   : > { %v3708_v23 = vmul.f32 %v5927_v1, %v3671_v17  ;;  %v2995_v29 = vadd.f32 %v5933_v3, %v2988_v53  ;;  %v4826_v39 = vpop.f32.mrb[10].mxu1  ;;  %v2989_v45 = vmul.f32 %v5927_v1, %v2966_v19 }
 0x206   : > { %v3717_v14 = vadd.f32 %v5933_v3, %v3710_v59  ;;  %v3004_v6 = vmax.f32 %v2997_v11, 0.0  ;;  %v3711_v16 = vmul.f32 %v4826_v39, %v5927_v1  ;;  %v3674_v30 = vpop.f32.mrb[11].mxu1 }
 0x207   : > { %v3715_v35 = vadd.f32 %v5933_v3, %v3708_v23  ;;  %v3002_v46 = vmax.f32 %v2995_v29, 0.0  ;;  %v3709_v55 = vmul.f32 %v5927_v1, %v3674_v30  ;;  %v2996_v57 = vadd.f32 %v5933_v3, %v2989_v45 }
 0x208   : > { %v3724_v61 = vmax.f32 %v3717_v14, 0.0  ;;  %v3011_v62 = vmax.f32 %v2249_v7, %v3004_v6  ;;  %v3718_v34 = vadd.f32 %v5933_v3, %v3711_v16 }
 0x209   : > { %v3722_v31 = vmax.f32 %v3715_v35, 0.0  ;;  %v3009_v26 = vmax.f32 %v2247_v18, %v3002_v46  ;;  %v3716_v28 = vadd.f32 %v5933_v3, %v3709_v55  ;;  %v3003_v63 = vmax.f32 %v2996_v57, 0.0 }
 0x20a   : > { %v3731_v20 = vmax.f32 %v3007_v21, %v3724_v61  ;;  %v3725_v25 = vmax.f32 %v3718_v34, 0.0 }
 0x20b   : > { %v3729_v27 = vmax.f32 %v3005_v37, %v3722_v31  ;;  %v3723_v33 = vmax.f32 %v3716_v28, 0.0  ;;  %v3010_v22 = vmax.f32 %v2248_v8, %v3003_v63  ;;  %v4829_v41 = vpop.f32.mrb[12].mxu1 }
 0x20c   : > { %v4178_v51 = vpack.c.bf16 %v3731_v20, %v3731_v20  ;;  %v3732_v60 = vmax.f32 %v3008_v42, %v3725_v25  ;;  %v3714_v7 = vmul.f32 %v4829_v41, %v5927_v1  ;;  %v3687_v10 = vpop.f32.mrb[13].mxu1 }
 0x20d   : > { %v4176_v18 = vpack.c.bf16 %v3729_v27, %v3729_v27  ;;  %v3730_v9 = vmax.f32 %v3006_v48, %v3723_v33  ;;  %v3712_v0 = vmul.f32 %v5927_v1, %v3687_v10  ;;  %v4830_v2 = vpop.f32.mrb[14].mxu1 }
 0x20e   : > { %3768 = vst.msk [vmem:[%s5988_s8 + $0x8] sm:$0xf] %vm3765_vm2, %v4178_v51  ;;  %v4179_v12 = vpack.c.bf16 %v3732_v60, %v3732_v60  ;;  %v3721_v13 = vadd.f32 %v5933_v3, %v3714_v7  ;;  %v3690_v15 = vpop.f32.mrb[15].mxu1 }
 0x20f   : > { %3766 = vst.msk [vmem:[%s5988_s8] sm:$0xf] %vm3765_vm2, %v4176_v18  ;;  %v4177_v8 = vpack.c.bf16 %v3730_v9, %v3730_v9  ;;  %v3719_v32 = vadd.f32 %v5933_v3, %v3712_v0  ;;  %v3713_v47 = vmul.f32 %v5927_v1, %v3690_v15 }
 0x210   : > { %3769 = vst.msk [vmem:[%s5988_s8 + $0xc] sm:$0xf] %vm3765_vm2, %v4179_v12  ;;  %v3728_v50 = vmax.f32 %v3721_v13, 0.0 }
 0x211   : > { %3767 = vst.msk [vmem:[%s5988_s8 + $0x4] sm:$0xf] %vm3765_vm2, %v4177_v8  ;;  %v3726_v52 = vmax.f32 %v3719_v32, 0.0  ;;  %v3720_v56 = vadd.f32 %v5933_v3, %v3713_v47 }
 0x212   : > { %v3735_v58 = vmax.f32 %v3011_v62, %v3728_v50 }
 0x213   : > { %v3733_v4 = vmax.f32 %v3009_v26, %v3726_v52  ;;  %v3727_v5 = vmax.f32 %v3720_v56, 0.0 }
 0x214   : > { %v4182_v24 = vpack.c.bf16 %v3735_v58, %v3735_v58 }
 0x215   : > { %v4180_v21 = vpack.c.bf16 %v3733_v4, %v3733_v4  ;;  %v3734_v36 = vmax.f32 %v3010_v22, %v3727_v5 }
 0x216   : > { %3772 = vst.msk [vmem:[%s5988_s8 + $0x18] sm:$0xf] %vm3765_vm2, %v4182_v24 }
 0x217   : > { %3770 = vst.msk [vmem:[%s5988_s8 + $0x10] sm:$0xf] %vm3765_vm2, %v4180_v21  ;;  %v4181_v37 = vpack.c.bf16 %v3734_v36, %v3734_v36 }
 0x219   : > { %3771 = vst.msk [vmem:[%s5988_s8 + $0x14] sm:$0xf] %vm3765_vm2, %v4181_v37 }
 0x21a PF: > { %s13_s12 = sadd.s32 1, %s5185_s12  }
 0x21b   : > { %p10_p4 = scmp.ge.s32.totalorder %s13_s12, 4  }
 0x21d   :  { %12 = sbr.rel (!%p10_p4) target bundleno = 1 (0x1), region = 73 }

</bundles_post_ra>
